<compile_context>
chip_gen: v7x
topology: tpu7x:2x2x1
jax: 0.10.0
libtpu: 0.0.40
codegen_flags: <defaults>
</compile_context>

<pallas_src>
import jax
import jax.numpy as jnp
from jax.experimental import pallas as pl
from jax.experimental.pallas import tpu as pltpu

EPS = 1e-3  # BatchNorm2d eps=0.001


# ---------------------------------------------------------------------------
# Kernel: conv-as-matmul (bf16 in, f32 acc) + fused training-mode BatchNorm
# ---------------------------------------------------------------------------
def _conv_bn_kernel(patch_ref, w_ref, gamma_ref, beta_ref, o_ref):
    # patch_ref: (P, Kpad)  bf16      P = N*Ho*Wo, Kpad = 512
    # w_ref    : (Kpad, Cout) bf16
    # gamma/beta: (1, Cout) f32
    # o_ref    : (P, Cout) f32
    out = jnp.dot(patch_ref[...], w_ref[...],
                  preferred_element_type=jnp.float32)          # (P, Cout) f32

    # One-pass batch statistics (biased variance, training-mode BN).
    inv_p = 1.0 / out.shape[0]
    s1 = jnp.sum(out, axis=0, keepdims=True)                   # (1, Cout)
    s2 = jnp.sum(out * out, axis=0, keepdims=True)             # (1, Cout)
    mean = s1 * inv_p
    var = s2 * inv_p - mean * mean

    # Fold BN into a per-channel affine: y = out * scale + shift
    scale = gamma_ref[...] * jax.lax.rsqrt(var + EPS)           # (1, Cout)
    shift = beta_ref[...] - mean * scale                        # (1, Cout)
    o_ref[...] = out * scale + shift


# ---------------------------------------------------------------------------
# Wrapper
# ---------------------------------------------------------------------------
def add_conv_bn(x50, x44, weight, gamma, beta):
    """x50, x44: (N, Cin, H, W) f32;  weight: (Cout, Cin, 3, 3);  gamma/beta: (Cout,)."""
    N, Cin, H, W = x50.shape
    Cout = weight.shape[0]
    KH = KW = 3
    S = 2
    Ho = (H + 2 - KH) // S + 1
    Wo = (W + 2 - KW) // S + 1

    # ---- XLA-fused data-movement glue: add, NHWC, pad, im2col, bf16 cast ----
    x = x50 + x44                                               # (N,Cin,H,W) f32
    x = jnp.transpose(x, (0, 2, 3, 1)).astype(jnp.bfloat16)     # NHWC bf16
    xp = jnp.pad(x, ((0, 0), (1, 1), (1, 1), (0, 0)))           # (N,H+2,W+2,Cin)

    cols = []
    for kh in range(KH):
        for kw in range(KW):
            cols.append(xp[:, kh:kh + S * Ho - 1:S, kw:kw + S * Wo - 1:S, :])
    # patch column layout: index = (kh*KW + kw)*Cin + cin
    patches = jnp.concatenate(cols, axis=-1).reshape(N * Ho * Wo, KH * KW * Cin)

    K = KH * KW * Cin                         # 432
    Kpad = ((K + 127) // 128) * 128           # 512 (multiple of 128 lanes)
    patches = jnp.pad(patches, ((0, 0), (0, Kpad - K)))         # bf16, zero pad

    # weight (Cout, Cin, kh, kw) -> (kh, kw, Cin, Cout) -> (K, Cout), pad rows.
    wmat = jnp.transpose(weight, (2, 3, 1, 0)).reshape(K, Cout)
    wmat = jnp.pad(wmat, ((0, Kpad - K), (0, 0))).astype(jnp.bfloat16)

    P = N * Ho * Wo

    out2d = pl.pallas_call(
        _conv_bn_kernel,
        out_shape=jax.ShapeDtypeStruct((P, Cout), jnp.float32),
        grid=(1,),
        in_specs=[pl.BlockSpec((P, Kpad), lambda i: (0, 0)),
                  pl.BlockSpec((Kpad, Cout), lambda i: (0, 0)),
                  pl.BlockSpec((1, Cout), lambda i: (0, 0)),
                  pl.BlockSpec((1, Cout), lambda i: (0, 0))],
        out_specs=pl.BlockSpec((P, Cout), lambda i: (0, 0)),
        compiler_params=pltpu.CompilerParams(
            dimension_semantics=("arbitrary",),
            vmem_limit_bytes=16 << 20),
    )(patches, wmat, gamma.reshape(1, Cout), beta.reshape(1, Cout))

    # Back to NCHW to match the PyTorch module's return layout.
    # (A downstream TPU consumer should prefer the (P, Cout) / NHWC form.)
    return out2d.reshape(N, Ho, Wo, Cout).transpose(0, 3, 1, 2)


# ---------------------------------------------------------------------------
# Pure-JAX reference (f32) for a sanity check
# ---------------------------------------------------------------------------
def reference(x50, x44, weight, gamma, beta):
    x = x50 + x44
    y = jax.lax.conv_general_dilated(
        x, weight, window_strides=(2, 2), padding=((1, 1), (1, 1)),
        dimension_numbers=("NCHW", "OIHW", "NCHW"))
    mean = y.mean(axis=(0, 2, 3), keepdims=True)
    var = jnp.square(y - mean).mean(axis=(0, 2, 3), keepdims=True)
    yn = (y - mean) / jnp.sqrt(var + EPS)
    return yn * gamma.reshape(1, -1, 1, 1) + beta.reshape(1, -1, 1, 1)


if __name__ == "__main__":
    key = jax.random.PRNGKey(0)
    k1, k2, k3, k4, k5 = jax.random.split(key, 5)

    N, Cin, H, W = 1, 48, 56, 56
    Cout = 192

    x50 = jax.random.normal(k1, (N, Cin, H, W), dtype=jnp.float32)
    x44 = jax.random.normal(k2, (N, Cin, H, W), dtype=jnp.float32)
    weight = jax.random.normal(k3, (Cout, Cin, 3, 3), dtype=jnp.float32) * 0.05
    gamma = 1.0 + 0.1 * jax.random.normal(k4, (Cout,), dtype=jnp.float32)
    beta = 0.1 * jax.random.normal(k5, (Cout,), dtype=jnp.float32)

    out = add_conv_bn(x50, x44, weight, gamma, beta)
    out = jax.block_until_ready(out)

    ref = jax.block_until_ready(reference(x50, x44, weight, gamma, beta))
    assert out.shape == (N, Cout, 28, 28), out.shape
    max_diff = float(jnp.max(jnp.abs(out - ref)))
    assert max_diff < 1e-1, f"max diff too large: {max_diff}"

    print("KERNEL_OK")
</pallas_src>

<mosaic_0001>
module attributes {stable_mosaic.version = 11 : i64} {
  func.func @_conv_bn_kernel(%arg0: i32, %arg1: memref<784x512xbf16, #tpu.memory_space<vmem>>, %arg2: memref<512x192xbf16, #tpu.memory_space<vmem>>, %arg3: memref<1x192xf32, #tpu.memory_space<vmem>>, %arg4: memref<1x192xf32, #tpu.memory_space<vmem>>, %arg5: memref<784x192xf32, #tpu.memory_space<vmem>>) attributes {dimension_semantics = [#tpu.dimension_semantics<arbitrary>], iteration_bounds = array<i64: 1>, scalar_prefetch = 0 : i64, scratch_operands = 0 : i64, tpu.core_type = #tpu.core_type<tc>, window_params = [{pipeline_mode = #tpu.pipeline_mode<synchronous>, transform_indices = @transform_0, window_bounds = array<i64: 784, 512>}, {pipeline_mode = #tpu.pipeline_mode<synchronous>, transform_indices = @transform_1, window_bounds = array<i64: 512, 192>}, {pipeline_mode = #tpu.pipeline_mode<synchronous>, transform_indices = @transform_2, window_bounds = array<i64: 1, 192>}, {pipeline_mode = #tpu.pipeline_mode<synchronous>, transform_indices = @transform_3, window_bounds = array<i64: 1, 192>}, {pipeline_mode = #tpu.pipeline_mode<synchronous>, transform_indices = @transform_4, window_bounds = array<i64: 784, 192>}]} {
    %c0 = arith.constant 0 : index
    %c0_0 = arith.constant 0 : index
    %0 = vector.load %arg1[%c0, %c0_0] : memref<784x512xbf16, #tpu.memory_space<vmem>>, vector<784x512xbf16>
    %c0_1 = arith.constant 0 : index
    %c0_2 = arith.constant 0 : index
    %1 = vector.load %arg2[%c0_1, %c0_2] : memref<512x192xbf16, #tpu.memory_space<vmem>>, vector<512x192xbf16>
    %cst = arith.constant dense<0.000000e+00> : vector<784x192xf32>
    %2 = tpu.matmul %0, %1, %cst {dimension_numbers = #tpu.dot_dimension_numbers<[1], [0], [0], [1], [0, 0, 1, 1], [], []>} : vector<784x512xbf16>, vector<512x192xbf16>, vector<784x192xf32> -> vector<784x192xf32>
    %cst_3 = arith.constant dense<0.000000e+00> : vector<192xf32>
    %3 = vector.multi_reduction <add>, %2, %cst_3 [0] : vector<784x192xf32> to vector<192xf32>
    %4 = vector.shape_cast %3 : vector<192xf32> to vector<1x192xf32>
    %5 = arith.mulf %2, %2 : vector<784x192xf32>
    %cst_4 = arith.constant dense<0.000000e+00> : vector<192xf32>
    %6 = vector.multi_reduction <add>, %5, %cst_4 [0] : vector<784x192xf32> to vector<192xf32>
    %7 = vector.shape_cast %6 : vector<192xf32> to vector<1x192xf32>
    %cst_5 = arith.constant 0.00127551018 : f32
    %8 = vector.broadcast %cst_5 : f32 to vector<1x192xf32>
    %9 = arith.mulf %4, %8 : vector<1x192xf32>
    %cst_6 = arith.constant 0.00127551018 : f32
    %10 = vector.broadcast %cst_6 : f32 to vector<1x192xf32>
    %11 = arith.mulf %7, %10 : vector<1x192xf32>
    %12 = arith.mulf %9, %9 : vector<1x192xf32>
    %13 = arith.subf %11, %12 : vector<1x192xf32>
    %c0_7 = arith.constant 0 : index
    %c0_8 = arith.constant 0 : index
    %14 = vector.load %arg3[%c0_7, %c0_8] : memref<1x192xf32, #tpu.memory_space<vmem>>, vector<1x192xf32>
    %cst_9 = arith.constant 1.000000e-03 : f32
    %15 = vector.broadcast %cst_9 : f32 to vector<1x192xf32>
    %16 = arith.addf %13, %15 : vector<1x192xf32>
    %17 = math.rsqrt %16 : vector<1x192xf32>
    %18 = arith.mulf %14, %17 : vector<1x192xf32>
    %c0_10 = arith.constant 0 : index
    %c0_11 = arith.constant 0 : index
    %19 = vector.load %arg4[%c0_10, %c0_11] : memref<1x192xf32, #tpu.memory_space<vmem>>, vector<1x192xf32>
    %20 = arith.mulf %9, %18 : vector<1x192xf32>
    %21 = arith.subf %19, %20 : vector<1x192xf32>
    %22 = vector.broadcast %18 : vector<1x192xf32> to vector<784x192xf32>
    %23 = arith.mulf %2, %22 : vector<784x192xf32>
    %24 = vector.broadcast %21 : vector<1x192xf32> to vector<784x192xf32>
    %25 = arith.addf %23, %24 : vector<784x192xf32>
    %c0_12 = arith.constant 0 : index
    %c0_13 = arith.constant 0 : index
    %26 = vector.load %arg5[%c0_12, %c0_13] : memref<784x192xf32, #tpu.memory_space<vmem>>, vector<784x192xf32>
    tpu.vector_store %arg5[%c0_12, %c0_13], %25 {strides = array<i32>} : memref<784x192xf32, #tpu.memory_space<vmem>>, vector<784x192xf32>,
    return
  }
  func.func @transform_0(%arg0: i32) -> (i32, i32) {
    %c0_i32 = arith.constant 0 : i32
    %c0_i32_0 = arith.constant 0 : i32
    %c0_i32_1 = arith.constant 0 : i32
    return %c0_i32, %c0_i32_0 : i32, i32
  }
  func.func @transform_1(%arg0: i32) -> (i32, i32) {
    %c0_i32 = arith.constant 0 : i32
    %c0_i32_0 = arith.constant 0 : i32
    %c0_i32_1 = arith.constant 0 : i32
    return %c0_i32, %c0_i32_0 : i32, i32
  }
  func.func @transform_2(%arg0: i32) -> (i32, i32) {
    %c0_i32 = arith.constant 0 : i32
    %c0_i32_0 = arith.constant 0 : i32
    %c0_i32_1 = arith.constant 0 : i32
    return %c0_i32, %c0_i32_0 : i32, i32
  }
  func.func @transform_3(%arg0: i32) -> (i32, i32) {
    %c0_i32 = arith.constant 0 : i32
    %c0_i32_0 = arith.constant 0 : i32
    %c0_i32_1 = arith.constant 0 : i32
    return %c0_i32, %c0_i32_0 : i32, i32
  }
  func.func @transform_4(%arg0: i32) -> (i32, i32) {
    %c0_i32 = arith.constant 0 : i32
    %c0_i32_0 = arith.constant 0 : i32
    %c0_i32_1 = arith.constant 0 : i32
    return %c0_i32, %c0_i32_0 : i32, i32
  }
}

</mosaic_0001>

<bundles_post_ra>
// kernel: tpu_custom_call.1
= control target key start
LH: loop header
LB: loop body
LE: loop exit
PB: predicated region body
PF: predicated region fallthrough
CT: control target
= control target key end

     0   :  { %9 = vsyncpa [#allocation3], 0  ;;  %s4989_s15 = smov [#allocation2]   ;;  %s8293_s0 = inlined_call_operand.hbm [shape: bf16[784,512], index: 0, kind: input, shape index: {}]   ;;  %s8294_s1 = inlined_call_operand.vmem [shape: bf16[512,192], index: 1, kind: input, shape index: {}]   ;;  %s8295_s2 = inlined_call_operand.vmem [shape: f32[1,192], index: 2, kind: input, shape index: {}]   ;;  %s8296_s3 = inlined_call_operand.vmem [shape: f32[1,192], index: 3, kind: input, shape index: {}]   ;;  %s8297_s4 = inlined_call_operand.vmem [shape: f32[784,192], index: 4, kind: output, shape index: {}]  }
   0x1   :  { %s15_s16 = sshll.u32 %s4989_s15, 4  ;;  %s4965_s19 = scalar_lea.hbm %s8293_s0, 25088  ;;  %s16_s16 = int_to_ptr.vmem [resolvable:$true] %s15_s16 }
   0x2   :  { %p4966_p0 = scmp.ne.s32.totalorder %s8293_s0, %s4965_s19  ;;  %p4969_p1 = scmp.lt.u32.totalorder %s4965_s19, %s8293_s0 }
   0x4   :  { %p4971_p2 = pnand %p4969_p1, %p4966_p0 }
   0x6   :  { %4974 = shalt.err (!%p4971_p2)
}
   0x7   :  { %s4975_s24 = scalar_lea.vmem %s16_s16, 25088  ;;  %p4980_p4 = scmp.lt.s32.totalorder %s16_s16, %s16_s16 }
   0x8   :  { %p4976_p3 = scmp.ne.s32.totalorder %s16_s16, %s4975_s24  ;;  %p4981_p5 = scmp.lt.s32.totalorder %s4975_s24, %s4975_s24 }
   0xa   :  { %p4982_p6 = por %p4981_p5, %p4980_p4 }
   0xc   :  { %p4983_p7 = pnand %p4982_p6, %p4976_p3 }
   0xe   :  { %4986 = shalt.err (!%p4983_p7)
}
   0xf   :  { %s4990_s25 = smov 256   ;;  %s4991_s26 = smov 16  }
  0x10   :  { %21 = dma.hbm_to_vmem [thread:$0]  %s8293_s0, 25088, %s16_s16, [#allocation3], %s4990_s25, %s4990_s25, %s4991_s26  }
  0x11   :  { %4987 = dma.done.wait [#allocation3], 25088  }
  0x12   :  { %4988 = vsyncadd [#allocation3], 4294942208  ;;  %v4571_v0 = vld [vmem:[%s8294_s1 + $0x4] ss:$8 sps:$4 sm:$0xff]   ;;  %v4575_v2 = vld [vmem:[%s8294_s1] ss:$8 sps:$4 sm:$0xff]  }
  0x13   :  { %v4573_v1 = vld [vmem:[%s8294_s1 + $0x104] ss:$8 sps:$4 sm:$0xff]   ;;  %1591 = vmatprep.subr.bf16.mxu1 %v4571_v0  ;;  %v4576_v3 = vld [vmem:[%s8294_s1 + $0x100] ss:$8 sps:$4 sm:$0xff]   ;;  %v4577_v4 = vld [vmem:[%s8294_s1 + $0x14] ss:$8 sps:$4 sm:$0xff]  }
  0x14   :  { %2114 = vmatprep.subr.bf16.mxu0 %v4573_v1  ;;  %1592 = vmatpush1.bf16.msra.mxu1 %v4575_v2  ;;  %v4579_v5 = vld [vmem:[%s8294_s1 + $0x114] ss:$8 sps:$4 sm:$0xff]   ;;  %v4581_v6 = vld [vmem:[%s8294_s1 + $0x10] ss:$8 sps:$4 sm:$0xff]   ;;  %v4583_v8 = vld [vmem:[%s8294_s1 + $0x24] ss:$8 sps:$4 sm:$0xff]  }
  0x15   :  { %2115 = vmatpush1.bf16.msra.mxu0 %v4576_v3  ;;  %1593 = vmatprep.subr.bf16.mxu1 %v4577_v4  ;;  %v4582_v7 = vld [vmem:[%s8294_s1 + $0x110] ss:$8 sps:$4 sm:$0xff]   ;;  %v4585_v9 = vld [vmem:[%s8294_s1 + $0x124] ss:$8 sps:$4 sm:$0xff]   ;;  %v4587_v10 = vld [vmem:[%s8294_s1 + $0x20] ss:$8 sps:$4 sm:$0xff]  }
  0x16   :  { %2116 = vmatprep.subr.bf16.mxu0 %v4579_v5  ;;  %v4588_v11 = vld [vmem:[%s8294_s1 + $0x120] ss:$8 sps:$4 sm:$0xff]   ;;  %v4589_v12 = vld [vmem:[%s8294_s1 + $0x34] ss:$8 sps:$4 sm:$0xff]   ;;  %v4593_v14 = vld [vmem:[%s8294_s1 + $0x30] ss:$8 sps:$4 sm:$0xff]  }
  0x17   :  { %v4591_v13 = vld [vmem:[%s8294_s1 + $0x134] ss:$8 sps:$4 sm:$0xff]   ;;  %v4594_v15 = vld [vmem:[%s8294_s1 + $0x130] ss:$8 sps:$4 sm:$0xff]   ;;  %v4595_v16 = vld [vmem:[%s8294_s1 + $0x44] ss:$8 sps:$4 sm:$0xff]  }
  0x18   :  { %1594 = vmatpush1.bf16.msra.mxu1 %v4581_v6  ;;  %v4597_v17 = vld [vmem:[%s8294_s1 + $0x144] ss:$8 sps:$4 sm:$0xff]   ;;  %v4599_v18 = vld [vmem:[%s8294_s1 + $0x40] ss:$8 sps:$4 sm:$0xff]   ;;  %v4601_v20 = vld [vmem:[%s8294_s1 + $0x54] ss:$8 sps:$4 sm:$0xff]  }
  0x19   :  { %2117 = vmatpush1.bf16.msra.mxu0 %v4582_v7  ;;  %1595 = vmatprep.subr.bf16.mxu1 %v4583_v8  ;;  %v4600_v19 = vld [vmem:[%s8294_s1 + $0x140] ss:$8 sps:$4 sm:$0xff]   ;;  %v4603_v21 = vld [vmem:[%s8294_s1 + $0x154] ss:$8 sps:$4 sm:$0xff]   ;;  %v4605_v22 = vld [vmem:[%s8294_s1 + $0x50] ss:$8 sps:$4 sm:$0xff]  }
  0x1a   :  { %2118 = vmatprep.subr.bf16.mxu0 %v4585_v9  ;;  %v4606_v23 = vld [vmem:[%s8294_s1 + $0x150] ss:$8 sps:$4 sm:$0xff]   ;;  %v4607_v24 = vld [vmem:[%s8294_s1 + $0x64] ss:$8 sps:$4 sm:$0xff]   ;;  %v4611_v26 = vld [vmem:[%s8294_s1 + $0x60] ss:$8 sps:$4 sm:$0xff]  }
  0x1b   :  { %v4609_v25 = vld [vmem:[%s8294_s1 + $0x164] ss:$8 sps:$4 sm:$0xff]   ;;  %v4612_v27 = vld [vmem:[%s8294_s1 + $0x160] ss:$8 sps:$4 sm:$0xff]   ;;  %v4613_v28 = vld [vmem:[%s8294_s1 + $0x74] ss:$8 sps:$4 sm:$0xff]  }
  0x1c   :  { %1596 = vmatpush1.bf16.msra.mxu1 %v4587_v10  ;;  %v4615_v29 = vld [vmem:[%s8294_s1 + $0x174] ss:$8 sps:$4 sm:$0xff]   ;;  %v4617_v30 = vld [vmem:[%s8294_s1 + $0x70] ss:$8 sps:$4 sm:$0xff]   ;;  %v4619_v32 = vld [vmem:[%s8294_s1 + $0x84] ss:$8 sps:$4 sm:$0xff]  }
  0x1d   :  { %2119 = vmatpush1.bf16.msra.mxu0 %v4588_v11  ;;  %1597 = vmatprep.subr.bf16.mxu1 %v4589_v12  ;;  %v4618_v31 = vld [vmem:[%s8294_s1 + $0x170] ss:$8 sps:$4 sm:$0xff]   ;;  %v4621_v33 = vld [vmem:[%s8294_s1 + $0x184] ss:$8 sps:$4 sm:$0xff]   ;;  %v4623_v34 = vld [vmem:[%s8294_s1 + $0x80] ss:$8 sps:$4 sm:$0xff]  }
  0x1e   :  { %2120 = vmatprep.subr.bf16.mxu0 %v4591_v13  ;;  %v4624_v35 = vld [vmem:[%s8294_s1 + $0x180] ss:$8 sps:$4 sm:$0xff]   ;;  %v4625_v36 = vld [vmem:[%s8294_s1 + $0x94] ss:$8 sps:$4 sm:$0xff]   ;;  %v4629_v38 = vld [vmem:[%s8294_s1 + $0x90] ss:$8 sps:$4 sm:$0xff]  }
  0x1f   :  { %v4627_v37 = vld [vmem:[%s8294_s1 + $0x194] ss:$8 sps:$4 sm:$0xff]   ;;  %v4630_v39 = vld [vmem:[%s8294_s1 + $0x190] ss:$8 sps:$4 sm:$0xff]   ;;  %v4631_v40 = vld [vmem:[%s8294_s1 + $0xa4] ss:$8 sps:$4 sm:$0xff]  }
  0x20   :  { %1598 = vmatpush1.bf16.msra.mxu1 %v4593_v14  ;;  %v4633_v41 = vld [vmem:[%s8294_s1 + $0x1a4] ss:$8 sps:$4 sm:$0xff]   ;;  %v4635_v42 = vld [vmem:[%s8294_s1 + $0xa0] ss:$8 sps:$4 sm:$0xff]   ;;  %v4637_v44 = vld [vmem:[%s8294_s1 + $0xb4] ss:$8 sps:$4 sm:$0xff]  }
  0x21   :  { %2121 = vmatpush1.bf16.msra.mxu0 %v4594_v15  ;;  %1599 = vmatprep.subr.bf16.mxu1 %v4595_v16  ;;  %v4636_v43 = vld [vmem:[%s8294_s1 + $0x1a0] ss:$8 sps:$4 sm:$0xff]   ;;  %v4639_v45 = vld [vmem:[%s8294_s1 + $0x1b4] ss:$8 sps:$4 sm:$0xff]   ;;  %v4641_v46 = vld [vmem:[%s8294_s1 + $0xb0] ss:$8 sps:$4 sm:$0xff]  }
  0x22   :  { %2122 = vmatprep.subr.bf16.mxu0 %v4597_v17  ;;  %v4642_v47 = vld [vmem:[%s8294_s1 + $0x1b0] ss:$8 sps:$4 sm:$0xff]   ;;  %v4643_v48 = vld [vmem:[%s8294_s1 + $0xc4] ss:$8 sps:$4 sm:$0xff]   ;;  %v4647_v52 = vld [vmem:[%s8294_s1 + $0xc0] ss:$8 sps:$4 sm:$0xff]  }
  0x23   :  { %v4669_v49 = vld [vmem:[#allocation2 + $0x4] ss:$16 sps:$4 sm:$0xff]   ;;  %v4672_v51 = vld [vmem:[#allocation2 + $0xc] ss:$16 sps:$4 sm:$0xff]   ;;  %v4648_v53 = vld [vmem:[%s8294_s1 + $0x1c0] ss:$8 sps:$4 sm:$0xff]  }
  0x24   :  { %1600 = vmatpush1.bf16.msra.mxu1 %v4599_v18  ;;  %v4645_v50 = vld [vmem:[%s8294_s1 + $0x1c4] ss:$8 sps:$4 sm:$0xff]   ;;  %1623 = vmatprep.mubr.bf16.mxu1 %v4669_v49  ;;  %v4649_v54 = vld [vmem:[%s8294_s1 + $0xd4] ss:$8 sps:$4 sm:$0xff]   ;;  %v4653_v56 = vld [vmem:[%s8294_s1 + $0xd0] ss:$8 sps:$4 sm:$0xff]  }
  0x25   :  { %2123 = vmatpush1.bf16.msra.mxu0 %v4600_v19  ;;  %1601 = vmatprep.subr.bf16.mxu1 %v4601_v20  ;;  %v4651_v55 = vld [vmem:[%s8294_s1 + $0x1d4] ss:$8 sps:$4 sm:$0xff]   ;;  %v4654_v57 = vld [vmem:[%s8294_s1 + $0x1d0] ss:$8 sps:$4 sm:$0xff]   ;;  %v4655_v58 = vld [vmem:[%s8294_s1 + $0xe4] ss:$8 sps:$4 sm:$0xff]  }
  0x26   :  { %2124 = vmatprep.subr.bf16.mxu0 %v4603_v21  ;;  %2146 = vmatprep.mubr.bf16.mxu0 %v4672_v51  ;;  %v4657_v59 = vld [vmem:[%s8294_s1 + $0x1e4] ss:$8 sps:$4 sm:$0xff]   ;;  %v4659_v60 = vld [vmem:[%s8294_s1 + $0xe0] ss:$8 sps:$4 sm:$0xff]   ;;  %v4661_v62 = vld [vmem:[%s8294_s1 + $0xf4] ss:$8 sps:$4 sm:$0xff]  }
  0x27   :  { %v4660_v61 = vld [vmem:[%s8294_s1 + $0x1e0] ss:$8 sps:$4 sm:$0xff]   ;;  %v4663_v63 = vld [vmem:[%s8294_s1 + $0x1f4] ss:$8 sps:$4 sm:$0xff]   ;;  %v4665_v0 = vld [vmem:[%s8294_s1 + $0xf0] ss:$8 sps:$4 sm:$0xff]  }
  0x28   :  { %1602 = vmatpush1.bf16.msra.mxu1 %v4605_v22  ;;  %v4666_v1 = vld [vmem:[%s8294_s1 + $0x1f0] ss:$8 sps:$4 sm:$0xff]   ;;  %v4673_v4 = vld [vmem:[#allocation2 + $0x24] ss:$16 sps:$4 sm:$0xff]   ;;  %v4675_v5 = vld [vmem:[#allocation2 + $0x2c] ss:$16 sps:$4 sm:$0xff]  }
  0x29   :  { %2125 = vmatpush1.bf16.msra.mxu0 %v4606_v23  ;;  %1603 = vmatprep.subr.bf16.mxu1 %v4607_v24  ;;  %v4667_v2 = vld [vmem:[#allocation2] ss:$16 sps:$4 sm:$0xff]   ;;  %v4670_v3 = vld [vmem:[#allocation2 + $0x8] ss:$16 sps:$4 sm:$0xff]   ;;  %v4679_v8 = vld [vmem:[#allocation2 + $0x44] ss:$16 sps:$4 sm:$0xff]  }
  0x2a   :  { %2126 = vmatprep.subr.bf16.mxu0 %v4609_v25  ;;  %v4677_v6 = vld [vmem:[#allocation2 + $0x20] ss:$16 sps:$4 sm:$0xff]   ;;  %v4678_v7 = vld [vmem:[#allocation2 + $0x28] ss:$16 sps:$4 sm:$0xff]   ;;  %v4681_v9 = vld [vmem:[#allocation2 + $0x4c] ss:$16 sps:$4 sm:$0xff]  }
  0x2b   :  { %v4683_v10 = vld [vmem:[#allocation2 + $0x40] ss:$16 sps:$4 sm:$0xff]   ;;  %v4684_v11 = vld [vmem:[#allocation2 + $0x48] ss:$16 sps:$4 sm:$0xff]   ;;  %v4685_v12 = vld [vmem:[#allocation2 + $0x64] ss:$16 sps:$4 sm:$0xff]  }
  0x2c   :  { %1604 = vmatpush1.bf16.msra.mxu1 %v4611_v26  ;;  %v4687_v13 = vld [vmem:[#allocation2 + $0x6c] ss:$16 sps:$4 sm:$0xff]   ;;  %v4689_v14 = vld [vmem:[#allocation2 + $0x60] ss:$16 sps:$4 sm:$0xff]   ;;  %v4690_v15 = vld [vmem:[#allocation2 + $0x68] ss:$16 sps:$4 sm:$0xff]  }
  0x2d   :  { %2127 = vmatpush1.bf16.msra.mxu0 %v4612_v27  ;;  %1605 = vmatprep.subr.bf16.mxu1 %v4613_v28  ;;  %v4691_v16 = vld [vmem:[#allocation2 + $0x84] ss:$16 sps:$4 sm:$0xff]   ;;  %v4693_v17 = vld [vmem:[#allocation2 + $0x8c] ss:$16 sps:$4 sm:$0xff]   ;;  %v4695_v18 = vld [vmem:[#allocation2 + $0x80] ss:$16 sps:$4 sm:$0xff]  }
  0x2e   :  { %2128 = vmatprep.subr.bf16.mxu0 %v4615_v29  ;;  %v4696_v19 = vld [vmem:[#allocation2 + $0x88] ss:$16 sps:$4 sm:$0xff]   ;;  %v4697_v20 = vld [vmem:[#allocation2 + $0xa4] ss:$16 sps:$4 sm:$0xff]   ;;  %v4699_v21 = vld [vmem:[#allocation2 + $0xac] ss:$16 sps:$4 sm:$0xff]  }
  0x2f   :  { %v4701_v22 = vld [vmem:[#allocation2 + $0xa0] ss:$16 sps:$4 sm:$0xff]   ;;  %v4702_v23 = vld [vmem:[#allocation2 + $0xa8] ss:$16 sps:$4 sm:$0xff]   ;;  %v4703_v24 = vld [vmem:[#allocation2 + $0xc4] ss:$16 sps:$4 sm:$0xff]  }
  0x30   :  { %1606 = vmatpush1.bf16.msra.mxu1 %v4617_v30  ;;  %v4705_v25 = vld [vmem:[#allocation2 + $0xcc] ss:$16 sps:$4 sm:$0xff]   ;;  %v4707_v26 = vld [vmem:[#allocation2 + $0xc0] ss:$16 sps:$4 sm:$0xff]   ;;  %v4708_v27 = vld [vmem:[#allocation2 + $0xc8] ss:$16 sps:$4 sm:$0xff]  }
  0x31   :  { %2129 = vmatpush1.bf16.msra.mxu0 %v4618_v31  ;;  %1607 = vmatprep.subr.bf16.mxu1 %v4619_v32  ;;  %v4709_v28 = vld [vmem:[#allocation2 + $0xe4] ss:$16 sps:$4 sm:$0xff]   ;;  %v4711_v29 = vld [vmem:[#allocation2 + $0xec] ss:$16 sps:$4 sm:$0xff]   ;;  %v4713_v30 = vld [vmem:[#allocation2 + $0xe0] ss:$16 sps:$4 sm:$0xff]  }
  0x32   :  { %2130 = vmatprep.subr.bf16.mxu0 %v4621_v33  ;;  %v4714_v31 = vld [vmem:[#allocation2 + $0xe8] ss:$16 sps:$4 sm:$0xff]   ;;  %v4715_v32 = vld [vmem:[#allocation2 + $0x104] ss:$16 sps:$4 sm:$0xff]   ;;  %v4717_v33 = vld [vmem:[#allocation2 + $0x10c] ss:$16 sps:$4 sm:$0xff]  }
  0x33   :  { %v4741_v49 = vld [vmem:[#allocation2 + $0x18c] ss:$16 sps:$4 sm:$0xff]   ;;  %v4744_v51 = vld [vmem:[#allocation2 + $0x188] ss:$16 sps:$4 sm:$0xff]   ;;  %vm2740_vm0 = vcmask 523264  }
  0x34   :  { %1608 = vmatpush1.bf16.msra.mxu1 %v4623_v34  ;;  %v4719_v34 = vld [vmem:[#allocation2 + $0x100] ss:$16 sps:$4 sm:$0xff]  }
  0x35   :  { %2131 = vmatpush1.bf16.msra.mxu0 %v4624_v35  ;;  %1609 = vmatprep.subr.bf16.mxu1 %v4625_v36  ;;  %v4720_v35 = vld [vmem:[#allocation2 + $0x108] ss:$16 sps:$4 sm:$0xff]   ;;  %v4721_v36 = vld [vmem:[#allocation2 + $0x124] ss:$16 sps:$4 sm:$0xff]  }
  0x36   :  { %2132 = vmatprep.subr.bf16.mxu0 %v4627_v37  ;;  %v4723_v37 = vld [vmem:[#allocation2 + $0x12c] ss:$16 sps:$4 sm:$0xff]  }
  0x38   :  { %1610 = vmatpush1.bf16.msra.mxu1 %v4629_v38  ;;  %v4725_v38 = vld [vmem:[#allocation2 + $0x120] ss:$16 sps:$4 sm:$0xff]  }
  0x39   :  { %2133 = vmatpush1.bf16.msra.mxu0 %v4630_v39  ;;  %1611 = vmatprep.subr.bf16.mxu1 %v4631_v40  ;;  %v4726_v39 = vld [vmem:[#allocation2 + $0x128] ss:$16 sps:$4 sm:$0xff]   ;;  %v4727_v40 = vld [vmem:[#allocation2 + $0x144] ss:$16 sps:$4 sm:$0xff]  }
  0x3a   :  { %2134 = vmatprep.subr.bf16.mxu0 %v4633_v41  ;;  %v4729_v41 = vld [vmem:[#allocation2 + $0x14c] ss:$16 sps:$4 sm:$0xff]  }
  0x3c   :  { %1612 = vmatpush1.bf16.msra.mxu1 %v4635_v42  ;;  %v4731_v42 = vld [vmem:[#allocation2 + $0x140] ss:$16 sps:$4 sm:$0xff]  }
  0x3d   :  { %2135 = vmatpush1.bf16.msra.mxu0 %v4636_v43  ;;  %1613 = vmatprep.subr.bf16.mxu1 %v4637_v44  ;;  %v4732_v43 = vld [vmem:[#allocation2 + $0x148] ss:$16 sps:$4 sm:$0xff]   ;;  %v4733_v44 = vld [vmem:[#allocation2 + $0x164] ss:$16 sps:$4 sm:$0xff]  }
  0x3e   :  { %2136 = vmatprep.subr.bf16.mxu0 %v4639_v45  ;;  %v4735_v45 = vld [vmem:[#allocation2 + $0x16c] ss:$16 sps:$4 sm:$0xff]  }
  0x40   :  { %1614 = vmatpush1.bf16.msra.mxu1 %v4641_v46  ;;  %v4737_v46 = vld [vmem:[#allocation2 + $0x160] ss:$16 sps:$4 sm:$0xff]  }
  0x41   :  { %2137 = vmatpush1.bf16.msra.mxu0 %v4642_v47  ;;  %1615 = vmatprep.subr.bf16.mxu1 %v4643_v48  ;;  %v4738_v47 = vld [vmem:[#allocation2 + $0x168] ss:$16 sps:$4 sm:$0xff]   ;;  %v4739_v48 = vld [vmem:[#allocation2 + $0x184] ss:$16 sps:$4 sm:$0xff]  }
  0x42   :  { %2138 = vmatprep.subr.bf16.mxu0 %v4645_v50  ;;  %v4743_v50 = vld [vmem:[#allocation2 + $0x180] ss:$16 sps:$4 sm:$0xff]  }
  0x44   :  { %1616 = vmatpush1.bf16.msra.mxu1 %v4647_v52  ;;  %v4745_v52 = vld [vmem:[#allocation2 + $0x1a4] ss:$16 sps:$4 sm:$0xff]  }
  0x45   :  { %2139 = vmatpush1.bf16.msra.mxu0 %v4648_v53  ;;  %1617 = vmatprep.subr.bf16.mxu1 %v4649_v54  ;;  %v4747_v53 = vld [vmem:[#allocation2 + $0x1ac] ss:$16 sps:$4 sm:$0xff]   ;;  %v4749_v54 = vld [vmem:[#allocation2 + $0x1a0] ss:$16 sps:$4 sm:$0xff]  }
  0x46   :  { %2140 = vmatprep.subr.bf16.mxu0 %v4651_v55  ;;  %v4750_v55 = vld [vmem:[#allocation2 + $0x1a8] ss:$16 sps:$4 sm:$0xff]  }
  0x48   :  { %1618 = vmatpush1.bf16.msra.mxu1 %v4653_v56  ;;  %v4751_v56 = vld [vmem:[#allocation2 + $0x1c4] ss:$16 sps:$4 sm:$0xff]  }
  0x49   :  { %2141 = vmatpush1.bf16.msra.mxu0 %v4654_v57  ;;  %1619 = vmatprep.subr.bf16.mxu1 %v4655_v58  ;;  %v4753_v57 = vld [vmem:[#allocation2 + $0x1cc] ss:$16 sps:$4 sm:$0xff]   ;;  %v4755_v58 = vld [vmem:[#allocation2 + $0x1c0] ss:$16 sps:$4 sm:$0xff]  }
  0x4a   :  { %2142 = vmatprep.subr.bf16.mxu0 %v4657_v59  ;;  %v4756_v59 = vld [vmem:[#allocation2 + $0x1c8] ss:$16 sps:$4 sm:$0xff]  }
  0x4c   :  { %1620 = vmatpush1.bf16.msra.mxu1 %v4659_v60  ;;  %v4757_v60 = vld [vmem:[#allocation2 + $0x1e4] ss:$16 sps:$4 sm:$0xff]  }
  0x4d   :  { %2143 = vmatpush1.bf16.msra.mxu0 %v4660_v61  ;;  %1621 = vmatprep.subr.bf16.mxu1 %v4661_v62  ;;  %v4759_v61 = vld [vmem:[#allocation2 + $0x1ec] ss:$16 sps:$4 sm:$0xff]   ;;  %v4761_v62 = vld [vmem:[#allocation2 + $0x1e0] ss:$16 sps:$4 sm:$0xff]  }
  0x4e   :  { %2144 = vmatprep.subr.bf16.mxu0 %v4663_v63  ;;  %v4762_v63 = vld [vmem:[#allocation2 + $0x1e8] ss:$16 sps:$4 sm:$0xff]  }
  0x50   :  { %1622 = vmatpush1.bf16.msra.mxu1 %v4665_v0  ;;  %v4763_v0 = vld [vmem:[#allocation2 + $0x204] ss:$16 sps:$4 sm:$0xff]  }
  0x51   :  { %2145 = vmatpush1.bf16.msra.mxu0 %v4666_v1  ;;  %v4765_v1 = vld [vmem:[#allocation2 + $0x20c] ss:$16 sps:$4 sm:$0xff]  }
  0x53   :  { %1624 = vmatmul.mubr.bf16.vlgmr.msra.gmra.mrb[0].mxu1 %v4667_v2  ;;  %v4767_v2 = vld [vmem:[#allocation2 + $0x200] ss:$16 sps:$4 sm:$0xff]  }
  0x54   :  { %2147 = vmatmul.mubr.bf16.vlgmr.msra.gmra.mrb[0].mxu0 %v4670_v3  ;;  %1633 = vmatprep.mubr.bf16.mxu1 %v4673_v4  ;;  %v4768_v3 = vld [vmem:[#allocation2 + $0x208] ss:$16 sps:$4 sm:$0xff]   ;;  %v4769_v4 = vld [vmem:[#allocation2 + $0x224] ss:$16 sps:$4 sm:$0xff]  }
  0x55   :  { %2156 = vmatprep.mubr.bf16.mxu0 %v4675_v5  ;;  %v4771_v5 = vld [vmem:[#allocation2 + $0x22c] ss:$16 sps:$4 sm:$0xff]  }
  0x5b   :  { %1634 = vmatmul.mubr.bf16.gmra.mrb[4].mxu1 %v4677_v6  ;;  %v4773_v6 = vld [vmem:[#allocation2 + $0x220] ss:$16 sps:$4 sm:$0xff]  }
  0x5c   :  { %2157 = vmatmul.mubr.bf16.gmra.mrb[4].mxu0 %v4678_v7  ;;  %1643 = vmatprep.mubr.bf16.mxu1 %v4679_v8  ;;  %v4774_v7 = vld [vmem:[#allocation2 + $0x228] ss:$16 sps:$4 sm:$0xff]   ;;  %v4775_v8 = vld [vmem:[#allocation2 + $0x244] ss:$16 sps:$4 sm:$0xff]  }
  0x5d   :  { %2166 = vmatprep.mubr.bf16.mxu0 %v4681_v9  ;;  %v4777_v9 = vld [vmem:[#allocation2 + $0x24c] ss:$16 sps:$4 sm:$0xff]  }
  0x63   :  { %1644 = vmatmul.mubr.bf16.gmra.mrb[8].mxu1 %v4683_v10  ;;  %v4779_v10 = vld [vmem:[#allocation2 + $0x240] ss:$16 sps:$4 sm:$0xff]  }
  0x64   :  { %2167 = vmatmul.mubr.bf16.gmra.mrb[8].mxu0 %v4684_v11  ;;  %1653 = vmatprep.mubr.bf16.mxu1 %v4685_v12  ;;  %v4780_v11 = vld [vmem:[#allocation2 + $0x248] ss:$16 sps:$4 sm:$0xff]   ;;  %v4781_v12 = vld [vmem:[#allocation2 + $0x264] ss:$16 sps:$4 sm:$0xff]  }
  0x65   :  { %2176 = vmatprep.mubr.bf16.mxu0 %v4687_v13  ;;  %v4783_v13 = vld [vmem:[#allocation2 + $0x26c] ss:$16 sps:$4 sm:$0xff]  }
  0x6b   :  { %1654 = vmatmul.mubr.bf16.gmra.mrb[12].mxu1 %v4689_v14  ;;  %v4785_v14 = vld [vmem:[#allocation2 + $0x260] ss:$16 sps:$4 sm:$0xff]  }
  0x6c   :  { %2177 = vmatmul.mubr.bf16.gmra.mrb[12].mxu0 %v4690_v15  ;;  %1663 = vmatprep.mubr.bf16.mxu1 %v4691_v16  ;;  %v4786_v15 = vld [vmem:[#allocation2 + $0x268] ss:$16 sps:$4 sm:$0xff]   ;;  %v4787_v16 = vld [vmem:[#allocation2 + $0x284] ss:$16 sps:$4 sm:$0xff]  }
  0x6d   :  { %2186 = vmatprep.mubr.bf16.mxu0 %v4693_v17  ;;  %v4789_v17 = vld [vmem:[#allocation2 + $0x28c] ss:$16 sps:$4 sm:$0xff]  }
  0x73   :  { %1664 = vmatmul.mubr.bf16.gmra.mrb[16].mxu1 %v4695_v18  ;;  %v4791_v18 = vld [vmem:[#allocation2 + $0x280] ss:$16 sps:$4 sm:$0xff]  }
  0x74   :  { %2187 = vmatmul.mubr.bf16.gmra.mrb[16].mxu0 %v4696_v19  ;;  %1673 = vmatprep.mubr.bf16.mxu1 %v4697_v20  ;;  %v4792_v19 = vld [vmem:[#allocation2 + $0x288] ss:$16 sps:$4 sm:$0xff]   ;;  %v4793_v20 = vld [vmem:[#allocation2 + $0x2a4] ss:$16 sps:$4 sm:$0xff]  }
  0x75   :  { %2196 = vmatprep.mubr.bf16.mxu0 %v4699_v21  ;;  %v4795_v21 = vld [vmem:[#allocation2 + $0x2ac] ss:$16 sps:$4 sm:$0xff]  }
  0x7b   :  { %1674 = vmatmul.mubr.bf16.gmra.mrb[20].mxu1 %v4701_v22  ;;  %v4797_v22 = vld [vmem:[#allocation2 + $0x2a0] ss:$16 sps:$4 sm:$0xff]  }
  0x7c   :  { %2197 = vmatmul.mubr.bf16.gmra.mrb[20].mxu0 %v4702_v23  ;;  %1683 = vmatprep.mubr.bf16.mxu1 %v4703_v24  ;;  %v4798_v23 = vld [vmem:[#allocation2 + $0x2a8] ss:$16 sps:$4 sm:$0xff]   ;;  %v4799_v24 = vld [vmem:[#allocation2 + $0x2c4] ss:$16 sps:$4 sm:$0xff]  }
  0x7d   :  { %2206 = vmatprep.mubr.bf16.mxu0 %v4705_v25  ;;  %v4801_v25 = vld [vmem:[#allocation2 + $0x2cc] ss:$16 sps:$4 sm:$0xff]  }
  0x83   :  { %1684 = vmatmul.mubr.bf16.gmra.mrb[24].mxu1 %v4707_v26  ;;  %v4803_v26 = vld [vmem:[#allocation2 + $0x2c0] ss:$16 sps:$4 sm:$0xff]  }
  0x84   :  { %2207 = vmatmul.mubr.bf16.gmra.mrb[24].mxu0 %v4708_v27  ;;  %1693 = vmatprep.mubr.bf16.mxu1 %v4709_v28  ;;  %v4804_v27 = vld [vmem:[#allocation2 + $0x2c8] ss:$16 sps:$4 sm:$0xff]   ;;  %v4805_v28 = vld [vmem:[#allocation2 + $0x2e4] ss:$16 sps:$4 sm:$0xff]  }
  0x85   :  { %2216 = vmatprep.mubr.bf16.mxu0 %v4711_v29  ;;  %v4807_v29 = vld [vmem:[#allocation2 + $0x2ec] ss:$16 sps:$4 sm:$0xff]  }
  0x8b   :  { %1694 = vmatmul.mubr.bf16.gmra.mrb[28].mxu1 %v4713_v30  ;;  %v4809_v30 = vld [vmem:[#allocation2 + $0x2e0] ss:$16 sps:$4 sm:$0xff]  }
  0x8c   :  { %2217 = vmatmul.mubr.bf16.gmra.mrb[28].mxu0 %v4714_v31  ;;  %1703 = vmatprep.mubr.bf16.mxu1 %v4715_v32  ;;  %v4810_v31 = vld [vmem:[#allocation2 + $0x2e8] ss:$16 sps:$4 sm:$0xff]   ;;  %v4811_v32 = vld [vmem:[#allocation2 + $0x304] ss:$16 sps:$4 sm:$0xff]  }
  0x8d   :  { %2226 = vmatprep.mubr.bf16.mxu0 %v4717_v33  ;;  %v4813_v33 = vld [vmem:[#allocation2 + $0x30c] ss:$16 sps:$4 sm:$0xff]  }
  0x93   :  { %1704 = vmatmul.mubr.bf16.gmra.mrb[32].mxu1 %v4719_v34  ;;  %v4815_v34 = vld [vmem:[#allocation2 + $0x300] ss:$16 sps:$4 sm:$0xff]  }
  0x94   :  { %2227 = vmatmul.mubr.bf16.gmra.mrb[32].mxu0 %v4720_v35  ;;  %1713 = vmatprep.mubr.bf16.mxu1 %v4721_v36  ;;  %v4816_v35 = vld [vmem:[#allocation2 + $0x308] ss:$16 sps:$4 sm:$0xff]   ;;  %v4817_v36 = vld [vmem:[#allocation2 + $0x324] ss:$16 sps:$4 sm:$0xff]  }
  0x95   :  { %2236 = vmatprep.mubr.bf16.mxu0 %v4723_v37  ;;  %v4819_v37 = vld [vmem:[#allocation2 + $0x32c] ss:$16 sps:$4 sm:$0xff]  }
  0x9b   :  { %1714 = vmatmul.mubr.bf16.gmra.mrb[36].mxu1 %v4725_v38  ;;  %v4821_v38 = vld [vmem:[#allocation2 + $0x320] ss:$16 sps:$4 sm:$0xff]  }
  0x9c   :  { %2237 = vmatmul.mubr.bf16.gmra.mrb[36].mxu0 %v4726_v39  ;;  %1723 = vmatprep.mubr.bf16.mxu1 %v4727_v40  ;;  %v4822_v39 = vld [vmem:[#allocation2 + $0x328] ss:$16 sps:$4 sm:$0xff]   ;;  %v4823_v40 = vld [vmem:[#allocation2 + $0x344] ss:$16 sps:$4 sm:$0xff]  }
  0x9d   :  { %2246 = vmatprep.mubr.bf16.mxu0 %v4729_v41  ;;  %v4825_v41 = vld [vmem:[#allocation2 + $0x34c] ss:$16 sps:$4 sm:$0xff]  }
  0xa3   :  { %1724 = vmatmul.mubr.bf16.gmra.mrb[40].mxu1 %v4731_v42  ;;  %v4827_v42 = vld [vmem:[#allocation2 + $0x340] ss:$16 sps:$4 sm:$0xff]  }
  0xa4   :  { %2247 = vmatmul.mubr.bf16.gmra.mrb[40].mxu0 %v4732_v43  ;;  %1733 = vmatprep.mubr.bf16.mxu1 %v4733_v44  ;;  %v4828_v43 = vld [vmem:[#allocation2 + $0x348] ss:$16 sps:$4 sm:$0xff]   ;;  %v4829_v44 = vld [vmem:[#allocation2 + $0x364] ss:$16 sps:$4 sm:$0xff]  }
  0xa5   :  { %2256 = vmatprep.mubr.bf16.mxu0 %v4735_v45  ;;  %v4831_v45 = vld [vmem:[#allocation2 + $0x36c] ss:$16 sps:$4 sm:$0xff]  }
  0xab   :  { %1734 = vmatmul.mubr.bf16.gmra.mrb[44].mxu1 %v4737_v46 }
  0xac   :  { %2257 = vmatmul.mubr.bf16.gmra.mrb[44].mxu0 %v4738_v47  ;;  %1743 = vmatprep.mubr.bf16.mxu1 %v4739_v48 }
  0xad   :  { %2266 = vmatprep.mubr.bf16.mxu0 %v4741_v49 }
  0xb3   :  { %1744 = vmatmul.mubr.bf16.gmra.mrb[48].mxu1 %v4743_v50 }
  0xb4   :  { %2267 = vmatmul.mubr.bf16.gmra.mrb[48].mxu0 %v4744_v51  ;;  %1753 = vmatprep.mubr.bf16.mxu1 %v4745_v52  ;;  %v4833_v51 = vld [vmem:[#allocation2 + $0x360] ss:$16 sps:$4 sm:$0xff]   ;;  %v4834_v52 = vld [vmem:[#allocation2 + $0x368] ss:$16 sps:$4 sm:$0xff]  }
  0xb5   :  { %2276 = vmatprep.mubr.bf16.mxu0 %v4747_v53 }
  0xbb   :  { %1754 = vmatmul.mubr.bf16.gmra.mrb[52].mxu1 %v4749_v54 }
  0xbc   :  { %2277 = vmatmul.mubr.bf16.gmra.mrb[52].mxu0 %v4750_v55  ;;  %1763 = vmatprep.mubr.bf16.mxu1 %v4751_v56  ;;  %v4835_v56 = vld [vmem:[#allocation2 + $0x384] ss:$16 sps:$4 sm:$0xff]  }
  0xbd   :  { %2286 = vmatprep.mubr.bf16.mxu0 %v4753_v57  ;;  %v4837_v57 = vld [vmem:[#allocation2 + $0x38c] ss:$16 sps:$4 sm:$0xff]  }
  0xc3   :  { %1764 = vmatmul.mubr.bf16.gmra.mrb[56].mxu1 %v4755_v58 }
  0xc4   :  { %2287 = vmatmul.mubr.bf16.gmra.mrb[56].mxu0 %v4756_v59  ;;  %1773 = vmatprep.mubr.bf16.mxu1 %v4757_v60 }
  0xc5   :  { %2296 = vmatprep.mubr.bf16.mxu0 %v4759_v61 }
  0xcb   :  { %1774 = vmatmul.mubr.bf16.gmra.mrb[60].mxu1 %v4761_v62 }
  0xcc   :  { %2297 = vmatmul.mubr.bf16.gmra.mrb[60].mxu0 %v4762_v63  ;;  %1783 = vmatprep.mubr.bf16.mxu1 %v4763_v0 }
  0xcd   :  { %2306 = vmatprep.mubr.bf16.mxu0 %v4765_v1 }
  0xd3   :  { %1784 = vmatmul.mubr.bf16.gmra.mrb[64].mxu1 %v4767_v2 }
  0xd4   :  { %2307 = vmatmul.mubr.bf16.gmra.mrb[64].mxu0 %v4768_v3  ;;  %1793 = vmatprep.mubr.bf16.mxu1 %v4769_v4  ;;  %v4839_v3 = vld [vmem:[#allocation2 + $0x380] ss:$16 sps:$4 sm:$0xff]  }
  0xd5   :  { %2316 = vmatprep.mubr.bf16.mxu0 %v4771_v5 }
  0xdb   :  { %1794 = vmatmul.mubr.bf16.gmra.mrb[68].mxu1 %v4773_v6 }
  0xdc   :  { %2317 = vmatmul.mubr.bf16.gmra.mrb[68].mxu0 %v4774_v7  ;;  %1803 = vmatprep.mubr.bf16.mxu1 %v4775_v8  ;;  %v4840_v7 = vld [vmem:[#allocation2 + $0x388] ss:$16 sps:$4 sm:$0xff]   ;;  %v4841_v8 = vld [vmem:[#allocation2 + $0x3a4] ss:$16 sps:$4 sm:$0xff]  }
  0xdd   :  { %2326 = vmatprep.mubr.bf16.mxu0 %v4777_v9 }
  0xe3   :  { %1804 = vmatmul.mubr.bf16.gmra.mrb[72].mxu1 %v4779_v10 }
  0xe4   :  { %2327 = vmatmul.mubr.bf16.gmra.mrb[72].mxu0 %v4780_v11  ;;  %1813 = vmatprep.mubr.bf16.mxu1 %v4781_v12  ;;  %v4843_v12 = vld [vmem:[#allocation2 + $0x3ac] ss:$16 sps:$4 sm:$0xff]  }
  0xe5   :  { %2336 = vmatprep.mubr.bf16.mxu0 %v4783_v13 }
  0xeb   :  { %1814 = vmatmul.mubr.bf16.gmra.mrb[76].mxu1 %v4785_v14 }
  0xec   :  { %2337 = vmatmul.mubr.bf16.gmra.mrb[76].mxu0 %v4786_v15  ;;  %1823 = vmatprep.mubr.bf16.mxu1 %v4787_v16 }
  0xed   :  { %2346 = vmatprep.mubr.bf16.mxu0 %v4789_v17 }
  0xf3   :  { %1824 = vmatmul.mubr.bf16.gmra.mrb[80].mxu1 %v4791_v18 }
  0xf4   :  { %2347 = vmatmul.mubr.bf16.gmra.mrb[80].mxu0 %v4792_v19  ;;  %1833 = vmatprep.mubr.bf16.mxu1 %v4793_v20  ;;  %v4845_v19 = vld [vmem:[#allocation2 + $0x3a0] ss:$16 sps:$4 sm:$0xff]  }
  0xf5   :  { %2356 = vmatprep.mubr.bf16.mxu0 %v4795_v21 }
  0xfb   :  { %1834 = vmatmul.mubr.bf16.gmra.mrb[84].mxu1 %v4797_v22 }
  0xfc   :  { %2357 = vmatmul.mubr.bf16.gmra.mrb[84].mxu0 %v4798_v23  ;;  %1843 = vmatprep.mubr.bf16.mxu1 %v4799_v24  ;;  %v4846_v23 = vld [vmem:[#allocation2 + $0x3a8] ss:$16 sps:$4 sm:$0xff]   ;;  %v4847_v24 = vld [vmem:[#allocation2 + $0x3c4] ss:$16 sps:$4 sm:$0xff]  }
  0xfd   :  { %2366 = vmatprep.mubr.bf16.mxu0 %v4801_v25 }
 0x103   :  { %1844 = vmatmul.mubr.bf16.gmra.mrb[88].mxu1 %v4803_v26 }
 0x104   :  { %2367 = vmatmul.mubr.bf16.gmra.mrb[88].mxu0 %v4804_v27  ;;  %1853 = vmatprep.mubr.bf16.mxu1 %v4805_v28  ;;  %v4849_v28 = vld [vmem:[#allocation2 + $0x3cc] ss:$16 sps:$4 sm:$0xff]  }
 0x105   :  { %2376 = vmatprep.mubr.bf16.mxu0 %v4807_v29 }
 0x10b   :  { %1854 = vmatmul.mubr.bf16.gmra.mrb[92].mxu1 %v4809_v30 }
 0x10c   :  { %2377 = vmatmul.mubr.bf16.gmra.mrb[92].mxu0 %v4810_v31  ;;  %1863 = vmatprep.mubr.bf16.mxu1 %v4811_v32 }
 0x10d   :  { %2386 = vmatprep.mubr.bf16.mxu0 %v4813_v33 }
 0x113   :  { %1864 = vmatmul.mubr.bf16.gmra.mrb[96].mxu1 %v4815_v34 }
 0x114   :  { %2387 = vmatmul.mubr.bf16.gmra.mrb[96].mxu0 %v4816_v35  ;;  %1873 = vmatprep.mubr.bf16.mxu1 %v4817_v36  ;;  %v4851_v35 = vld [vmem:[#allocation2 + $0x3c0] ss:$16 sps:$4 sm:$0xff]  }
 0x115   :  { %2396 = vmatprep.mubr.bf16.mxu0 %v4819_v37 }
 0x11b   :  { %1874 = vmatmul.mubr.bf16.gmra.mrb[100].mxu1 %v4821_v38 }
 0x11c   :  { %2397 = vmatmul.mubr.bf16.gmra.mrb[100].mxu0 %v4822_v39  ;;  %1883 = vmatprep.mubr.bf16.mxu1 %v4823_v40  ;;  %v4852_v39 = vld [vmem:[#allocation2 + $0x3c8] ss:$16 sps:$4 sm:$0xff]   ;;  %v4853_v40 = vld [vmem:[#allocation2 + $0x3e4] ss:$16 sps:$4 sm:$0xff]  }
 0x11d   :  { %2406 = vmatprep.mubr.bf16.mxu0 %v4825_v41 }
 0x123   :  { %1884 = vmatmul.mubr.bf16.gmra.mrb[104].mxu1 %v4827_v42 }
 0x124   :  { %2407 = vmatmul.mubr.bf16.gmra.mrb[104].mxu0 %v4828_v43  ;;  %1893 = vmatprep.mubr.bf16.mxu1 %v4829_v44  ;;  %v4855_v44 = vld [vmem:[#allocation2 + $0x3ec] ss:$16 sps:$4 sm:$0xff]  }
 0x125   :  { %2416 = vmatprep.mubr.bf16.mxu0 %v4831_v45 }
 0x126   :  { %v1625_v46 = vpop.f32.mrb[0].mxu1 }
 0x127   :  { %v2148_v47 = vpop.f32.mrb[0].mxu0  ;;  %v1627_v49 = vpop.f32.mrb[1].mxu1 }
 0x128   :  { %v5222_v48 = vadd.f32 %v2148_v47, %v1625_v46  ;;  %v2150_v50 = vpop.f32.mrb[1].mxu0  ;;  %v1629_v54 = vpop.f32.mrb[2].mxu1 }
 0x129   :  { %v5224_v53 = vadd.f32 %v2150_v50, %v1627_v49  ;;  %v2152_v55 = vpop.f32.mrb[2].mxu0  ;;  %v1631_v59 = vpop.f32.mrb[3].mxu1 }
 0x12a   :  { %8460 = vst [vmem:[#allocation5_spill] sm:$0xff] %v5222_v48  ;;  %v5226_v58 = vadd.f32 %v2152_v55, %v1629_v54  ;;  %v2154_v60 = vpop.f32.mrb[3].mxu0 }
 0x12b   :  { %8461 = vst [vmem:[#allocation6_spill] sm:$0xff] %v5224_v53  ;;  %v5228_v61 = vadd.f32 %v2154_v60, %v1631_v59  ;;  %1894 = vmatmul.mubr.bf16.gmra.mrb[108].mxu1 %v4833_v51  ;;  %v4859_v59 = vld [vmem:[#allocation2 + $0x404] ss:$16 sps:$4 sm:$0xff]  }
 0x12c   :  { %8462 = vst [vmem:[#allocation7_spill] sm:$0xff] %v5226_v58  ;;  %2417 = vmatmul.mubr.bf16.gmra.mrb[108].mxu0 %v4834_v52  ;;  %1903 = vmatprep.mubr.bf16.mxu1 %v4835_v56  ;;  %v4857_v52 = vld [vmem:[#allocation2 + $0x3e0] ss:$16 sps:$4 sm:$0xff]  }
 0x12d   :  { %8463 = vst [vmem:[#allocation8_spill] sm:$0xff] %v5228_v61  ;;  %2426 = vmatprep.mubr.bf16.mxu0 %v4837_v57  ;;  %v4858_v57 = vld [vmem:[#allocation2 + $0x3e8] ss:$16 sps:$4 sm:$0xff]  }
 0x12e   :  { %v1635_v62 = vpop.f32.mrb[4].mxu1 }
 0x12f   :  { %v2158_v63 = vpop.f32.mrb[4].mxu0  ;;  %v1637_v1 = vpop.f32.mrb[5].mxu1 }
 0x130   :  { %v5230_v0 = vadd.f32 %v2158_v63, %v1635_v62  ;;  %v2160_v2 = vpop.f32.mrb[5].mxu0  ;;  %v1639_v5 = vpop.f32.mrb[6].mxu1 }
 0x131   :  { %v5232_v4 = vadd.f32 %v2160_v2, %v1637_v1  ;;  %v2162_v6 = vpop.f32.mrb[6].mxu0  ;;  %v1641_v10 = vpop.f32.mrb[7].mxu1  ;;  %v4861_v1 = vld [vmem:[#allocation2 + $0x40c] ss:$16 sps:$4 sm:$0xff]  }
 0x132   :  { %8464 = vst [vmem:[#allocation9_spill] sm:$0xff] %v5230_v0  ;;  %v5234_v9 = vadd.f32 %v2162_v6, %v1639_v5  ;;  %v2164_v11 = vpop.f32.mrb[7].mxu0 }
 0x133   :  { %8465 = vst [vmem:[#allocation10_spill] sm:$0xff] %v5232_v4  ;;  %v5236_v13 = vadd.f32 %v2164_v11, %v1641_v10  ;;  %1904 = vmatmul.mubr.bf16.gmra.mrb[112].mxu1 %v4839_v3  ;;  %v4863_v10 = vld [vmem:[#allocation2 + $0x400] ss:$16 sps:$4 sm:$0xff]  }
 0x134   :  { %8466 = vst [vmem:[#allocation11_spill] sm:$0xff] %v5234_v9  ;;  %2427 = vmatmul.mubr.bf16.gmra.mrb[112].mxu0 %v4840_v7  ;;  %1913 = vmatprep.mubr.bf16.mxu1 %v4841_v8 }
 0x135   :  { %8467 = vst [vmem:[#allocation12_spill] sm:$0xff] %v5236_v13  ;;  %2436 = vmatprep.mubr.bf16.mxu0 %v4843_v12 }
 0x136   :  { %v1645_v14 = vpop.f32.mrb[8].mxu1 }
 0x137   :  { %v2168_v15 = vpop.f32.mrb[8].mxu0  ;;  %v1647_v17 = vpop.f32.mrb[9].mxu1 }
 0x138   :  { %v5238_v16 = vadd.f32 %v2168_v15, %v1645_v14  ;;  %v2170_v18 = vpop.f32.mrb[9].mxu0  ;;  %v1649_v21 = vpop.f32.mrb[10].mxu1  ;;  %v4864_v15 = vld [vmem:[#allocation2 + $0x408] ss:$16 sps:$4 sm:$0xff]  }
 0x139   :  { %v5240_v20 = vadd.f32 %v2170_v18, %v1647_v17  ;;  %v2172_v22 = vpop.f32.mrb[10].mxu0  ;;  %v1651_v26 = vpop.f32.mrb[11].mxu1  ;;  %v4865_v17 = vld [vmem:[#allocation2 + $0x424] ss:$16 sps:$4 sm:$0xff]  }
 0x13a   :  { %8468 = vst [vmem:[#allocation13_spill] sm:$0xff] %v5238_v16  ;;  %v5242_v25 = vadd.f32 %v2172_v22, %v1649_v21  ;;  %v2174_v27 = vpop.f32.mrb[11].mxu0  ;;  %v4867_v22 = vld [vmem:[#allocation2 + $0x42c] ss:$16 sps:$4 sm:$0xff]  }
 0x13b   :  { %8469 = vst [vmem:[#allocation14_spill] sm:$0xff] %v5240_v20  ;;  %v5244_v29 = vadd.f32 %v2174_v27, %v1651_v26  ;;  %1914 = vmatmul.mubr.bf16.gmra.mrb[116].mxu1 %v4845_v19 }
 0x13c   :  { %2437 = vmatmul.mubr.bf16.gmra.mrb[116].mxu0 %v4846_v23  ;;  %1923 = vmatprep.mubr.bf16.mxu1 %v4847_v24 }
 0x13d   :  { %8470 = vst [vmem:[#allocation15_spill] sm:$0xff] %v5244_v29  ;;  %2446 = vmatprep.mubr.bf16.mxu0 %v4849_v28 }
 0x13e   :  { %v1655_v30 = vpop.f32.mrb[12].mxu1 }
 0x13f   :  { %v2178_v31 = vpop.f32.mrb[12].mxu0  ;;  %v1657_v33 = vpop.f32.mrb[13].mxu1 }
 0x140   :  { %v5246_v32 = vadd.f32 %v2178_v31, %v1655_v30  ;;  %v2180_v34 = vpop.f32.mrb[13].mxu0  ;;  %v1659_v37 = vpop.f32.mrb[14].mxu1  ;;  %v4869_v31 = vld [vmem:[#allocation2 + $0x420] ss:$16 sps:$4 sm:$0xff]  }
 0x141   :  { %v5248_v36 = vadd.f32 %v2180_v34, %v1657_v33  ;;  %v2182_v38 = vpop.f32.mrb[14].mxu0  ;;  %v1661_v42 = vpop.f32.mrb[15].mxu1 }
 0x142   :  { %8471 = vst [vmem:[#allocation16_spill] sm:$0xff] %v5246_v32  ;;  %v5250_v41 = vadd.f32 %v2182_v38, %v1659_v37  ;;  %v2184_v43 = vpop.f32.mrb[15].mxu0  ;;  %v4870_v37 = vld [vmem:[#allocation2 + $0x428] ss:$16 sps:$4 sm:$0xff]   ;;  %v4871_v38 = vld [vmem:[#allocation2 + $0x444] ss:$16 sps:$4 sm:$0xff]  }
 0x143   :  { %8472 = vst [vmem:[#allocation17_spill] sm:$0xff] %v5248_v36  ;;  %v5252_v45 = vadd.f32 %v2184_v43, %v1661_v42  ;;  %1924 = vmatmul.mubr.bf16.gmra.mrb[120].mxu1 %v4851_v35  ;;  %v4873_v43 = vld [vmem:[#allocation2 + $0x44c] ss:$16 sps:$4 sm:$0xff]  }
 0x144   :  { %2447 = vmatmul.mubr.bf16.gmra.mrb[120].mxu0 %v4852_v39  ;;  %1933 = vmatprep.mubr.bf16.mxu1 %v4853_v40 }
 0x145   :  { %8473 = vst [vmem:[#allocation18_spill] sm:$0xff] %v5252_v45  ;;  %2456 = vmatprep.mubr.bf16.mxu0 %v4855_v44 }
 0x146   :  { %v1665_v46 = vpop.f32.mrb[16].mxu1 }
 0x147   :  { %v2188_v47 = vpop.f32.mrb[16].mxu0  ;;  %v1667_v50 = vpop.f32.mrb[17].mxu1 }
 0x148   :  { %v5254_v49 = vadd.f32 %v2188_v47, %v1665_v46  ;;  %v2190_v51 = vpop.f32.mrb[17].mxu0  ;;  %v1669_v55 = vpop.f32.mrb[18].mxu1 }
 0x149   :  { %v5256_v54 = vadd.f32 %v2190_v51, %v1667_v50  ;;  %v2192_v56 = vpop.f32.mrb[18].mxu0  ;;  %v1671_v62 = vpop.f32.mrb[19].mxu1 }
 0x14a   :  { %v5258_v60 = vadd.f32 %v2192_v56, %v1669_v55  ;;  %v2194_v63 = vpop.f32.mrb[19].mxu0  ;;  %v4875_v55 = vld [vmem:[#allocation2 + $0x440] ss:$16 sps:$4 sm:$0xff]  }
 0x14b   :  { %8474 = vst [vmem:[#allocation19_spill] sm:$0xff] %v5256_v54  ;;  %v5260_v2 = vadd.f32 %v2194_v63, %v1671_v62  ;;  %1934 = vmatmul.mubr.bf16.gmra.mrb[124].mxu1 %v4857_v52  ;;  %v4876_v62 = vld [vmem:[#allocation2 + $0x448] ss:$16 sps:$4 sm:$0xff]   ;;  %v4877_v63 = vld [vmem:[#allocation2 + $0x464] ss:$16 sps:$4 sm:$0xff]  }
 0x14c   :  { %8475 = vst [vmem:[#allocation20_spill] sm:$0xff] %v5258_v60  ;;  %2457 = vmatmul.mubr.bf16.gmra.mrb[124].mxu0 %v4858_v57  ;;  %1943 = vmatprep.mubr.bf16.mxu1 %v4859_v59 }
 0x14d   :  { %8476 = vst [vmem:[#allocation21_spill] sm:$0xff] %v5260_v2  ;;  %2466 = vmatprep.mubr.bf16.mxu0 %v4861_v1 }
 0x14e   :  { %v1675_v3 = vpop.f32.mrb[20].mxu1 }
 0x14f   :  { %v2198_v5 = vpop.f32.mrb[20].mxu0  ;;  %v1677_v7 = vpop.f32.mrb[21].mxu1 }
 0x150   :  { %v5262_v6 = vadd.f32 %v2198_v5, %v1675_v3  ;;  %v2200_v8 = vpop.f32.mrb[21].mxu0  ;;  %v1679_v12 = vpop.f32.mrb[22].mxu1 }
 0x151   :  { %v5264_v11 = vadd.f32 %v2200_v8, %v1677_v7  ;;  %v2202_v14 = vpop.f32.mrb[22].mxu0  ;;  %v1681_v19 = vpop.f32.mrb[23].mxu1  ;;  %v4879_v7 = vld [vmem:[#allocation2 + $0x46c] ss:$16 sps:$4 sm:$0xff]  }
 0x152   :  { %v5266_v18 = vadd.f32 %v2202_v14, %v1679_v12  ;;  %v2204_v21 = vpop.f32.mrb[23].mxu0 }
 0x153   :  { %8477 = vst [vmem:[#allocation22_spill] sm:$0xff] %v5264_v11  ;;  %v5268_v23 = vadd.f32 %v2204_v21, %v1681_v19  ;;  %1944 = vmatmul.mubr.bf16.gmra.mrb[128].mxu1 %v4863_v10  ;;  %v4881_v19 = vld [vmem:[#allocation2 + $0x460] ss:$16 sps:$4 sm:$0xff]  }
 0x154   :  { %8478 = vst [vmem:[#allocation23_spill] sm:$0xff] %v5266_v18  ;;  %2467 = vmatmul.mubr.bf16.gmra.mrb[128].mxu0 %v4864_v15  ;;  %1953 = vmatprep.mubr.bf16.mxu1 %v4865_v17 }
 0x155   :  { %8479 = vst [vmem:[#allocation24_spill] sm:$0xff] %v5268_v23  ;;  %2476 = vmatprep.mubr.bf16.mxu0 %v4867_v22 }
 0x156   :  { %v1685_v24 = vpop.f32.mrb[24].mxu1 }
 0x157   :  { %v2208_v26 = vpop.f32.mrb[24].mxu0  ;;  %v1687_v28 = vpop.f32.mrb[25].mxu1 }
 0x158   :  { %v5270_v27 = vadd.f32 %v2208_v26, %v1685_v24  ;;  %v2210_v30 = vpop.f32.mrb[25].mxu0  ;;  %v1689_v34 = vpop.f32.mrb[26].mxu1  ;;  %v4882_v26 = vld [vmem:[#allocation2 + $0x468] ss:$16 sps:$4 sm:$0xff]  }
 0x159   :  { %v5272_v33 = vadd.f32 %v2210_v30, %v1687_v28  ;;  %v2212_v35 = vpop.f32.mrb[26].mxu0  ;;  %v1691_v40 = vpop.f32.mrb[27].mxu1  ;;  %v4883_v28 = vld [vmem:[#allocation2 + $0x484] ss:$16 sps:$4 sm:$0xff]  }
 0x15a   :  { %8480 = vst [vmem:[#allocation25_spill] sm:$0xff] %v5270_v27  ;;  %v5274_v39 = vadd.f32 %v2212_v35, %v1689_v34  ;;  %v2214_v42 = vpop.f32.mrb[27].mxu0  ;;  %v4885_v35 = vld [vmem:[#allocation2 + $0x48c] ss:$16 sps:$4 sm:$0xff]  }
 0x15b   :  { %8481 = vst [vmem:[#allocation26_spill] sm:$0xff] %v5272_v33  ;;  %v5276_v44 = vadd.f32 %v2214_v42, %v1691_v40  ;;  %1954 = vmatmul.mubr.bf16.gmra.mrb[132].mxu1 %v4869_v31 }
 0x15c   :  { %8482 = vst [vmem:[#allocation27_spill] sm:$0xff] %v5274_v39  ;;  %2477 = vmatmul.mubr.bf16.gmra.mrb[132].mxu0 %v4870_v37  ;;  %1963 = vmatprep.mubr.bf16.mxu1 %v4871_v38 }
 0x15d   :  { %8483 = vst [vmem:[#allocation28_spill] sm:$0xff] %v5276_v44  ;;  %2486 = vmatprep.mubr.bf16.mxu0 %v4873_v43 }
 0x15e   :  { %v1695_v46 = vpop.f32.mrb[28].mxu1 }
 0x15f   :  { %v2218_v47 = vpop.f32.mrb[28].mxu0  ;;  %v1697_v51 = vpop.f32.mrb[29].mxu1 }
 0x160   :  { %v5278_v50 = vadd.f32 %v2218_v47, %v1695_v46  ;;  %v2220_v52 = vpop.f32.mrb[29].mxu0  ;;  %v1699_v57 = vpop.f32.mrb[30].mxu1  ;;  %v4887_v47 = vld [vmem:[#allocation2 + $0x480] ss:$16 sps:$4 sm:$0xff]  }
 0x161   :  { %v5280_v56 = vadd.f32 %v2220_v52, %v1697_v51  ;;  %v2222_v59 = vpop.f32.mrb[30].mxu0  ;;  %v1701_v3 = vpop.f32.mrb[31].mxu1 }
 0x162   :  { %8484 = vst [vmem:[#allocation29_spill] sm:$0xff] %v5278_v50  ;;  %v5282_v1 = vadd.f32 %v2222_v59, %v1699_v57  ;;  %v2224_v5 = vpop.f32.mrb[31].mxu0  ;;  %v4888_v57 = vld [vmem:[#allocation2 + $0x488] ss:$16 sps:$4 sm:$0xff]   ;;  %v4889_v59 = vld [vmem:[#allocation2 + $0x4a4] ss:$16 sps:$4 sm:$0xff]  }
 0x163   :  { %8485 = vst [vmem:[#allocation30_spill] sm:$0xff] %v5280_v56  ;;  %v5284_v8 = vadd.f32 %v2224_v5, %v1701_v3  ;;  %1964 = vmatmul.mubr.bf16.gmra.mrb[136].mxu1 %v4875_v55  ;;  %v4891_v5 = vld [vmem:[#allocation2 + $0x4ac] ss:$16 sps:$4 sm:$0xff]  }
 0x164   :  { %8486 = vst [vmem:[#allocation31_spill] sm:$0xff] %v5282_v1  ;;  %2487 = vmatmul.mubr.bf16.gmra.mrb[136].mxu0 %v4876_v62  ;;  %1973 = vmatprep.mubr.bf16.mxu1 %v4877_v63 }
 0x165   :  { %8487 = vst [vmem:[#allocation32_spill] sm:$0xff] %v5284_v8  ;;  %2496 = vmatprep.mubr.bf16.mxu0 %v4879_v7 }
 0x166   :  { %v1705_v10 = vpop.f32.mrb[32].mxu1 }
 0x167   :  { %v2228_v12 = vpop.f32.mrb[32].mxu0  ;;  %v1707_v15 = vpop.f32.mrb[33].mxu1 }
 0x168   :  { %v5286_v14 = vadd.f32 %v2228_v12, %v1705_v10  ;;  %v2230_v17 = vpop.f32.mrb[33].mxu0  ;;  %v1709_v22 = vpop.f32.mrb[34].mxu1 }
 0x169   :  { %v5288_v21 = vadd.f32 %v2230_v17, %v1707_v15  ;;  %v2232_v24 = vpop.f32.mrb[34].mxu0  ;;  %v1711_v31 = vpop.f32.mrb[35].mxu1 }
 0x16a   :  { %8488 = vst [vmem:[#allocation33_spill] sm:$0xff] %v5286_v14  ;;  %v5290_v30 = vadd.f32 %v2232_v24, %v1709_v22  ;;  %v2234_v34 = vpop.f32.mrb[35].mxu0  ;;  %v4893_v22 = vld [vmem:[#allocation2 + $0x4a0] ss:$16 sps:$4 sm:$0xff]   ;;  %v2945_v24 = vmul.f32 %v5228_v61, %v5228_v61 }
 0x16b   :  { %8489 = vst [vmem:[#allocation34_spill] sm:$0xff] %v5288_v21  ;;  %v5292_v37 = vadd.f32 %v2234_v34, %v1711_v31  ;;  %1974 = vmatmul.mubr.bf16.gmra.mrb[140].mxu1 %v4881_v19  ;;  %v4894_v34 = vld [vmem:[#allocation2 + $0x4a8] ss:$16 sps:$4 sm:$0xff]  }
 0x16c   :  { %8490 = vst [vmem:[#allocation35_spill] sm:$0xff] %v5290_v30  ;;  %2497 = vmatmul.mubr.bf16.gmra.mrb[140].mxu0 %v4882_v26  ;;  %1983 = vmatprep.mubr.bf16.mxu1 %v4883_v28 }
 0x16d   :  { %8491 = vst [vmem:[#allocation36_spill] sm:$0xff] %v5292_v37  ;;  %2506 = vmatprep.mubr.bf16.mxu0 %v4885_v35  ;;  %v4895_v35 = vld [vmem:[#allocation2 + $0x4c4] ss:$16 sps:$4 sm:$0xff]  }
 0x16e   :  { %v1715_v38 = vpop.f32.mrb[36].mxu1 }
 0x16f   :  { %v2238_v40 = vpop.f32.mrb[36].mxu0  ;;  %v1717_v43 = vpop.f32.mrb[37].mxu1 }
 0x170   :  { %v5294_v42 = vadd.f32 %v2238_v40, %v1715_v38  ;;  %v2240_v46 = vpop.f32.mrb[37].mxu0  ;;  %v1719_v52 = vpop.f32.mrb[38].mxu1  ;;  %v2943_v38 = vmul.f32 %v5224_v53, %v5224_v53 }
 0x171   :  { %v5296_v51 = vadd.f32 %v2240_v46, %v1717_v43  ;;  %v2242_v55 = vpop.f32.mrb[38].mxu0  ;;  %v1721_v63 = vpop.f32.mrb[39].mxu1 }
 0x172   :  { %8492 = vst [vmem:[#allocation37_spill] sm:$0xff] %v5294_v42  ;;  %v5298_v62 = vadd.f32 %v2242_v55, %v1719_v52  ;;  %v2244_v3 = vpop.f32.mrb[39].mxu0  ;;  %v2944_v52 = vmul.f32 %v5226_v58, %v5226_v58  ;;  %v2947_v55 = vmul.f32 %v5232_v4, %v5232_v4 }
 0x173   :  { %8493 = vst [vmem:[#allocation38_spill] sm:$0xff] %v5296_v51  ;;  %v5300_v7 = vadd.f32 %v2244_v3, %v1721_v63  ;;  %1984 = vmatmul.mubr.bf16.gmra.mrb[144].mxu1 %v4887_v47  ;;  %v4897_v47 = vld [vmem:[#allocation2 + $0x4cc] ss:$16 sps:$4 sm:$0xff]   ;;  %v2742_v63 = vsel %vm2740_vm0, %v5228_v61, 0.0  ;;  %v3242_v3 = vsel %vm2740_vm0, %v2945_v24, 0.0 }
 0x174   :  { %8494 = vst [vmem:[#allocation39_spill] sm:$0xff] %v5298_v62  ;;  %2507 = vmatmul.mubr.bf16.gmra.mrb[144].mxu0 %v4888_v57  ;;  %1993 = vmatprep.mubr.bf16.mxu1 %v4889_v59  ;;  %v2942_v59 = vmul.f32 %v5222_v48, %v5222_v48  ;;  %v3244_v24 = vsel %vm2740_vm0, %v2947_v55, 0.0  ;;  %v2951_v55 = vmul.f32 %v5240_v20, %v5240_v20 }
 0x175   :  { %8495 = vst [vmem:[#allocation40_spill] sm:$0xff] %v5300_v7  ;;  %2516 = vmatprep.mubr.bf16.mxu0 %v4891_v5  ;;  %v2946_v5 = vmul.f32 %v5230_v0, %v5230_v0 }
 0x176   :  { %v1725_v10 = vpop.f32.mrb[40].mxu1 }
 0x177   :  { %v2248_v12 = vpop.f32.mrb[40].mxu0  ;;  %v1727_v17 = vpop.f32.mrb[41].mxu1 }
 0x178   :  { %v5302_v15 = vadd.f32 %v2248_v12, %v1725_v10  ;;  %v2250_v19 = vpop.f32.mrb[41].mxu0  ;;  %v1729_v28 = vpop.f32.mrb[42].mxu1  ;;  %v2741_v10 = vsel %vm2740_vm0, %v5224_v53, 0.0  ;;  %v3241_v12 = vsel %vm2740_vm0, %v2943_v38, 0.0 }
 0x179   :  { %v5306_v26 = vadd.f32 %v2250_v19, %v1727_v17  ;;  %v2252_v31 = vpop.f32.mrb[42].mxu0  ;;  %v1731_v43 = vpop.f32.mrb[43].mxu1  ;;  %v2637_v17 = vadd.f32 %v5226_v58, %v5222_v48  ;;  %v3138_v19 = vadd.f32 %v2944_v52, %v2942_v59  ;;  %v2948_v59 = vmul.f32 %v5234_v9, %v5234_v9 }
 0x17a   :  { %8496 = vst [vmem:[#allocation41_spill] sm:$0xff] %v5302_v15  ;;  %v5310_v40 = vadd.f32 %v2252_v31, %v1729_v28  ;;  %v2254_v46 = vpop.f32.mrb[43].mxu0  ;;  %v2949_v28 = vmul.f32 %v5236_v13, %v5236_v13 }
 0x17b   :  { %8497 = vst [vmem:[#allocation42_spill] sm:$0xff] %v5306_v26  ;;  %v5316_v57 = vadd.f32 %v2254_v46, %v1731_v43  ;;  %1994 = vmatmul.mubr.bf16.gmra.mrb[148].mxu1 %v4893_v22  ;;  %v2744_v22 = vsel %vm2740_vm0, %v5232_v4, 0.0  ;;  %v3243_v43 = vadd.f32 %v3242_v3, %v3241_v12  ;;  %v2638_v46 = vadd.f32 %v2637_v17, %v5230_v0  ;;  %v4901_v3 = vld [vmem:[#allocation2 + $0x4e4] ss:$16 sps:$4 sm:$0xff]   ;;  %v4903_v0 = vld [vmem:[#allocation2 + $0x4ec] ss:$16 sps:$4 sm:$0xff]  }
 0x17c   :  { %8498 = vst [vmem:[#allocation43_spill] sm:$0xff] %v5310_v40  ;;  %2517 = vmatmul.mubr.bf16.gmra.mrb[148].mxu0 %v4894_v34  ;;  %2003 = vmatprep.mubr.bf16.mxu1 %v4895_v35  ;;  %v2743_v35 = vadd.f32 %v2742_v63, %v2741_v10  ;;  %v3139_v52 = vadd.f32 %v3138_v19, %v2946_v5  ;;  %v4900_v63 = vld [vmem:[#allocation2 + $0x4c8] ss:$16 sps:$4 sm:$0xff]   ;;  %v2746_v5 = vsel %vm2740_vm0, %v5236_v13, 0.0  ;;  %v3246_v19 = vsel %vm2740_vm0, %v2949_v28, 0.0 }
 0x17d   :  { %8499 = vst [vmem:[#allocation44_spill] sm:$0xff] %v5316_v57  ;;  %2526 = vmatprep.mubr.bf16.mxu0 %v4897_v47  ;;  %v4899_v47 = vld [vmem:[#allocation2 + $0x4c0] ss:$16 sps:$4 sm:$0xff]   ;;  %v3245_v12 = vadd.f32 %v3244_v24, %v3243_v43  ;;  %v2953_v24 = vmul.f32 %v5244_v29, %v5244_v29 }
 0x17e   :  { %v1735_v31 = vpop.f32.mrb[44].mxu1  ;;  %v2745_v10 = vadd.f32 %v2744_v22, %v2743_v35  ;;  %v3140_v22 = vadd.f32 %v3139_v52, %v2948_v59 }
 0x17f   :  { %v2258_v34 = vpop.f32.mrb[44].mxu0  ;;  %v1737_v61 = vpop.f32.mrb[45].mxu1  ;;  %v3247_v35 = vadd.f32 %v3246_v19, %v3245_v12  ;;  %v4906_v12 = vld [vmem:[#allocation2 + $0x4e8] ss:$16 sps:$4 sm:$0xff]  }
 0x180   :  { %v5336_v38 = vadd.f32 %v2258_v34, %v1735_v31  ;;  %v2260_v58 = vpop.f32.mrb[45].mxu0  ;;  %v1739_v53 = vpop.f32.mrb[46].mxu1  ;;  %v2747_v28 = vadd.f32 %v2746_v5, %v2745_v10  ;;  %v4905_v10 = vld [vmem:[#allocation2 + $0x4e0] ss:$16 sps:$4 sm:$0xff]   ;;  %v2954_v5 = vmul.f32 %v5246_v32, %v5246_v32 }
 0x181   :  { %v5342_v4 = vadd.f32 %v2260_v58, %v1737_v61  ;;  %v2262_v48 = vpop.f32.mrb[46].mxu0  ;;  %v1741_v31 = vpop.f32.mrb[47].mxu1  ;;  %v2950_v58 = vmul.f32 %v5238_v16, %v5238_v16 }
 0x182   :  { %8500 = vst [vmem:[#allocation45_spill] sm:$0xff] %v5336_v38  ;;  %v5344_v17 = vadd.f32 %v2262_v48, %v1739_v53  ;;  %v2264_v34 = vpop.f32.mrb[47].mxu0  ;;  %v2639_v38 = vadd.f32 %v2638_v46, %v5234_v9  ;;  %v2748_v48 = vsel %vm2740_vm0, %v5240_v20, 0.0  ;;  %v3248_v53 = vsel %vm2740_vm0, %v2951_v55, 0.0 }
 0x183   :  { %8501 = vst [vmem:[#allocation46_spill] sm:$0xff] %v5342_v4  ;;  %v5351_v61 = vadd.f32 %v2264_v34, %v1741_v31  ;;  %2004 = vmatmul.mubr.bf16.gmra.mrb[152].mxu1 %v4899_v47  ;;  %v3141_v31 = vadd.f32 %v3140_v22, %v2950_v58  ;;  %v2952_v46 = vmul.f32 %v5242_v25, %v5242_v25 }
 0x184   :  { %2527 = vmatmul.mubr.bf16.gmra.mrb[152].mxu0 %v4900_v63  ;;  %2013 = vmatprep.mubr.bf16.mxu1 %v4901_v3  ;;  %v2640_v43 = vadd.f32 %v2639_v38, %v5238_v16  ;;  %v2749_v59 = vadd.f32 %v2748_v48, %v2747_v28  ;;  %v3249_v34 = vadd.f32 %v3248_v53, %v3247_v35  ;;  %v3250_v38 = vsel %vm2740_vm0, %v2953_v24, 0.0  ;;  %v4907_v48 = vld [vmem:[#allocation2 + $0x504] ss:$16 sps:$4 sm:$0xff]  }
 0x185   :  { %2536 = vmatprep.mubr.bf16.mxu0 %v4903_v0  ;;  %v2955_v55 = vmul.f32 %v5248_v36, %v5248_v36  ;;  %v2750_v0 = vsel %vm2740_vm0, %v5244_v29, 0.0  ;;  %v3142_v16 = vadd.f32 %v3141_v31, %v2952_v46  ;;  %v2752_v29 = vsel %vm2740_vm0, %v5248_v36, 0.0 }
 0x186   :  { %v1745_v47 = vpop.f32.mrb[48].mxu1  ;;  %v2751_v13 = vadd.f32 %v2750_v0, %v2749_v59  ;;  %v3251_v9 = vadd.f32 %v3250_v38, %v3249_v34  ;;  %v2959_v46 = vmul.f32 %v5256_v54, %v5256_v54  ;;  %v2754_v34 = vsel %vm2740_vm0, %v5252_v45, 0.0 }
 0x187   :  { %v2268_v52 = vpop.f32.mrb[48].mxu0  ;;  %v1747_v63 = vpop.f32.mrb[49].mxu1 }
 0x188   :  { %v5364_v20 = vadd.f32 %v2268_v52, %v1745_v47  ;;  %v2270_v3 = vpop.f32.mrb[49].mxu0  ;;  %v1749_v58 = vpop.f32.mrb[50].mxu1  ;;  %v4909_v47 = vld [vmem:[#allocation2 + $0x50c] ss:$16 sps:$4 sm:$0xff]   ;;  %v2641_v52 = vadd.f32 %v2640_v43, %v5242_v25  ;;  %v2956_v43 = vmul.f32 %v5250_v41, %v5250_v41  ;;  %v2753_v31 = vadd.f32 %v2752_v29, %v2751_v13  ;;  %v4912_v29 = vld [vmem:[#allocation2 + $0x508] ss:$16 sps:$4 sm:$0xff]  }
 0x189   :  { %v5371_v19 = vadd.f32 %v2270_v3, %v1747_v63  ;;  %v2272_v22 = vpop.f32.mrb[50].mxu0  ;;  %v1751_v28 = vpop.f32.mrb[51].mxu1  ;;  %v3252_v63 = vsel %vm2740_vm0, %v2955_v55, 0.0  ;;  %v2957_v3 = vmul.f32 %v5252_v45, %v5252_v45  ;;  %v3256_v45 = vsel %vm2740_vm0, %v2959_v46, 0.0 }
 0x18a   :  { %v5373_v53 = vadd.f32 %v2272_v22, %v1749_v58  ;;  %v2274_v35 = vpop.f32.mrb[51].mxu0  ;;  %v2642_v58 = vadd.f32 %v2641_v52, %v5246_v32  ;;  %v3143_v22 = vadd.f32 %v3142_v16, %v2954_v5  ;;  %v3253_v59 = vadd.f32 %v3252_v63, %v3251_v9  ;;  %v4913_v63 = vld [vmem:[#allocation2 + $0x524] ss:$16 sps:$4 sm:$0xff]  }
 0x18b   :  { %8502 = vst [vmem:[#allocation47_spill] sm:$0xff] %v5371_v19  ;;  %v5378_v24 = vadd.f32 %v2274_v35, %v1751_v28  ;;  %2014 = vmatmul.mubr.bf16.gmra.mrb[156].mxu1 %v4905_v10  ;;  %v4911_v10 = vld [vmem:[#allocation2 + $0x500] ss:$16 sps:$4 sm:$0xff]   ;;  %v3254_v38 = vsel %vm2740_vm0, %v2957_v3, 0.0  ;;  %v2958_v16 = vmul.f32 %v5254_v49, %v5254_v49  ;;  %v2756_v9 = vsel %vm2740_vm0, %v5256_v54, 0.0 }
 0x18c   :  { %8503 = vst [vmem:[#allocation48_spill] sm:$0xff] %v5373_v53  ;;  %2537 = vmatmul.mubr.bf16.gmra.mrb[156].mxu0 %v4906_v12  ;;  %2023 = vmatprep.mubr.bf16.mxu1 %v4907_v48  ;;  %v2643_v48 = vadd.f32 %v2642_v58, %v5250_v41  ;;  %v3144_v28 = vadd.f32 %v3143_v22, %v2956_v43  ;;  %v4915_v58 = vld [vmem:[#allocation2 + $0x52c] ss:$16 sps:$4 sm:$0xff]  }
 0x18d   :  { %8504 = vst [vmem:[#allocation49_spill] sm:$0xff] %v5378_v24  ;;  %2546 = vmatprep.mubr.bf16.mxu0 %v4909_v47  ;;  %v2755_v3 = vadd.f32 %v2754_v34, %v2753_v31  ;;  %v3255_v22 = vadd.f32 %v3254_v38, %v3253_v59  ;;  %v2960_v31 = vmul.f32 %v5258_v60, %v5258_v60  ;;  %v2758_v34 = vsel %vm2740_vm0, %v5260_v2, 0.0 }
 0x18e   :  { %v1755_v55 = vpop.f32.mrb[52].mxu1  ;;  %v2644_v43 = vadd.f32 %v2643_v48, %v5254_v49 }
 0x18f   :  { %v2278_v0 = vpop.f32.mrb[52].mxu0  ;;  %v1757_v12 = vpop.f32.mrb[53].mxu1  ;;  %v3257_v46 = vadd.f32 %v3256_v45, %v3255_v22 }
 0x190   :  { %v5393_v5 = vadd.f32 %v2278_v0, %v1755_v55  ;;  %v2280_v13 = vpop.f32.mrb[53].mxu0  ;;  %v1759_v47 = vpop.f32.mrb[54].mxu1  ;;  %v2961_v55 = vmul.f32 %v5260_v2, %v5260_v2 }
 0x191   :  { %v5398_v35 = vadd.f32 %v2280_v13, %v1757_v12  ;;  %v2282_v52 = vpop.f32.mrb[54].mxu0  ;;  %v1761_v36 = vpop.f32.mrb[55].mxu1  ;;  %v3145_v12 = vadd.f32 %v3144_v28, %v2958_v16  ;;  %v2757_v13 = vadd.f32 %v2756_v9, %v2755_v3  ;;  %v2760_v28 = vsel %vm2740_vm0, %v5264_v11, 0.0 }
 0x192   :  { %8505 = vst [vmem:[#allocation50_spill] sm:$0xff] %v5393_v5  ;;  %v5403_v0 = vadd.f32 %v2282_v52, %v1759_v47  ;;  %v2284_v32 = vpop.f32.mrb[55].mxu0  ;;  %v2963_v47 = vmul.f32 %v5264_v11, %v5264_v11  ;;  %v3258_v59 = vsel %vm2740_vm0, %v2961_v55, 0.0  ;;  %v2967_v11 = vmul.f32 %v5272_v33, %v5272_v33 }
 0x193   :  { %8506 = vst [vmem:[#allocation51_spill] sm:$0xff] %v5398_v35  ;;  %v5406_v54 = vadd.f32 %v2284_v32, %v1761_v36  ;;  %2024 = vmatmul.mubr.bf16.gmra.mrb[160].mxu1 %v4911_v10  ;;  %v2962_v32 = vmul.f32 %v5262_v6, %v5262_v6  ;;  %v2645_v36 = vadd.f32 %v2644_v43, %v5258_v60  ;;  %v4917_v10 = vld [vmem:[#allocation2 + $0x520] ss:$16 sps:$4 sm:$0xff]   ;;  %v2762_v60 = vsel %vm2740_vm0, %v5268_v23, 0.0 }
 0x194   :  { %2547 = vmatmul.mubr.bf16.gmra.mrb[160].mxu0 %v4912_v29  ;;  %2033 = vmatprep.mubr.bf16.mxu1 %v4913_v63  ;;  %v3146_v45 = vadd.f32 %v3145_v12, %v2960_v31  ;;  %v2759_v48 = vadd.f32 %v2758_v34, %v2757_v13  ;;  %v4918_v63 = vld [vmem:[#allocation2 + $0x528] ss:$16 sps:$4 sm:$0xff]   ;;  %v3259_v3 = vadd.f32 %v3258_v59, %v3257_v46  ;;  %v3260_v55 = vsel %vm2740_vm0, %v2963_v47, 0.0  ;;  %v4919_v12 = vld [vmem:[#allocation2 + $0x544] ss:$16 sps:$4 sm:$0xff]  }
 0x195   :  { %8507 = vst [vmem:[#allocation52_spill] sm:$0xff] %v5406_v54  ;;  %2556 = vmatprep.mubr.bf16.mxu0 %v4915_v58  ;;  %v2965_v58 = vmul.f32 %v5268_v23, %v5268_v23  ;;  %v2646_v13 = vadd.f32 %v2645_v36, %v5262_v6  ;;  %v2964_v34 = vmul.f32 %v5266_v18, %v5266_v18  ;;  %v4921_v59 = vld [vmem:[#allocation2 + $0x54c] ss:$16 sps:$4 sm:$0xff]  }
 0x196   :  { %v1765_v38 = vpop.f32.mrb[56].mxu1  ;;  %v3147_v31 = vadd.f32 %v3146_v45, %v2962_v32  ;;  %v2761_v47 = vadd.f32 %v2760_v28, %v2759_v48  ;;  %v2966_v32 = vmul.f32 %v5270_v27, %v5270_v27  ;;  %v2764_v48 = vsel %vm2740_vm0, %v5272_v33, 0.0 }
 0x197   :  { %v2288_v16 = vpop.f32.mrb[56].mxu0  ;;  %v1767_v29 = vpop.f32.mrb[57].mxu1  ;;  %v2647_v36 = vadd.f32 %v2646_v13, %v5266_v18  ;;  %v2772_v18 = vsel %vm2740_vm0, %v5288_v21, 0.0 }
 0x198   :  { %v5420_v9 = vadd.f32 %v2288_v16, %v1765_v38  ;;  %v2290_v52 = vpop.f32.mrb[57].mxu0  ;;  %v1769_v43 = vpop.f32.mrb[58].mxu1  ;;  %v3148_v45 = vadd.f32 %v3147_v31, %v2964_v34  ;;  %v2763_v28 = vadd.f32 %v2762_v60, %v2761_v47  ;;  %v4923_v34 = vld [vmem:[#allocation2 + $0x540] ss:$16 sps:$4 sm:$0xff]   ;;  %v2968_v60 = vmul.f32 %v5274_v39, %v5274_v39 }
 0x199   :  { %v5425_v22 = vadd.f32 %v2290_v52, %v1767_v29  ;;  %v2292_v2 = vpop.f32.mrb[58].mxu0  ;;  %v1771_v16 = vpop.f32.mrb[59].mxu1  ;;  %v3261_v52 = vadd.f32 %v3260_v55, %v3259_v3  ;;  %v3264_v3 = vsel %vm2740_vm0, %v2967_v11, 0.0  ;;  %v2969_v55 = vmul.f32 %v5276_v44, %v5276_v44 }
 0x19a   :  { %v5430_v38 = vadd.f32 %v2292_v2, %v1769_v43  ;;  %v2294_v46 = vpop.f32.mrb[59].mxu0  ;;  %v3262_v2 = vsel %vm2740_vm0, %v2965_v58, 0.0  ;;  %v2648_v58 = vadd.f32 %v2647_v36, %v5270_v27  ;;  %v2971_v11 = vmul.f32 %v5280_v56, %v5280_v56 }
 0x19b   :  { %v5434_v29 = vadd.f32 %v2294_v46, %v1771_v16  ;;  %2034 = vmatmul.mubr.bf16.gmra.mrb[164].mxu1 %v4917_v10  ;;  %v3263_v10 = vadd.f32 %v3262_v2, %v3261_v52  ;;  %v2765_v46 = vadd.f32 %v2764_v48, %v2763_v28  ;;  %v4924_v52 = vld [vmem:[#allocation2 + $0x548] ss:$16 sps:$4 sm:$0xff]   ;;  %v4925_v2 = vld [vmem:[#allocation2 + $0x564] ss:$16 sps:$4 sm:$0xff]   ;;  %v4927_v28 = vld [vmem:[#allocation2 + $0x56c] ss:$16 sps:$4 sm:$0xff]   ;;  %v2970_v27 = vmul.f32 %v5278_v50, %v5278_v50 }
 0x19c   :  { %2557 = vmatmul.mubr.bf16.gmra.mrb[164].mxu0 %v4918_v63  ;;  %2043 = vmatprep.mubr.bf16.mxu1 %v4919_v12  ;;  %v3149_v63 = vadd.f32 %v3148_v45, %v2966_v32  ;;  %v2766_v32 = vsel %vm2740_vm0, %v5276_v44, 0.0 }
 0x19d   :  { %8508 = vst [vmem:[#allocation53_spill] sm:$0xff] %v5434_v29  ;;  %2566 = vmatprep.mubr.bf16.mxu0 %v4921_v59  ;;  %v3265_v36 = vadd.f32 %v3264_v3, %v3263_v10  ;;  %v2768_v3 = vsel %vm2740_vm0, %v5280_v56, 0.0  ;;  %v2767_v44 = vadd.f32 %v2766_v32, %v2765_v46  ;;  %v4930_v32 = vld [vmem:[#allocation2 + $0x568] ss:$16 sps:$4 sm:$0xff]  }
 0x19e   :  { %v1775_v43 = vpop.f32.mrb[60].mxu1  ;;  %v3150_v10 = vadd.f32 %v3149_v63, %v2968_v60  ;;  %v4929_v63 = vld [vmem:[#allocation2 + $0x560] ss:$16 sps:$4 sm:$0xff]   ;;  %v2770_v60 = vsel %vm2740_vm0, %v5284_v8, 0.0 }
 0x19f   :  { %v2298_v16 = vpop.f32.mrb[60].mxu0  ;;  %v1777_v13 = vpop.f32.mrb[61].mxu1  ;;  %v2769_v23 = vadd.f32 %v2768_v3, %v2767_v44  ;;  %v2974_v44 = vmul.f32 %v5286_v14, %v5286_v14  ;;  %v4931_v3 = vld [vmem:[#allocation2 + $0x584] ss:$16 sps:$4 sm:$0xff]  }
 0x1a0   :  { %v5448_v12 = vadd.f32 %v2298_v16, %v1775_v43  ;;  %v2300_v31 = vpop.f32.mrb[61].mxu0  ;;  %v1779_v47 = vpop.f32.mrb[62].mxu1  ;;  %v3266_v16 = vsel %vm2740_vm0, %v2969_v55, 0.0 }
 0x1a1   :  { %v5454_v59 = vadd.f32 %v2300_v31, %v1777_v13  ;;  %v2302_v33 = vpop.f32.mrb[62].mxu0  ;;  %v1781_v43 = vpop.f32.mrb[63].mxu1  ;;  %v2649_v31 = vadd.f32 %v2648_v58, %v5274_v39  ;;  %v3267_v55 = vadd.f32 %v3266_v16, %v3265_v36  ;;  %v2972_v58 = vmul.f32 %v5282_v1, %v5282_v1 }
 0x1a2   :  { %8509 = vst [vmem:[#allocation54_spill] sm:$0xff] %v5448_v12  ;;  %v5458_v45 = vadd.f32 %v2302_v33, %v1779_v47  ;;  %v2304_v48 = vpop.f32.mrb[63].mxu0  ;;  %v3268_v33 = vsel %vm2740_vm0, %v2971_v11, 0.0  ;;  %v2973_v47 = vmul.f32 %v5284_v8, %v5284_v8  ;;  %v2975_v11 = vmul.f32 %v5288_v21, %v5288_v21  ;;  %v4933_v8 = vld [vmem:[#allocation2 + $0x58c] ss:$16 sps:$4 sm:$0xff]  }
 0x1a3   :  { %8510 = vst [vmem:[#allocation55_spill] sm:$0xff] %v5454_v59  ;;  %v5463_v13 = vadd.f32 %v2304_v48, %v1781_v43  ;;  %2044 = vmatmul.mubr.bf16.gmra.mrb[168].mxu1 %v4923_v34  ;;  %v2650_v43 = vadd.f32 %v2649_v31, %v5278_v50  ;;  %v3151_v48 = vadd.f32 %v3150_v10, %v2970_v27 }
 0x1a4   :  { %8511 = vst [vmem:[#allocation56_spill] sm:$0xff] %v5458_v45  ;;  %2567 = vmatmul.mubr.bf16.gmra.mrb[168].mxu0 %v4924_v52  ;;  %2053 = vmatprep.mubr.bf16.mxu1 %v4925_v2  ;;  %v3269_v46 = vadd.f32 %v3268_v33, %v3267_v55  ;;  %v3270_v27 = vsel %vm2740_vm0, %v2973_v47, 0.0  ;;  %v2771_v50 = vadd.f32 %v2770_v60, %v2769_v23 }
 0x1a5   :  { %8512 = vst [vmem:[#allocation57_spill] sm:$0xff] %v5463_v13  ;;  %2576 = vmatprep.mubr.bf16.mxu0 %v4927_v28  ;;  %v2979_v23 = vmul.f32 %v5296_v51, %v5296_v51 }
 0x1a6   :  { %v1785_v56 = vpop.f32.mrb[64].mxu1  ;;  %v3271_v47 = vadd.f32 %v3270_v27, %v3269_v46  ;;  %v2978_v27 = vmul.f32 %v5294_v42, %v5294_v42 }
 0x1a7   :  { %v2308_v34 = vpop.f32.mrb[64].mxu0  ;;  %v1787_v2 = vpop.f32.mrb[65].mxu1 }
 0x1a8   :  { %v5478_v52 = vadd.f32 %v2308_v34, %v1785_v56  ;;  %v2310_v36 = vpop.f32.mrb[65].mxu0  ;;  %v1789_v16 = vpop.f32.mrb[66].mxu1  ;;  %v2651_v56 = vadd.f32 %v2650_v43, %v5282_v1  ;;  %v3152_v34 = vadd.f32 %v3151_v48, %v2972_v58  ;;  %v2976_v43 = vmul.f32 %v5290_v30, %v5290_v30 }
 0x1a9   :  { %v5483_v28 = vadd.f32 %v2310_v36, %v1787_v2  ;;  %v2312_v31 = vpop.f32.mrb[66].mxu0  ;;  %v1791_v33 = vpop.f32.mrb[67].mxu1  ;;  %v3272_v2 = vsel %vm2740_vm0, %v2975_v11, 0.0  ;;  %v2977_v36 = vmul.f32 %v5292_v37, %v5292_v37  ;;  %v2773_v48 = vadd.f32 %v2772_v18, %v2771_v50 }
 0x1aa   :  { %v5485_v10 = vadd.f32 %v2312_v31, %v1789_v16  ;;  %v2314_v55 = vpop.f32.mrb[67].mxu0  ;;  %v2652_v16 = vadd.f32 %v2651_v56, %v5286_v14  ;;  %v3153_v31 = vadd.f32 %v3152_v34, %v2974_v44  ;;  %v3273_v58 = vadd.f32 %v3272_v2, %v3271_v47  ;;  %v4936_v34 = vld [vmem:[#allocation2 + $0x588] ss:$16 sps:$4 sm:$0xff]   ;;  %v4937_v47 = vld [vmem:[#allocation2 + $0x5a4] ss:$16 sps:$4 sm:$0xff]  }
 0x1ab   :  { %8513 = vst [vmem:[#allocation58_spill] sm:$0xff] %v5483_v28  ;;  %v5488_v39 = vadd.f32 %v2314_v55, %v1791_v33  ;;  %2054 = vmatmul.mubr.bf16.gmra.mrb[172].mxu1 %v4929_v63  ;;  %v2774_v11 = vsel %vm2740_vm0, %v5292_v37, 0.0  ;;  %v3274_v63 = vsel %vm2740_vm0, %v2977_v36, 0.0  ;;  %v4935_v33 = vld [vmem:[#allocation2 + $0x580] ss:$16 sps:$4 sm:$0xff]   ;;  %v2776_v2 = vsel %vm2740_vm0, %v5296_v51, 0.0 }
 0x1ac   :  { %8514 = vst [vmem:[#allocation59_spill] sm:$0xff] %v5485_v10  ;;  %2577 = vmatmul.mubr.bf16.gmra.mrb[172].mxu0 %v4930_v32  ;;  %2063 = vmatprep.mubr.bf16.mxu1 %v4931_v3  ;;  %v2653_v55 = vadd.f32 %v2652_v16, %v5290_v30  ;;  %v3276_v36 = vsel %vm2740_vm0, %v2979_v23, 0.0  ;;  %v4939_v16 = vld [vmem:[#allocation2 + $0x5ac] ss:$16 sps:$4 sm:$0xff]   ;;  %v2980_v23 = vmul.f32 %v5298_v62, %v5298_v62 }
 0x1ad   :  { %8515 = vst [vmem:[#allocation60_spill] sm:$0xff] %v5488_v39  ;;  %2586 = vmatprep.mubr.bf16.mxu0 %v4933_v8  ;;  %v3154_v8 = vadd.f32 %v3153_v31, %v2976_v43  ;;  %v2775_v31 = vadd.f32 %v2774_v11, %v2773_v48  ;;  %v3275_v43 = vadd.f32 %v3274_v63, %v3273_v58 }
 0x1ae   :  { %v1795_v46 = vpop.f32.mrb[68].mxu1 }
 0x1af   :  { %v2318_v60 = vpop.f32.mrb[68].mxu0  ;;  %v1797_v32 = vpop.f32.mrb[69].mxu1  ;;  %v3155_v30 = vadd.f32 %v3154_v8, %v2978_v27  ;;  %v2777_v14 = vadd.f32 %v2776_v2, %v2775_v31  ;;  %v3277_v51 = vadd.f32 %v3276_v36, %v3275_v43  ;;  %v4943_v31 = vld [vmem:[#allocation2 + $0x5c4] ss:$16 sps:$4 sm:$0xff]   ;;  %v2780_v43 = vsel %vm2740_vm0, %v5306_v26, 0.0 }
 0x1b0   :  { %v5505_v44 = vadd.f32 %v2318_v60, %v1795_v46  ;;  %v2320_v3 = vpop.f32.mrb[69].mxu0  ;;  %v1799_v50 = vpop.f32.mrb[70].mxu1  ;;  %v2981_v46 = vmul.f32 %v5300_v7, %v5300_v7 }
 0x1b1   :  { %v5508_v18 = vadd.f32 %v2320_v3, %v1797_v32  ;;  %v2322_v56 = vpop.f32.mrb[70].mxu0  ;;  %v1801_v37 = vpop.f32.mrb[71].mxu1  ;;  %v2654_v3 = vadd.f32 %v2653_v55, %v5294_v42  ;;  %v4941_v55 = vld [vmem:[#allocation2 + $0x5a0] ss:$16 sps:$4 sm:$0xff]   ;;  %v3156_v8 = vadd.f32 %v3155_v30, %v2980_v23  ;;  %v4951_v42 = vld [vmem:[#allocation2 + $0x5ec] ss:$16 sps:$4 sm:$0xff]  }
 0x1b2   :  { %8516 = vst [vmem:[#allocation61_spill] sm:$0xff] %v5505_v44  ;;  %v5515_v60 = vadd.f32 %v2322_v56, %v1799_v50  ;;  %v2324_v21 = vpop.f32.mrb[71].mxu0  ;;  %v2778_v50 = vsel %vm2740_vm0, %v5300_v7, 0.0  ;;  %v3278_v56 = vsel %vm2740_vm0, %v2981_v46, 0.0 }
 0x1b3   :  { %8517 = vst [vmem:[#allocation62_spill] sm:$0xff] %v5508_v18  ;;  %v5517_v32 = vadd.f32 %v2324_v21, %v1801_v37  ;;  %2064 = vmatmul.mubr.bf16.gmra.mrb[176].mxu1 %v4935_v33  ;;  %v2983_v21 = vmul.f32 %v5306_v26, %v5306_v26  ;;  %v2982_v37 = vmul.f32 %v5302_v15, %v5302_v15 }
 0x1b4   :  { %2587 = vmatmul.mubr.bf16.gmra.mrb[176].mxu0 %v4936_v34  ;;  %2073 = vmatprep.mubr.bf16.mxu1 %v4937_v47  ;;  %v2655_v11 = vadd.f32 %v2654_v3, %v5298_v62  ;;  %v2779_v34 = vadd.f32 %v2778_v50, %v2777_v14  ;;  %v3279_v47 = vadd.f32 %v3278_v56, %v3277_v51  ;;  %v4945_v14 = vld [vmem:[#allocation2 + $0x5cc] ss:$16 sps:$4 sm:$0xff]  }
 0x1b5   :  { %8518 = vst [vmem:[#allocation63_spill] sm:$0xff] %v5517_v32  ;;  %2596 = vmatprep.mubr.bf16.mxu0 %v4939_v16  ;;  %v4942_v16 = vld [vmem:[#allocation2 + $0x5a8] ss:$16 sps:$4 sm:$0xff]   ;;  %v3280_v7 = vsel %vm2740_vm0, %v2983_v21, 0.0  ;;  %v2985_v3 = vmul.f32 %v5316_v57, %v5316_v57  ;;  %v3157_v23 = vadd.f32 %v3156_v8, %v2982_v37  ;;  %v2984_v50 = vmul.f32 %v5310_v40, %v5310_v40 }
 0x1b6   :  { %v1805_v48 = vpop.f32.mrb[72].mxu1  ;;  %v2656_v51 = vadd.f32 %v2655_v11, %v5302_v15  ;;  %v2781_v21 = vadd.f32 %v2780_v43, %v2779_v34  ;;  %v8522_v11 = vld [vmem:[#allocation45_spill] sm:$0xff]  ;;  %v2989_v34 = vmul.f32 %v5351_v61, %v5351_v61 }
 0x1b7   :  { %v2328_v58 = vpop.f32.mrb[72].mxu0  ;;  %v1807_v27 = vpop.f32.mrb[73].mxu1  ;;  %v2986_v37 = vmul.f32 %v8522_v11, %v8522_v11  ;;  %v4947_v43 = vld [vmem:[#allocation2 + $0x5c0] ss:$16 sps:$4 sm:$0xff]  }
 0x1b8   :  { %v5530_v63 = vadd.f32 %v2328_v58, %v1805_v48  ;;  %v2330_v33 = vpop.f32.mrb[73].mxu0  ;;  %v1809_v36 = vpop.f32.mrb[74].mxu1  ;;  %v2657_v8 = vadd.f32 %v2656_v51, %v5310_v40  ;;  %v4949_v40 = vld [vmem:[#allocation2 + $0x5e4] ss:$16 sps:$4 sm:$0xff]  }
 0x1b9   :  { %v5532_v2 = vadd.f32 %v2330_v33, %v1807_v27  ;;  %v2332_v46 = vpop.f32.mrb[74].mxu0  ;;  %v1811_v58 = vpop.f32.mrb[75].mxu1  ;;  %v2987_v27 = vmul.f32 %v5342_v4, %v5342_v4  ;;  %v3281_v33 = vadd.f32 %v3280_v7, %v3279_v47 }
 0x1ba   :  { %8519 = vst [vmem:[#allocation64_spill] sm:$0xff] %v5530_v63  ;;  %v5539_v48 = vadd.f32 %v2332_v46, %v1809_v36  ;;  %v2334_v30 = vpop.f32.mrb[75].mxu0  ;;  %v2782_v36 = vsel %vm2740_vm0, %v5316_v57, 0.0  ;;  %v3282_v46 = vsel %vm2740_vm0, %v2985_v3, 0.0 }
 0x1bb   :  { %8520 = vst [vmem:[#allocation65_spill] sm:$0xff] %v5532_v2  ;;  %v5544_v56 = vadd.f32 %v2334_v30, %v1811_v58  ;;  %2074 = vmatmul.mubr.bf16.gmra.mrb[180].mxu1 %v4941_v55  ;;  %v3158_v58 = vadd.f32 %v3157_v23, %v2984_v50  ;;  %v2784_v55 = vsel %vm2740_vm0, %v5342_v4, 0.0  ;;  %v3284_v7 = vsel %vm2740_vm0, %v2987_v27, 0.0  ;;  %v4948_v50 = vld [vmem:[#allocation2 + $0x5c8] ss:$16 sps:$4 sm:$0xff]  }
 0x1bc   :  { %2597 = vmatmul.mubr.bf16.gmra.mrb[180].mxu0 %v4942_v16  ;;  %2083 = vmatprep.mubr.bf16.mxu1 %v4943_v31  ;;  %v2783_v3 = vadd.f32 %v2782_v36, %v2781_v21  ;;  %v2658_v4 = vadd.f32 %v2657_v8, %v8522_v11  ;;  %v2988_v27 = vmul.f32 %v5344_v17, %v5344_v17 }
 0x1bd   :  { %8521 = vst [vmem:[#allocation66_spill] sm:$0xff] %v5544_v56  ;;  %2606 = vmatprep.mubr.bf16.mxu0 %v4945_v14  ;;  %v3283_v14 = vadd.f32 %v3282_v46, %v3281_v33  ;;  %v3159_v15 = vadd.f32 %v3158_v58, %v2986_v37  ;;  %v2991_v33 = vmul.f32 %v5371_v19, %v5371_v19  ;;  %v2786_v46 = vsel %vm2740_vm0, %v5351_v61, 0.0 }
 0x1be   :  { %v1815_v30 = vpop.f32.mrb[76].mxu1  ;;  %v2785_v1 = vadd.f32 %v2784_v55, %v2783_v3  ;;  %v3286_v37 = vsel %vm2740_vm0, %v2989_v34, 0.0  ;;  %v2990_v8 = vmul.f32 %v5364_v20, %v5364_v20  ;;  %v2659_v58 = vadd.f32 %v2658_v4, %v5344_v17 }
 0x1bf   :  { %v2338_v26 = vpop.f32.mrb[76].mxu0  ;;  %v1817_v16 = vpop.f32.mrb[77].mxu1  ;;  %v3285_v21 = vadd.f32 %v3284_v7, %v3283_v14  ;;  %v3160_v55 = vadd.f32 %v3159_v15, %v2988_v27  ;;  %v2788_v7 = vsel %vm2740_vm0, %v5371_v19, 0.0  ;;  %v3288_v3 = vsel %vm2740_vm0, %v2991_v33, 0.0  ;;  %v4954_v33 = vld [vmem:[#allocation2 + $0x5e8] ss:$16 sps:$4 sm:$0xff]  }
 0x1c0   :  { %v5559_v47 = vadd.f32 %v2338_v26, %v1815_v30  ;;  %v2340_v31 = vpop.f32.mrb[77].mxu0  ;;  %v1819_v51 = vpop.f32.mrb[78].mxu1  ;;  %v2993_v34 = vmul.f32 %v5378_v24, %v5378_v24  ;;  %v2992_v4 = vmul.f32 %v5373_v53, %v5373_v53  ;;  %v2995_v27 = vmul.f32 %v5398_v35, %v5398_v35 }
 0x1c1   :  { %v5561_v57 = vadd.f32 %v2340_v31, %v1817_v16  ;;  %v2342_v23 = vpop.f32.mrb[78].mxu0  ;;  %v1821_v26 = vpop.f32.mrb[79].mxu1  ;;  %v2787_v16 = vadd.f32 %v2786_v46, %v2785_v1  ;;  %v3287_v31 = vadd.f32 %v3286_v37, %v3285_v21  ;;  %v4955_v46 = vld [vmem:[#allocation2 + $0x604] ss:$16 sps:$4 sm:$0xff]  }
 0x1c2   :  { %8523 = vst [vmem:[#allocation45_spill] sm:$0xff] %v5559_v47  ;;  %v5566_v62 = vadd.f32 %v2342_v23, %v1819_v51  ;;  %v2344_v30 = vpop.f32.mrb[79].mxu0  ;;  %v3161_v23 = vadd.f32 %v3160_v55, %v2990_v8  ;;  %v2790_v8 = vsel %vm2740_vm0, %v5378_v24, 0.0  ;;  %v3292_v24 = vsel %vm2740_vm0, %v2995_v27, 0.0 }
 0x1c3   :  { %8524 = vst [vmem:[#allocation67_spill] sm:$0xff] %v5561_v57  ;;  %v5570_v36 = vadd.f32 %v2344_v30, %v1821_v26  ;;  %2084 = vmatmul.mubr.bf16.gmra.mrb[184].mxu1 %v4947_v43  ;;  %v2660_v43 = vadd.f32 %v2659_v58, %v5364_v20  ;;  %v2789_v1 = vadd.f32 %v2788_v7, %v2787_v16  ;;  %v4957_v16 = vld [vmem:[#allocation2 + $0x60c] ss:$16 sps:$4 sm:$0xff]  }
 0x1c4   :  { %8525 = vst [vmem:[#allocation68_spill] sm:$0xff] %v5566_v62  ;;  %2607 = vmatmul.mubr.bf16.gmra.mrb[184].mxu0 %v4948_v50  ;;  %2093 = vmatprep.mubr.bf16.mxu1 %v4949_v40  ;;  %v3289_v37 = vadd.f32 %v3288_v3, %v3287_v31  ;;  %v2994_v58 = vmul.f32 %v5393_v5, %v5393_v5  ;;  %v2792_v31 = vsel %vm2740_vm0, %v5398_v35, 0.0 }
 0x1c5   :  { %8526 = vst [vmem:[#allocation69_spill] sm:$0xff] %v5570_v36  ;;  %2616 = vmatprep.mubr.bf16.mxu0 %v4951_v42  ;;  %v4953_v42 = vld [vmem:[#allocation2 + $0x5e0] ss:$16 sps:$4 sm:$0xff]   ;;  %v3162_v19 = vadd.f32 %v3161_v23, %v2992_v4  ;;  %v2791_v3 = vadd.f32 %v2790_v8, %v2789_v1  ;;  %v2999_v4 = vmul.f32 %v5425_v22, %v5425_v22  ;;  %v2794_v8 = vsel %vm2740_vm0, %v5406_v54, 0.0 }
 0x1c6   :  { %v1825_v14 = vpop.f32.mrb[80].mxu1 }
 0x1c7   :  { %v2348_v51 = vpop.f32.mrb[80].mxu0  ;;  %v1827_v40 = vpop.f32.mrb[81].mxu1  ;;  %v2793_v23 = vadd.f32 %v2792_v31, %v2791_v3  ;;  %v4960_v31 = vld [vmem:[#allocation2 + $0x608] ss:$16 sps:$4 sm:$0xff]  }
 0x1c8   :  { %v5586_v15 = vadd.f32 %v2348_v51, %v1825_v14  ;;  %v2350_v50 = vpop.f32.mrb[81].mxu0  ;;  %v1829_v30 = vpop.f32.mrb[82].mxu1  ;;  %v3290_v51 = vsel %vm2740_vm0, %v2993_v34, 0.0 }
 0x1c9   :  { %v5590_v26 = vadd.f32 %v2350_v50, %v1827_v40  ;;  %v2352_v21 = vpop.f32.mrb[82].mxu0  ;;  %v1831_v14 = vpop.f32.mrb[83].mxu1  ;;  %v2661_v50 = vadd.f32 %v2660_v43, %v5373_v53  ;;  %v2996_v43 = vmul.f32 %v5403_v0, %v5403_v0  ;;  %v2795_v35 = vadd.f32 %v2794_v8, %v2793_v23 }
 0x1ca   :  { %v5596_v55 = vadd.f32 %v2352_v21, %v1829_v30  ;;  %v2354_v7 = vpop.f32.mrb[83].mxu0  ;;  %v2997_v30 = vmul.f32 %v5406_v54, %v5406_v54  ;;  %v3291_v21 = vadd.f32 %v3290_v51, %v3289_v37  ;;  %v2798_v23 = vsel %vm2740_vm0, %v5434_v29, 0.0 }
 0x1cb   :  { %8527 = vst [vmem:[#allocation70_spill] sm:$0xff] %v5590_v26  ;;  %v5599_v40 = vadd.f32 %v2354_v7, %v1831_v14  ;;  %2094 = vmatmul.mubr.bf16.gmra.mrb[188].mxu1 %v4953_v42  ;;  %v2662_v34 = vadd.f32 %v2661_v50, %v5393_v5  ;;  %v3163_v14 = vadd.f32 %v3162_v19, %v2994_v58  ;;  %v4959_v7 = vld [vmem:[#allocation2 + $0x600] ss:$16 sps:$4 sm:$0xff]  }
 0x1cc   :  { %8528 = vst [vmem:[#allocation71_spill] sm:$0xff] %v5596_v55  ;;  %2617 = vmatmul.mubr.bf16.gmra.mrb[188].mxu0 %v4954_v33  ;;  %2103 = vmatprep.mubr.bf16.mxu1 %v4955_v46  ;;  %v3293_v27 = vadd.f32 %v3292_v24, %v3291_v21  ;;  %v3294_v19 = vsel %vm2740_vm0, %v2997_v30, 0.0  ;;  %v2998_v58 = vmul.f32 %v5420_v9, %v5420_v9  ;;  %v2796_v21 = vsel %vm2740_vm0, %v5425_v22, 0.0 }
 0x1cd   :  { %8529 = vst [vmem:[#allocation72_spill] sm:$0xff] %v5599_v40  ;;  %2626 = vmatprep.mubr.bf16.mxu0 %v4957_v16  ;;  %v2663_v24 = vadd.f32 %v2662_v34, %v5403_v0  ;;  %v3164_v3 = vadd.f32 %v3163_v14, %v2996_v43  ;;  %v3296_v30 = vsel %vm2740_vm0, %v2999_v4, 0.0  ;;  %v2797_v14 = vadd.f32 %v2796_v21, %v2795_v35 }
 0x1ce   :  { %v1835_v42 = vpop.f32.mrb[84].mxu1  ;;  %v3295_v5 = vadd.f32 %v3294_v19, %v3293_v27  ;;  %v3000_v43 = vmul.f32 %v5430_v38, %v5430_v38  ;;  %v3003_v4 = vmul.f32 %v5454_v59, %v5454_v59  ;;  %v3002_v27 = vmul.f32 %v5448_v12, %v5448_v12 }
 0x1cf   :  { %v2358_v1 = vpop.f32.mrb[84].mxu0  ;;  %v1837_v46 = vpop.f32.mrb[85].mxu1  ;;  %v2664_v53 = vadd.f32 %v2663_v24, %v5420_v9  ;;  %v3165_v34 = vadd.f32 %v3164_v3, %v2998_v58  ;;  %v2800_v24 = vsel %vm2740_vm0, %v5454_v59, 0.0 }
 0x1d0   :  { %v5614_v33 = vadd.f32 %v2358_v1, %v1835_v42  ;;  %v2360_v37 = vpop.f32.mrb[85].mxu0  ;;  %v1839_v51 = vpop.f32.mrb[86].mxu1 }
 0x1d1   :  { %v5619_v16 = vadd.f32 %v2360_v37, %v1837_v46  ;;  %v2362_v50 = vpop.f32.mrb[86].mxu0  ;;  %v1841_v1 = vpop.f32.mrb[87].mxu1  ;;  %v3001_v46 = vmul.f32 %v5434_v29, %v5434_v29  ;;  %v2665_v35 = vadd.f32 %v2664_v53, %v5430_v38  ;;  %v3005_v29 = vmul.f32 %v5463_v13, %v5463_v13 }
 0x1d2   :  { %v5624_v42 = vadd.f32 %v2362_v50, %v1839_v51  ;;  %v2364_v54 = vpop.f32.mrb[87].mxu0  ;;  %v3297_v51 = vadd.f32 %v3296_v30, %v3295_v5  ;;  %v3166_v5 = vadd.f32 %v3165_v34, %v3000_v43  ;;  %v3004_v43 = vmul.f32 %v5458_v45, %v5458_v45 }
 0x1d3   :  { %8530 = vst [vmem:[#allocation73_spill] sm:$0xff] %v5619_v16  ;;  %v5629_v37 = vadd.f32 %v2364_v54, %v1841_v1  ;;  %2104 = vmatmul.mubr.bf16.gmra.mrb[192].mxu1 %v4959_v7  ;;  %v3298_v54 = vsel %vm2740_vm0, %v3001_v46, 0.0  ;;  %v3300_v46 = vsel %vm2740_vm0, %v3003_v4, 0.0  ;;  %v2666_v34 = vadd.f32 %v2665_v35, %v5448_v12 }
 0x1d4   :  { %8531 = vst [vmem:[#allocation74_spill] sm:$0xff] %v5624_v42  ;;  %2627 = vmatmul.mubr.bf16.gmra.mrb[192].mxu0 %v4960_v31  ;;  %v2799_v31 = vadd.f32 %v2798_v23, %v2797_v14  ;;  %v3299_v30 = vadd.f32 %v3298_v54, %v3297_v51  ;;  %v3167_v14 = vadd.f32 %v3166_v5, %v3002_v27  ;;  %v2802_v54 = vsel %vm2740_vm0, %v5463_v13, 0.0 }
 0x1d5   :  { %8532 = vst [vmem:[#allocation75_spill] sm:$0xff] %v5629_v37  ;;  %v3007_v51 = vmul.f32 %v5483_v28, %v5483_v28  ;;  %v2667_v27 = vadd.f32 %v2666_v34, %v5458_v45  ;;  %v2804_v5 = vsel %vm2740_vm0, %v5483_v28, 0.0 }
 0x1d6   :  { %v1845_v8 = vpop.f32.mrb[88].mxu1  ;;  %v3301_v4 = vadd.f32 %v3300_v46, %v3299_v30  ;;  %v3168_v35 = vadd.f32 %v3167_v14, %v3004_v43  ;;  %v3009_v30 = vmul.f32 %v5488_v39, %v5488_v39 }
 0x1d7   :  { %v2368_v7 = vpop.f32.mrb[88].mxu0  ;;  %v1847_v58 = vpop.f32.mrb[89].mxu1 }
 0x1d8   :  { %v5642_v19 = vadd.f32 %v2368_v7, %v1845_v8  ;;  %v2370_v50 = vpop.f32.mrb[89].mxu0  ;;  %v1849_v21 = vpop.f32.mrb[90].mxu1 }
 0x1d9   :  { %v5646_v3 = vadd.f32 %v2370_v50, %v1847_v58  ;;  %v2372_v1 = vpop.f32.mrb[90].mxu0  ;;  %v1851_v8 = vpop.f32.mrb[91].mxu1  ;;  %v2801_v58 = vadd.f32 %v2800_v24, %v2799_v31  ;;  %v3006_v50 = vmul.f32 %v5478_v52, %v5478_v52 }
 0x1da   :  { %8533 = vst [vmem:[#allocation76_spill] sm:$0xff] %v5642_v19  ;;  %v5651_v53 = vadd.f32 %v2372_v1, %v1849_v21  ;;  %v2374_v7 = vpop.f32.mrb[91].mxu0  ;;  %v3302_v21 = vsel %vm2740_vm0, %v3005_v29, 0.0  ;;  %v2668_v29 = vadd.f32 %v2667_v27, %v5478_v52 }
 0x1db   :  { %8534 = vst [vmem:[#allocation77_spill] sm:$0xff] %v5646_v3  ;;  %v5656_v23 = vadd.f32 %v2374_v7, %v1851_v8  ;;  %v2803_v24 = vadd.f32 %v2802_v54, %v2801_v58  ;;  %v3304_v8 = vsel %vm2740_vm0, %v3007_v51, 0.0  ;;  %v3303_v59 = vadd.f32 %v3302_v21, %v3301_v4 }
 0x1dc   :  { %8535 = vst [vmem:[#allocation78_spill] sm:$0xff] %v5651_v53  ;;  %v3169_v34 = vadd.f32 %v3168_v35, %v3006_v50  ;;  %v3008_v58 = vmul.f32 %v5485_v10, %v5485_v10  ;;  %v3011_v51 = vmul.f32 %v5508_v18, %v5508_v18  ;;  %v2806_v4 = vsel %vm2740_vm0, %v5488_v39, 0.0 }
 0x1dd   :  { %8536 = vst [vmem:[#allocation79_spill] sm:$0xff] %v5656_v23  ;;  %v2805_v45 = vadd.f32 %v2804_v5, %v2803_v24  ;;  %v3305_v12 = vadd.f32 %v3304_v8, %v3303_v59  ;;  %v3010_v21 = vmul.f32 %v5505_v44, %v5505_v44  ;;  %v2669_v27 = vadd.f32 %v2668_v29, %v5485_v10 }
 0x1de   :  { %v1855_v1 = vpop.f32.mrb[92].mxu1  ;;  %v2808_v35 = vsel %vm2740_vm0, %v5508_v18, 0.0  ;;  %v3308_v24 = vsel %vm2740_vm0, %v3011_v51, 0.0  ;;  %v3013_v59 = vmul.f32 %v5517_v32, %v5517_v32  ;;  %v3012_v29 = vmul.f32 %v5515_v60, %v5515_v60 }
 0x1df   :  { %v2378_v31 = vpop.f32.mrb[92].mxu0  ;;  %v1857_v7 = vpop.f32.mrb[93].mxu1  ;;  %v2807_v5 = vadd.f32 %v2806_v4, %v2805_v45  ;;  %v3016_v10 = vmul.f32 %v5539_v48, %v5539_v48 }
 0x1e0   :  { %v5671_v46 = vadd.f32 %v2378_v31, %v1855_v1  ;;  %v2380_v13 = vpop.f32.mrb[93].mxu0  ;;  %v1859_v43 = vpop.f32.mrb[94].mxu1 }
 0x1e1   :  { %v5674_v14 = vadd.f32 %v2380_v13, %v1857_v7  ;;  %v2382_v28 = vpop.f32.mrb[94].mxu0  ;;  %v1861_v1 = vpop.f32.mrb[95].mxu1  ;;  %v3306_v13 = vsel %vm2740_vm0, %v3009_v30, 0.0  ;;  %v2670_v7 = vadd.f32 %v2669_v27, %v5505_v44  ;;  %v3014_v27 = vmul.f32 %v5530_v63, %v5530_v63 }
 0x1e2   :  { %v5680_v54 = vadd.f32 %v2382_v28, %v1859_v43  ;;  %v2384_v31 = vpop.f32.mrb[95].mxu0  ;;  %v3170_v28 = vadd.f32 %v3169_v34, %v3008_v58  ;;  %v3307_v8 = vadd.f32 %v3306_v13, %v3305_v12  ;;  %v2810_v58 = vsel %vm2740_vm0, %v5517_v32, 0.0 }
 0x1e3   :  { %8537 = vst [vmem:[#allocation80_spill] sm:$0xff] %v5674_v14  ;;  %v5684_v50 = vadd.f32 %v2384_v31, %v1861_v1  ;;  %v2809_v31 = vadd.f32 %v2808_v35, %v2807_v5  ;;  %v3015_v12 = vmul.f32 %v5532_v2, %v5532_v2 }
 0x1e4   :  { %8538 = vst [vmem:[#allocation81_spill] sm:$0xff] %v5680_v54  ;;  %v3171_v1 = vadd.f32 %v3170_v28, %v3010_v21  ;;  %v3309_v45 = vadd.f32 %v3308_v24, %v3307_v8  ;;  %v3310_v21 = vsel %vm2740_vm0, %v3013_v59, 0.0  ;;  %v2812_v24 = vsel %vm2740_vm0, %v5532_v2, 0.0 }
 0x1e5   :  { %8539 = vst [vmem:[#allocation82_spill] sm:$0xff] %v5684_v50  ;;  %v3312_v32 = vsel %vm2740_vm0, %v3015_v12, 0.0  ;;  %v3017_v59 = vmul.f32 %v5544_v56, %v5544_v56 }
 0x1e6   :  { %v1865_v43 = vpop.f32.mrb[96].mxu1 }
 0x1e7   :  { %v2388_v30 = vpop.f32.mrb[96].mxu0  ;;  %v1867_v18 = vpop.f32.mrb[97].mxu1 }
 0x1e8   :  { %v5698_v39 = vadd.f32 %v2388_v30, %v1865_v43  ;;  %v2390_v34 = vpop.f32.mrb[97].mxu0  ;;  %v1869_v4 = vpop.f32.mrb[98].mxu1  ;;  %v2671_v43 = vadd.f32 %v2670_v7, %v5515_v60  ;;  %v2811_v30 = vadd.f32 %v2810_v58, %v2809_v31  ;;  %v3019_v7 = vmul.f32 %v5561_v57, %v5561_v57 }
 0x1e9   :  { %v5704_v51 = vadd.f32 %v2390_v34, %v1867_v18  ;;  %v2392_v13 = vpop.f32.mrb[98].mxu0  ;;  %v1871_v28 = vpop.f32.mrb[99].mxu1  ;;  %v3172_v18 = vadd.f32 %v3171_v1, %v3012_v29  ;;  %v3311_v34 = vadd.f32 %v3310_v21, %v3309_v45  ;;  %v3018_v45 = vmul.f32 %v5559_v47, %v5559_v47 }
 0x1ea   :  { %8540 = vst [vmem:[#allocation83_spill] sm:$0xff] %v5698_v39  ;;  %v5709_v35 = vadd.f32 %v2392_v13, %v1869_v4  ;;  %v2394_v5 = vpop.f32.mrb[99].mxu0  ;;  %v2672_v4 = vadd.f32 %v2671_v43, %v5530_v63  ;;  %v2813_v44 = vadd.f32 %v2812_v24, %v2811_v30 }
 0x1eb   :  { %8541 = vst [vmem:[#allocation84_spill] sm:$0xff] %v5704_v51  ;;  %v5713_v8 = vadd.f32 %v2394_v5, %v1871_v28  ;;  %v3173_v13 = vadd.f32 %v3172_v18, %v3014_v27  ;;  %v2814_v28 = vsel %vm2740_vm0, %v5544_v56, 0.0  ;;  %v3313_v29 = vadd.f32 %v3312_v32, %v3311_v34 }
 0x1ec   :  { %8542 = vst [vmem:[#allocation85_spill] sm:$0xff] %v5709_v35  ;;  %v3314_v27 = vsel %vm2740_vm0, %v3017_v59, 0.0  ;;  %v2673_v18 = vadd.f32 %v2672_v4, %v5539_v48  ;;  %v2815_v56 = vadd.f32 %v2814_v28, %v2813_v44  ;;  %v3021_v59 = vmul.f32 %v5570_v36, %v5570_v36 }
 0x1ed   :  { %8543 = vst [vmem:[#allocation86_spill] sm:$0xff] %v5713_v8  ;;  %v3174_v30 = vadd.f32 %v3173_v13, %v3016_v10  ;;  %v3020_v10 = vmul.f32 %v5566_v62, %v5566_v62  ;;  %v3023_v44 = vmul.f32 %v5590_v26, %v5590_v26 }
 0x1ee   :  { %v1875_v1 = vpop.f32.mrb[100].mxu1  ;;  %v2674_v63 = vadd.f32 %v2673_v18, %v5559_v47 }
 0x1ef   :  { %v2398_v31 = vpop.f32.mrb[100].mxu0  ;;  %v1877_v12 = vpop.f32.mrb[101].mxu1  ;;  %v3175_v4 = vadd.f32 %v3174_v30, %v3018_v45 }
 0x1f0   :  { %v5728_v58 = vadd.f32 %v2398_v31, %v1875_v1  ;;  %v2400_v21 = vpop.f32.mrb[101].mxu0  ;;  %v1879_v24 = vpop.f32.mrb[102].mxu1  ;;  %v2816_v1 = vsel %vm2740_vm0, %v5561_v57, 0.0  ;;  %v3316_v31 = vsel %vm2740_vm0, %v3019_v7, 0.0  ;;  %v2818_v7 = vsel %vm2740_vm0, %v5570_v36, 0.0 }
 0x1f1   :  { %v5731_v5 = vadd.f32 %v2400_v21, %v1877_v12  ;;  %v2402_v43 = vpop.f32.mrb[102].mxu0  ;;  %v1881_v32 = vpop.f32.mrb[103].mxu1  ;;  %v3315_v21 = vadd.f32 %v3314_v27, %v3313_v29  ;;  %v2817_v13 = vadd.f32 %v2816_v1, %v2815_v56  ;;  %v2675_v45 = vadd.f32 %v2674_v63, %v5566_v62 }
 0x1f2   :  { %v5734_v2 = vadd.f32 %v2402_v43, %v1879_v24  ;;  %v2404_v34 = vpop.f32.mrb[103].mxu0  ;;  %v3318_v24 = vsel %vm2740_vm0, %v3021_v59, 0.0  ;;  %v3022_v43 = vmul.f32 %v5586_v15, %v5586_v15  ;;  %v3176_v18 = vadd.f32 %v3175_v4, %v3020_v10 }
 0x1f3   :  { %8544 = vst [vmem:[#allocation87_spill] sm:$0xff] %v5731_v5  ;;  %v5741_v12 = vadd.f32 %v2404_v34, %v1881_v32  ;;  %v3317_v28 = vadd.f32 %v3316_v31, %v3315_v21  ;;  %v2820_v56 = vsel %vm2740_vm0, %v5590_v26, 0.0  ;;  %v3320_v1 = vsel %vm2740_vm0, %v3023_v44, 0.0 }
 0x1f4   :  { %v3025_v31 = vmul.f32 %v5599_v40, %v5599_v40  ;;  %v2819_v57 = vadd.f32 %v2818_v7, %v2817_v13  ;;  %v2676_v63 = vadd.f32 %v2675_v45, %v5586_v15  ;;  %v3024_v26 = vmul.f32 %v5596_v55, %v5596_v55 }
 0x1f5   :  { %8545 = vst [vmem:[#allocation88_spill] sm:$0xff] %v5741_v12  ;;  %v3319_v47 = vadd.f32 %v3318_v24, %v3317_v28  ;;  %v3027_v44 = vmul.f32 %v5619_v16, %v5619_v16  ;;  %v2822_v13 = vsel %vm2740_vm0, %v5599_v40, 0.0 }
 0x1f6   :  { %v1885_v29 = vpop.f32.mrb[104].mxu1  ;;  %v3322_v28 = vsel %vm2740_vm0, %v3025_v31, 0.0  ;;  %v2677_v7 = vadd.f32 %v2676_v63, %v5596_v55 }
 0x1f7   :  { %v2408_v27 = vpop.f32.mrb[104].mxu0  ;;  %v1887_v32 = vpop.f32.mrb[105].mxu1  ;;  %v3324_v45 = vsel %vm2740_vm0, %v3027_v44, 0.0 }
 0x1f8   :  { %v5754_v30 = vadd.f32 %v2408_v27, %v1885_v29  ;;  %v2410_v34 = vpop.f32.mrb[105].mxu0  ;;  %v1889_v21 = vpop.f32.mrb[106].mxu1  ;;  %v3177_v27 = vadd.f32 %v3176_v18, %v3022_v43  ;;  %v2824_v43 = vsel %vm2740_vm0, %v5619_v16, 0.0  ;;  %v2678_v31 = vadd.f32 %v2677_v7, %v5614_v33 }
 0x1f9   :  { %v5761_v59 = vadd.f32 %v2410_v34, %v1887_v32  ;;  %v2412_v36 = vpop.f32.mrb[106].mxu0  ;;  %v1891_v10 = vpop.f32.mrb[107].mxu1  ;;  %v2821_v32 = vadd.f32 %v2820_v56, %v2819_v57  ;;  %v3321_v34 = vadd.f32 %v3320_v1, %v3319_v47  ;;  %v3029_v57 = vmul.f32 %v5629_v37, %v5629_v37 }
 0x1fa   :  { %v5764_v4 = vadd.f32 %v2412_v36, %v1889_v21  ;;  %v2414_v29 = vpop.f32.mrb[107].mxu0  ;;  %v3026_v36 = vmul.f32 %v5614_v33, %v5614_v33  ;;  %v3178_v24 = vadd.f32 %v3177_v27, %v3024_v26  ;;  %v3031_v26 = vmul.f32 %v5646_v3, %v5646_v3 }
 0x1fb   :  { %8546 = vst [vmem:[#allocation89_spill] sm:$0xff] %v5761_v59  ;;  %v5770_v62 = vadd.f32 %v2414_v29, %v1891_v10  ;;  %v2823_v56 = vadd.f32 %v2822_v13, %v2821_v32  ;;  %v3323_v1 = vadd.f32 %v3322_v28, %v3321_v34  ;;  %v3028_v32 = vmul.f32 %v5624_v42, %v5624_v42 }
 0x1fc   :  { %8547 = vst [vmem:[#allocation90_spill] sm:$0xff] %v5764_v4  ;;  %v3179_v63 = vadd.f32 %v3178_v24, %v3026_v36  ;;  %v2826_v7 = vsel %vm2740_vm0, %v5629_v37, 0.0  ;;  %v3326_v36 = vsel %vm2740_vm0, %v3029_v57, 0.0 }
 0x1fd   :  { %8548 = vst [vmem:[#allocation91_spill] sm:$0xff] %v5770_v62  ;;  %v2825_v40 = vadd.f32 %v2824_v43, %v2823_v56  ;;  %v3325_v55 = vadd.f32 %v3324_v45, %v3323_v1  ;;  %v3030_v43 = vmul.f32 %v5642_v19, %v5642_v19  ;;  %v2828_v45 = vsel %vm2740_vm0, %v5646_v3, 0.0 }
 0x1fe   :  { %v1895_v47 = vpop.f32.mrb[108].mxu1  ;;  %v3180_v56 = vadd.f32 %v3179_v63, %v3028_v32  ;;  %v3032_v3 = vmul.f32 %v5651_v53, %v5651_v53 }
 0x1ff   :  { %v2418_v18 = vpop.f32.mrb[108].mxu0  ;;  %v1897_v10 = vpop.f32.mrb[109].mxu1  ;;  %v2827_v1 = vadd.f32 %v2826_v7, %v2825_v40 }
 0x200   :  { %v5784_v21 = vadd.f32 %v2418_v18, %v1895_v47  ;;  %v2420_v29 = vpop.f32.mrb[109].mxu0  ;;  %v1899_v44 = vpop.f32.mrb[110].mxu1  ;;  %v2679_v47 = vadd.f32 %v2678_v31, %v5624_v42  ;;  %v3033_v18 = vmul.f32 %v5656_v23, %v5656_v23  ;;  %v2830_v42 = vsel %vm2740_vm0, %v5656_v23, 0.0 }
 0x201   :  { %v5788_v27 = vadd.f32 %v2420_v29, %v1897_v10  ;;  %v2422_v16 = vpop.f32.mrb[110].mxu0  ;;  %v1901_v13 = vpop.f32.mrb[111].mxu1  ;;  %v3327_v10 = vadd.f32 %v3326_v36, %v3325_v55  ;;  %v3035_v29 = vmul.f32 %v5674_v14, %v5674_v14  ;;  %v3034_v36 = vmul.f32 %v5671_v46, %v5671_v46 }
 0x202   :  { %8549 = vst [vmem:[#allocation92_spill] sm:$0xff] %v5784_v21  ;;  %v5792_v34 = vadd.f32 %v2422_v16, %v1899_v44  ;;  %v2424_v28 = vpop.f32.mrb[111].mxu0  ;;  %v3328_v16 = vsel %vm2740_vm0, %v3031_v26, 0.0  ;;  %v2680_v57 = vadd.f32 %v2679_v47, %v5642_v19  ;;  %v3181_v44 = vadd.f32 %v3180_v56, %v3030_v43 }
 0x203   :  { %8550 = vst [vmem:[#allocation93_spill] sm:$0xff] %v5788_v27  ;;  %v5797_v24 = vadd.f32 %v2424_v28, %v1901_v13  ;;  %v2829_v13 = vadd.f32 %v2828_v45, %v2827_v1  ;;  %v3329_v28 = vadd.f32 %v3328_v16, %v3327_v10  ;;  %v3330_v40 = vsel %vm2740_vm0, %v3033_v18, 0.0 }
 0x204   :  { %8551 = vst [vmem:[#allocation94_spill] sm:$0xff] %v5792_v34  ;;  %v2681_v7 = vadd.f32 %v2680_v57, %v5651_v53  ;;  %v2832_v16 = vsel %vm2740_vm0, %v5674_v14, 0.0  ;;  %v3332_v56 = vsel %vm2740_vm0, %v3035_v29, 0.0  ;;  %v3182_v10 = vadd.f32 %v3181_v44, %v3032_v3 }
 0x205   :  { %8552 = vst [vmem:[#allocation95_spill] sm:$0xff] %v5797_v24  ;;  %v2831_v57 = vadd.f32 %v2830_v42, %v2829_v13  ;;  %v3036_v14 = vmul.f32 %v5680_v54, %v5680_v54  ;;  %v2834_v29 = vsel %vm2740_vm0, %v5684_v50, 0.0  ;;  %v3039_v3 = vmul.f32 %v5704_v51, %v5704_v51 }
 0x206   :  { %v1905_v31 = vpop.f32.mrb[112].mxu1  ;;  %v3038_v44 = vmul.f32 %v5698_v39, %v5698_v39 }
 0x207   :  { %v2428_v37 = vpop.f32.mrb[112].mxu0  ;;  %v1907_v26 = vpop.f32.mrb[113].mxu1  ;;  %v2833_v53 = vadd.f32 %v2832_v16, %v2831_v57  ;;  %v2836_v57 = vsel %vm2740_vm0, %v5704_v51, 0.0 }
 0x208   :  { %v5815_v55 = vadd.f32 %v2428_v37, %v1905_v31  ;;  %v2430_v63 = vpop.f32.mrb[113].mxu0  ;;  %v1909_v32 = vpop.f32.mrb[114].mxu1  ;;  %v3037_v37 = vmul.f32 %v5684_v50, %v5684_v50  ;;  %v3331_v31 = vadd.f32 %v3330_v40, %v3329_v28  ;;  %v3041_v50 = vmul.f32 %v5713_v8, %v5713_v8 }
 0x209   :  { %v5820_v47 = vadd.f32 %v2430_v63, %v1907_v26  ;;  %v2432_v43 = vpop.f32.mrb[114].mxu0  ;;  %v1911_v45 = vpop.f32.mrb[115].mxu1  ;;  %v2682_v26 = vadd.f32 %v2681_v7, %v5671_v46  ;;  %v3183_v63 = vadd.f32 %v3182_v10, %v3034_v36  ;;  %v2835_v16 = vadd.f32 %v2834_v29, %v2833_v53 }
 0x20a   :  { %v5827_v18 = vadd.f32 %v2432_v43, %v1909_v32  ;;  %v2434_v1 = vpop.f32.mrb[115].mxu0  ;;  %v3333_v19 = vadd.f32 %v3332_v56, %v3331_v31  ;;  %v3334_v32 = vsel %vm2740_vm0, %v3037_v37, 0.0  ;;  %v3336_v31 = vsel %vm2740_vm0, %v3039_v3, 0.0 }
 0x20b   :  { %8553 = vst [vmem:[#allocation96_spill] sm:$0xff] %v5820_v47  ;;  %v5829_v23 = vadd.f32 %v2434_v1, %v1911_v45  ;;  %v2683_v40 = vadd.f32 %v2682_v26, %v5680_v54  ;;  %v3184_v45 = vadd.f32 %v3183_v63, %v3036_v14  ;;  %v3043_v63 = vmul.f32 %v5731_v5, %v5731_v5 }
 0x20c   :  { %8554 = vst [vmem:[#allocation97_spill] sm:$0xff] %v5827_v18  ;;  %v3335_v56 = vadd.f32 %v3334_v32, %v3333_v19  ;;  %v3040_v19 = vmul.f32 %v5709_v35, %v5709_v35  ;;  %v2837_v29 = vadd.f32 %v2836_v57, %v2835_v16  ;;  %v2838_v3 = vsel %vm2740_vm0, %v5713_v8, 0.0 }
 0x20d   :  { %8555 = vst [vmem:[#allocation98_spill] sm:$0xff] %v5829_v23  ;;  %v3185_v14 = vadd.f32 %v3184_v45, %v3038_v44  ;;  %v3340_v16 = vsel %vm2740_vm0, %v3043_v63, 0.0  ;;  %v3047_v63 = vmul.f32 %v5761_v59, %v5761_v59 }
 0x20e   :  { %v1915_v42 = vpop.f32.mrb[116].mxu1  ;;  %v3337_v32 = vadd.f32 %v3336_v31, %v3335_v56  ;;  %v3045_v56 = vmul.f32 %v5741_v12, %v5741_v12 }
 0x20f   :  { %v2438_v13 = vpop.f32.mrb[116].mxu0  ;;  %v1917_v28 = vpop.f32.mrb[117].mxu1 }
 0x210   :  { %v5842_v7 = vadd.f32 %v2438_v13, %v1915_v42  ;;  %v2440_v36 = vpop.f32.mrb[117].mxu0  ;;  %v1919_v43 = vpop.f32.mrb[118].mxu1  ;;  %v2684_v13 = vadd.f32 %v2683_v40, %v5698_v39 }
 0x211   :  { %v5844_v1 = vadd.f32 %v2440_v36, %v1917_v28  ;;  %v2442_v37 = vpop.f32.mrb[118].mxu0  ;;  %v1921_v10 = vpop.f32.mrb[119].mxu1  ;;  %v3338_v28 = vsel %vm2740_vm0, %v3041_v50, 0.0  ;;  %v3042_v36 = vmul.f32 %v5728_v58, %v5728_v58 }
 0x212   :  { %8556 = vst [vmem:[#allocation99_spill] sm:$0xff] %v5842_v7  ;;  %v5851_v26 = vadd.f32 %v2442_v37, %v1919_v43  ;;  %v2444_v42 = vpop.f32.mrb[119].mxu0  ;;  %v2685_v44 = vadd.f32 %v2684_v13, %v5709_v35  ;;  %v3186_v43 = vadd.f32 %v3185_v14, %v3040_v19  ;;  %v3339_v8 = vadd.f32 %v3338_v28, %v3337_v32 }
 0x213   :  { %8557 = vst [vmem:[#allocation100_spill] sm:$0xff] %v5844_v1  ;;  %v5856_v53 = vadd.f32 %v2444_v42, %v1921_v10  ;;  %v2840_v10 = vsel %vm2740_vm0, %v5731_v5, 0.0  ;;  %v2839_v42 = vadd.f32 %v2838_v3, %v2837_v29  ;;  %v3044_v5 = vmul.f32 %v5734_v2, %v5734_v2 }
 0x214   :  { %8558 = vst [vmem:[#allocation101_spill] sm:$0xff] %v5851_v26  ;;  %v2686_v51 = vadd.f32 %v2685_v44, %v5728_v58  ;;  %v3187_v35 = vadd.f32 %v3186_v43, %v3042_v36  ;;  %v3341_v54 = vadd.f32 %v3340_v16, %v3339_v8  ;;  %v2842_v32 = vsel %vm2740_vm0, %v5741_v12, 0.0 }
 0x215   :  { %8559 = vst [vmem:[#allocation102_spill] sm:$0xff] %v5856_v53  ;;  %v3342_v3 = vsel %vm2740_vm0, %v3045_v56, 0.0  ;;  %v3046_v28 = vmul.f32 %v5754_v30, %v5754_v30  ;;  %v2844_v43 = vsel %vm2740_vm0, %v5761_v59, 0.0  ;;  %v3049_v8 = vmul.f32 %v5770_v62, %v5770_v62 }
 0x216   :  { %v1925_v40 = vpop.f32.mrb[120].mxu1  ;;  %v2687_v36 = vadd.f32 %v2686_v51, %v5734_v2  ;;  %v3188_v44 = vadd.f32 %v3187_v35, %v3044_v5  ;;  %v3051_v51 = vmul.f32 %v5788_v27, %v5788_v27  ;;  %v3048_v59 = vmul.f32 %v5764_v4, %v5764_v4 }
 0x217   :  { %v2448_v45 = vpop.f32.mrb[120].mxu0  ;;  %v1927_v37 = vpop.f32.mrb[121].mxu1 }
 0x218   :  { %v5871_v57 = vadd.f32 %v2448_v45, %v1925_v40  ;;  %v2450_v50 = vpop.f32.mrb[121].mxu0  ;;  %v1929_v31 = vpop.f32.mrb[122].mxu1  ;;  %v2841_v45 = vadd.f32 %v2840_v10, %v2839_v42 }
 0x219   :  { %v5874_v13 = vadd.f32 %v2450_v50, %v1927_v37  ;;  %v2452_v14 = vpop.f32.mrb[122].mxu0  ;;  %v1931_v19 = vpop.f32.mrb[123].mxu1  ;;  %v3344_v37 = vsel %vm2740_vm0, %v3047_v63, 0.0  ;;  %v3343_v50 = vadd.f32 %v3342_v3, %v3341_v54  ;;  %v3346_v3 = vsel %vm2740_vm0, %v3049_v8, 0.0 }
 0x21a   :  { %v5880_v39 = vadd.f32 %v2452_v14, %v1929_v31  ;;  %v2454_v40 = vpop.f32.mrb[123].mxu0  ;;  %v2843_v16 = vadd.f32 %v2842_v32, %v2841_v45  ;;  %v2688_v31 = vadd.f32 %v2687_v36, %v5754_v30  ;;  %v3189_v14 = vadd.f32 %v3188_v44, %v3046_v28 }
 0x21b   :  { %8560 = vst [vmem:[#allocation103_spill] sm:$0xff] %v5874_v13  ;;  %v5882_v29 = vadd.f32 %v2454_v40, %v1931_v19  ;;  %v3345_v63 = vadd.f32 %v3344_v37, %v3343_v50  ;;  %v2846_v32 = vsel %vm2740_vm0, %v5770_v62, 0.0  ;;  %v3053_v50 = vmul.f32 %v5797_v24, %v5797_v24 }
 0x21c   :  { %v2845_v40 = vadd.f32 %v2844_v43, %v2843_v16  ;;  %v2689_v44 = vadd.f32 %v2688_v31, %v5764_v4  ;;  %v3050_v43 = vmul.f32 %v5784_v21, %v5784_v21  ;;  %v3348_v16 = vsel %vm2740_vm0, %v3051_v51, 0.0 }
 0x21d   :  { %8561 = vst [vmem:[#allocation104_spill] sm:$0xff] %v5882_v29  ;;  %v3055_v31 = vmul.f32 %v5820_v47, %v5820_v47  ;;  %v2850_v4 = vsel %vm2740_vm0, %v5797_v24, 0.0 }
 0x21e   :  { %v1935_v10 = vpop.f32.mrb[124].mxu1  ;;  %v2847_v8 = vadd.f32 %v2846_v32, %v2845_v40 }
 0x21f   :  { %v2458_v56 = vpop.f32.mrb[124].mxu0  ;;  %v1937_v42 = vpop.f32.mrb[125].mxu1 }
 0x220   :  { %v5898_v35 = vadd.f32 %v2458_v56, %v1935_v10  ;;  %v2460_v5 = vpop.f32.mrb[125].mxu0  ;;  %v1939_v19 = vpop.f32.mrb[126].mxu1  ;;  %v2848_v10 = vsel %vm2740_vm0, %v5788_v27, 0.0  ;;  %v3190_v56 = vadd.f32 %v3189_v14, %v3048_v59  ;;  %v3052_v27 = vmul.f32 %v5792_v34, %v5792_v34 }
 0x221   :  { %v5902_v12 = vadd.f32 %v2460_v5, %v1937_v42  ;;  %v2462_v54 = vpop.f32.mrb[126].mxu0  ;;  %v1941_v45 = vpop.f32.mrb[127].mxu1  ;;  %v3347_v42 = vadd.f32 %v3346_v3, %v3345_v63  ;;  %v2690_v5 = vadd.f32 %v2689_v44, %v5784_v21  ;;  %v3350_v59 = vsel %vm2740_vm0, %v3053_v50, 0.0 }
 0x222   :  { %v5907_v28 = vadd.f32 %v2462_v54, %v1939_v19  ;;  %v2464_v36 = vpop.f32.mrb[127].mxu0  ;;  %v3191_v54 = vadd.f32 %v3190_v56, %v3050_v43  ;;  %v3054_v3 = vmul.f32 %v5815_v55, %v5815_v55  ;;  %v3352_v56 = vsel %vm2740_vm0, %v3055_v31, 0.0 }
 0x223   :  { %8562 = vst [vmem:[#allocation105_spill] sm:$0xff] %v5902_v12  ;;  %v5912_v37 = vadd.f32 %v2464_v36, %v1941_v45  ;;  %v2849_v45 = vadd.f32 %v2848_v10, %v2847_v8  ;;  %v3349_v36 = vadd.f32 %v3348_v16, %v3347_v42  ;;  %v2691_v32 = vadd.f32 %v2690_v5, %v5792_v34 }
 0x224   :  { %8563 = vst [vmem:[#allocation106_spill] sm:$0xff] %v5907_v28  ;;  %v2852_v16 = vsel %vm2740_vm0, %v5820_v47, 0.0  ;;  %v3192_v42 = vadd.f32 %v3191_v54, %v3052_v27  ;;  %v3056_v47 = vmul.f32 %v5827_v18, %v5827_v18  ;;  %v2854_v31 = vsel %vm2740_vm0, %v5829_v23, 0.0 }
 0x225   :  { %8564 = vst [vmem:[#allocation107_spill] sm:$0xff] %v5912_v37  ;;  %v2851_v5 = vadd.f32 %v2850_v4, %v2849_v45  ;;  %v3059_v27 = vmul.f32 %v5844_v1, %v5844_v1  ;;  %v3058_v54 = vmul.f32 %v5842_v7, %v5842_v7 }
 0x226   :  { %v1945_v19 = vpop.f32.mrb[128].mxu1 }
 0x227   :  { %v2468_v62 = vpop.f32.mrb[128].mxu0  ;;  %v1947_v51 = vpop.f32.mrb[129].mxu1  ;;  %v2853_v34 = vadd.f32 %v2852_v16, %v2851_v5  ;;  %v2856_v5 = vsel %vm2740_vm0, %v5844_v1, 0.0 }
 0x228   :  { %v5927_v14 = vadd.f32 %v2468_v62, %v1945_v19  ;;  %v2470_v40 = vpop.f32.mrb[129].mxu0  ;;  %v1949_v63 = vpop.f32.mrb[130].mxu1  ;;  %v3057_v62 = vmul.f32 %v5829_v23, %v5829_v23  ;;  %v3351_v19 = vadd.f32 %v3350_v59, %v3349_v36  ;;  %v3061_v23 = vmul.f32 %v5856_v53, %v5856_v53 }
 0x229   :  { %v5932_v44 = vadd.f32 %v2470_v40, %v1947_v51  ;;  %v2472_v43 = vpop.f32.mrb[130].mxu0  ;;  %v1951_v10 = vpop.f32.mrb[131].mxu1  ;;  %v2692_v51 = vadd.f32 %v2691_v32, %v5815_v55  ;;  %v3193_v40 = vadd.f32 %v3192_v42, %v3054_v3  ;;  %v2855_v16 = vadd.f32 %v2854_v31, %v2853_v34 }
 0x22a   :  { %8565 = vst [vmem:[#allocation108_spill] sm:$0xff] %v5927_v14  ;;  %v5939_v50 = vadd.f32 %v2472_v43, %v1949_v63  ;;  %v2474_v8 = vpop.f32.mrb[131].mxu0  ;;  %v3353_v21 = vadd.f32 %v3352_v56, %v3351_v19  ;;  %v3354_v63 = vsel %vm2740_vm0, %v3057_v62, 0.0  ;;  %v3356_v19 = vsel %vm2740_vm0, %v3059_v27, 0.0 }
 0x22b   :  { %8566 = vst [vmem:[#allocation109_spill] sm:$0xff] %v5932_v44  ;;  %v5941_v24 = vadd.f32 %v2474_v8, %v1951_v10  ;;  %v2693_v59 = vadd.f32 %v2692_v51, %v5827_v18  ;;  %v3194_v10 = vadd.f32 %v3193_v40, %v3056_v47  ;;  %v3063_v40 = vmul.f32 %v5874_v13, %v5874_v13 }
 0x22c   :  { %8567 = vst [vmem:[#allocation110_spill] sm:$0xff] %v5939_v50  ;;  %v3355_v56 = vadd.f32 %v3354_v63, %v3353_v21  ;;  %v3060_v21 = vmul.f32 %v5851_v26, %v5851_v26  ;;  %v2857_v31 = vadd.f32 %v2856_v5, %v2855_v16  ;;  %v2858_v27 = vsel %vm2740_vm0, %v5856_v53, 0.0 }
 0x22d   :  { %8568 = vst [vmem:[#allocation111_spill] sm:$0xff] %v5941_v24  ;;  %v3195_v47 = vadd.f32 %v3194_v10, %v3058_v54  ;;  %v3360_v16 = vsel %vm2740_vm0, %v3063_v40, 0.0  ;;  %v3067_v40 = vmul.f32 %v5902_v12, %v5902_v12 }
 0x22e   :  { %v1955_v4 = vpop.f32.mrb[132].mxu1  ;;  %v3357_v63 = vadd.f32 %v3356_v19, %v3355_v56  ;;  %v3065_v56 = vmul.f32 %v5882_v29, %v5882_v29 }
 0x22f   :  { %v2478_v45 = vpop.f32.mrb[132].mxu0  ;;  %v1957_v36 = vpop.f32.mrb[133].mxu1 }
 0x230   :  { %v5954_v32 = vadd.f32 %v2478_v45, %v1955_v4  ;;  %v2480_v3 = vpop.f32.mrb[133].mxu0  ;;  %v1959_v43 = vpop.f32.mrb[134].mxu1  ;;  %v2694_v45 = vadd.f32 %v2693_v59, %v5842_v7 }
 0x231   :  { %v5956_v8 = vadd.f32 %v2480_v3, %v1957_v36  ;;  %v2482_v62 = vpop.f32.mrb[134].mxu0  ;;  %v1961_v42 = vpop.f32.mrb[135].mxu1  ;;  %v3358_v36 = vsel %vm2740_vm0, %v3061_v23, 0.0  ;;  %v3062_v3 = vmul.f32 %v5871_v57, %v5871_v57 }
 0x232   :  { %v5963_v51 = vadd.f32 %v2482_v62, %v1959_v43  ;;  %v2484_v4 = vpop.f32.mrb[135].mxu0  ;;  %v2695_v54 = vadd.f32 %v2694_v45, %v5851_v26  ;;  %v3196_v43 = vadd.f32 %v3195_v47, %v3060_v21  ;;  %v3359_v53 = vadd.f32 %v3358_v36, %v3357_v63 }
 0x233   :  { %8569 = vst [vmem:[#allocation112_spill] sm:$0xff] %v5956_v8  ;;  %v5968_v34 = vadd.f32 %v2484_v4, %v1961_v42  ;;  %v2860_v42 = vsel %vm2740_vm0, %v5874_v13, 0.0  ;;  %v2859_v4 = vadd.f32 %v2858_v27, %v2857_v31  ;;  %v3064_v13 = vmul.f32 %v5880_v39, %v5880_v39 }
 0x234   :  { %8570 = vst [vmem:[#allocation113_spill] sm:$0xff] %v5963_v51  ;;  %v2696_v1 = vadd.f32 %v2695_v54, %v5871_v57  ;;  %v3197_v26 = vadd.f32 %v3196_v43, %v3062_v3  ;;  %v3361_v18 = vadd.f32 %v3360_v16, %v3359_v53  ;;  %v2862_v63 = vsel %vm2740_vm0, %v5882_v29, 0.0 }
 0x235   :  { %8571 = vst [vmem:[#allocation114_spill] sm:$0xff] %v5968_v34  ;;  %v3362_v27 = vsel %vm2740_vm0, %v3065_v56, 0.0  ;;  %v3066_v36 = vmul.f32 %v5898_v35, %v5898_v35  ;;  %v2864_v43 = vsel %vm2740_vm0, %v5902_v12, 0.0  ;;  %v3069_v53 = vmul.f32 %v5912_v37, %v5912_v37 }
 0x236   :  { %v1965_v59 = vpop.f32.mrb[136].mxu1  ;;  %v2697_v3 = vadd.f32 %v2696_v1, %v5880_v39  ;;  %v3198_v54 = vadd.f32 %v3197_v26, %v3064_v13  ;;  %v3071_v1 = vmul.f32 %v5932_v44, %v5932_v44  ;;  %v3068_v12 = vmul.f32 %v5907_v28, %v5907_v28 }
 0x237   :  { %v2488_v10 = vpop.f32.mrb[136].mxu0  ;;  %v1967_v62 = vpop.f32.mrb[137].mxu1 }
 0x238   :  { %v5983_v5 = vadd.f32 %v2488_v10, %v1965_v59  ;;  %v2490_v23 = vpop.f32.mrb[137].mxu0  ;;  %v1969_v19 = vpop.f32.mrb[138].mxu1  ;;  %v2861_v10 = vadd.f32 %v2860_v42, %v2859_v4 }
 0x239   :  { %v5986_v45 = vadd.f32 %v2490_v23, %v1967_v62  ;;  %v2492_v47 = vpop.f32.mrb[138].mxu0  ;;  %v1971_v21 = vpop.f32.mrb[139].mxu1  ;;  %v3364_v62 = vsel %vm2740_vm0, %v3067_v40, 0.0  ;;  %v3363_v23 = vadd.f32 %v3362_v27, %v3361_v18  ;;  %v3366_v27 = vsel %vm2740_vm0, %v3069_v53, 0.0 }
 0x23a   :  { %8572 = vst [vmem:[#allocation115_spill] sm:$0xff] %v5983_v5  ;;  %v5992_v7 = vadd.f32 %v2492_v47, %v1969_v19  ;;  %v2494_v59 = vpop.f32.mrb[139].mxu0  ;;  %v2863_v16 = vadd.f32 %v2862_v63, %v2861_v10  ;;  %v2698_v19 = vadd.f32 %v2697_v3, %v5898_v35  ;;  %v3199_v47 = vadd.f32 %v3198_v54, %v3066_v36 }
 0x23b   :  { %8573 = vst [vmem:[#allocation116_spill] sm:$0xff] %v5986_v45  ;;  %v5994_v31 = vadd.f32 %v2494_v59, %v1971_v21  ;;  %v3365_v40 = vadd.f32 %v3364_v62, %v3363_v23  ;;  %v2866_v63 = vsel %vm2740_vm0, %v5912_v37, 0.0  ;;  %v3073_v23 = vmul.f32 %v5941_v24, %v5941_v24 }
 0x23c   :  { %8574 = vst [vmem:[#allocation117_spill] sm:$0xff] %v5992_v7  ;;  %v2865_v59 = vadd.f32 %v2864_v43, %v2863_v16  ;;  %v2699_v54 = vadd.f32 %v2698_v19, %v5907_v28  ;;  %v3070_v43 = vmul.f32 %v5927_v14, %v5927_v14  ;;  %v3368_v16 = vsel %vm2740_vm0, %v3071_v1, 0.0 }
 0x23d   :  { %8575 = vst [vmem:[#allocation118_spill] sm:$0xff] %v5994_v31  ;;  %v3075_v19 = vmul.f32 %v5956_v8, %v5956_v8  ;;  %v2870_v28 = vsel %vm2740_vm0, %v5941_v24, 0.0 }
 0x23e   :  { %v1975_v42 = vpop.f32.mrb[140].mxu1  ;;  %v2867_v53 = vadd.f32 %v2866_v63, %v2865_v59 }
 0x23f   :  { %v2498_v56 = vpop.f32.mrb[140].mxu0  ;;  %v1977_v4 = vpop.f32.mrb[141].mxu1 }
 0x240   :  { %v6010_v26 = vadd.f32 %v2498_v56, %v1975_v42  ;;  %v2500_v13 = vpop.f32.mrb[141].mxu0  ;;  %v1979_v21 = vpop.f32.mrb[142].mxu1  ;;  %v2868_v42 = vsel %vm2740_vm0, %v5932_v44, 0.0  ;;  %v3200_v56 = vadd.f32 %v3199_v47, %v3068_v12  ;;  %v3072_v44 = vmul.f32 %v5939_v50, %v5939_v50 }
 0x241   :  { %v6014_v29 = vadd.f32 %v2500_v13, %v1977_v4  ;;  %v2502_v18 = vpop.f32.mrb[142].mxu0  ;;  %v1981_v10 = vpop.f32.mrb[143].mxu1  ;;  %v3367_v4 = vadd.f32 %v3366_v27, %v3365_v40  ;;  %v2700_v13 = vadd.f32 %v2699_v54, %v5927_v14  ;;  %v3370_v12 = vsel %vm2740_vm0, %v3073_v23, 0.0 }
 0x242   :  { %v6019_v36 = vadd.f32 %v2502_v18, %v1979_v21  ;;  %v2504_v3 = vpop.f32.mrb[143].mxu0  ;;  %v3201_v18 = vadd.f32 %v3200_v56, %v3070_v43  ;;  %v3074_v27 = vmul.f32 %v5954_v32, %v5954_v32  ;;  %v3372_v56 = vsel %vm2740_vm0, %v3075_v19, 0.0 }
 0x243   :  { %8576 = vst [vmem:[#allocation119_spill] sm:$0xff] %v6014_v29  ;;  %v6024_v62 = vadd.f32 %v2504_v3, %v1981_v10  ;;  %v2869_v10 = vadd.f32 %v2868_v42, %v2867_v53  ;;  %v3369_v3 = vadd.f32 %v3368_v16, %v3367_v4  ;;  %v2701_v63 = vadd.f32 %v2700_v13, %v5939_v50 }
 0x244   :  { %v2872_v16 = vsel %vm2740_vm0, %v5956_v8, 0.0  ;;  %v3202_v4 = vadd.f32 %v3201_v18, %v3072_v44  ;;  %v3076_v8 = vmul.f32 %v5963_v51, %v5963_v51  ;;  %v2874_v19 = vsel %vm2740_vm0, %v5968_v34, 0.0 }
 0x245   :  { %v2871_v13 = vadd.f32 %v2870_v28, %v2869_v10  ;;  %v3079_v44 = vmul.f32 %v5986_v45, %v5986_v45  ;;  %v3078_v18 = vmul.f32 %v5983_v5, %v5983_v5 }
 0x246   :  { %v1985_v21 = vpop.f32.mrb[144].mxu1 }
 0x247   :  { %v2508_v37 = vpop.f32.mrb[144].mxu0  ;;  %v1987_v1 = vpop.f32.mrb[145].mxu1  ;;  %v2873_v50 = vadd.f32 %v2872_v16, %v2871_v13  ;;  %v2876_v13 = vsel %vm2740_vm0, %v5986_v45, 0.0 }
 0x248   :  { %v6039_v47 = vadd.f32 %v2508_v37, %v1985_v21  ;;  %v2510_v59 = vpop.f32.mrb[145].mxu0  ;;  %v1989_v40 = vpop.f32.mrb[146].mxu1  ;;  %v3077_v37 = vmul.f32 %v5968_v34, %v5968_v34  ;;  %v3371_v21 = vadd.f32 %v3370_v12, %v3369_v3  ;;  %v3081_v34 = vmul.f32 %v5994_v31, %v5994_v31 }
 0x249   :  { %v6044_v54 = vadd.f32 %v2510_v59, %v1987_v1  ;;  %v2512_v43 = vpop.f32.mrb[146].mxu0  ;;  %v1991_v42 = vpop.f32.mrb[147].mxu1  ;;  %v2702_v1 = vadd.f32 %v2701_v63, %v5954_v32  ;;  %v3203_v59 = vadd.f32 %v3202_v4, %v3074_v27  ;;  %v2875_v16 = vadd.f32 %v2874_v19, %v2873_v50 }
 0x24a   :  { %8577 = vst [vmem:[#allocation120_spill] sm:$0xff] %v6039_v47  ;;  %v6051_v23 = vadd.f32 %v2512_v43, %v1989_v40  ;;  %v2514_v53 = vpop.f32.mrb[147].mxu0  ;;  %v3373_v14 = vadd.f32 %v3372_v56, %v3371_v21  ;;  %v3374_v40 = vsel %vm2740_vm0, %v3077_v37, 0.0  ;;  %v3376_v21 = vsel %vm2740_vm0, %v3079_v44, 0.0 }
 0x24b   :  { %8578 = vst [vmem:[#allocation121_spill] sm:$0xff] %v6044_v54  ;;  %v6053_v24 = vadd.f32 %v2514_v53, %v1991_v42  ;;  %v2703_v12 = vadd.f32 %v2702_v1, %v5963_v51  ;;  %v3204_v42 = vadd.f32 %v3203_v59, %v3076_v8  ;;  %v3083_v59 = vmul.f32 %v6014_v29, %v6014_v29 }
 0x24c   :  { %8579 = vst [vmem:[#allocation122_spill] sm:$0xff] %v6051_v23  ;;  %v3375_v56 = vadd.f32 %v3374_v40, %v3373_v14  ;;  %v3080_v14 = vmul.f32 %v5992_v7, %v5992_v7  ;;  %v2877_v19 = vadd.f32 %v2876_v13, %v2875_v16  ;;  %v2878_v44 = vsel %vm2740_vm0, %v5994_v31, 0.0 }
 0x24d   :  { %8580 = vst [vmem:[#allocation123_spill] sm:$0xff] %v6053_v24  ;;  %v3205_v8 = vadd.f32 %v3204_v42, %v3078_v18  ;;  %v3380_v16 = vsel %vm2740_vm0, %v3083_v59, 0.0 }
 0x24e   :  { %v1995_v28 = vpop.f32.mrb[148].mxu1  ;;  %v3377_v40 = vadd.f32 %v3376_v21, %v3375_v56  ;;  %v3085_v56 = vmul.f32 %v6024_v62, %v6024_v62 }
 0x24f   :  { %v2518_v10 = vpop.f32.mrb[148].mxu0  ;;  %v1997_v3 = vpop.f32.mrb[149].mxu1 }
 0x250   :  { %v6066_v63 = vadd.f32 %v2518_v10, %v1995_v28  ;;  %v2520_v27 = vpop.f32.mrb[149].mxu0  ;;  %v1999_v43 = vpop.f32.mrb[150].mxu1  ;;  %v2704_v10 = vadd.f32 %v2703_v12, %v5983_v5 }
 0x251   :  { %v6068_v53 = vadd.f32 %v2520_v27, %v1997_v3  ;;  %v2522_v37 = vpop.f32.mrb[150].mxu0  ;;  %v2001_v4 = vpop.f32.mrb[151].mxu1  ;;  %v3378_v3 = vsel %vm2740_vm0, %v3081_v34, 0.0  ;;  %v3082_v27 = vmul.f32 %v6010_v26, %v6010_v26 }
 0x252   :  { %8581 = vst [vmem:[#allocation124_spill] sm:$0xff] %v6066_v63  ;;  %v6075_v1 = vadd.f32 %v2522_v37, %v1999_v43  ;;  %v2524_v28 = vpop.f32.mrb[151].mxu0  ;;  %v2705_v18 = vadd.f32 %v2704_v10, %v5992_v7  ;;  %v3206_v43 = vadd.f32 %v3205_v8, %v3080_v14  ;;  %v3379_v31 = vadd.f32 %v3378_v3, %v3377_v40 }
 0x253   :  { %8582 = vst [vmem:[#allocation125_spill] sm:$0xff] %v6068_v53  ;;  %v6080_v50 = vadd.f32 %v2524_v28, %v2001_v4  ;;  %v2880_v4 = vsel %vm2740_vm0, %v6014_v29, 0.0  ;;  %v2879_v28 = vadd.f32 %v2878_v44, %v2877_v19  ;;  %v3084_v29 = vmul.f32 %v6019_v36, %v6019_v36 }
 0x254   :  { %v2706_v14 = vadd.f32 %v2705_v18, %v6010_v26  ;;  %v3207_v7 = vadd.f32 %v3206_v43, %v3082_v27  ;;  %v2882_v40 = vsel %vm2740_vm0, %v6024_v62, 0.0  ;;  %v3382_v44 = vsel %vm2740_vm0, %v3085_v56, 0.0 }
 0x255   :  { %8583 = vst [vmem:[#allocation126_spill] sm:$0xff] %v6080_v50  ;;  %v2881_v51 = vadd.f32 %v2880_v4, %v2879_v28  ;;  %v3086_v3 = vmul.f32 %v6039_v47, %v6039_v47  ;;  %v2884_v43 = vsel %vm2740_vm0, %v6044_v54, 0.0 }
 0x256   :  { %v2005_v12 = vpop.f32.mrb[152].mxu1  ;;  %v2707_v27 = vadd.f32 %v2706_v14, %v6019_v36  ;;  %v3208_v18 = vadd.f32 %v3207_v7, %v3084_v29 }
 0x257   :  { %v2528_v42 = vpop.f32.mrb[152].mxu0  ;;  %v2007_v37 = vpop.f32.mrb[153].mxu1 }
 0x258   :  { %v6095_v13 = vadd.f32 %v2528_v42, %v2005_v12  ;;  %v2530_v34 = vpop.f32.mrb[153].mxu0  ;;  %v2009_v21 = vpop.f32.mrb[154].mxu1  ;;  %v3381_v12 = vadd.f32 %v3380_v16, %v3379_v31  ;;  %v3087_v42 = vmul.f32 %v6044_v54, %v6044_v54  ;;  %v3089_v16 = vmul.f32 %v6053_v24, %v6053_v24 }
 0x259   :  { %v6097_v45 = vadd.f32 %v2530_v34, %v2007_v37  ;;  %v2532_v10 = vpop.f32.mrb[154].mxu0  ;;  %v2011_v8 = vpop.f32.mrb[155].mxu1  ;;  %v2883_v37 = vadd.f32 %v2882_v40, %v2881_v51  ;;  %v2708_v56 = vadd.f32 %v2707_v27, %v6039_v47  ;;  %v3209_v28 = vadd.f32 %v3208_v18, %v3086_v3 }
 0x25a   :  { %8584 = vst [vmem:[#allocation127_spill] sm:$0xff] %v6095_v13  ;;  %v6102_v59 = vadd.f32 %v2532_v10, %v2009_v21  ;;  %v2534_v5 = vpop.f32.mrb[155].mxu0  ;;  %v3383_v4 = vadd.f32 %v3382_v44, %v3381_v12  ;;  %v3088_v10 = vmul.f32 %v6051_v23, %v6051_v23  ;;  %v3091_v51 = vmul.f32 %v6068_v53, %v6068_v53 }
 0x25b   :  { %8585 = vst [vmem:[#allocation128_spill] sm:$0xff] %v6097_v45  ;;  %v6106_v19 = vadd.f32 %v2534_v5, %v2011_v8  ;;  %v3384_v5 = vsel %vm2740_vm0, %v3087_v42, 0.0  ;;  %v2885_v14 = vadd.f32 %v2884_v43, %v2883_v37  ;;  %v2886_v27 = vsel %vm2740_vm0, %v6053_v24, 0.0 }
 0x25c   :  { %v3385_v44 = vadd.f32 %v3384_v5, %v3383_v4  ;;  %v3090_v3 = vmul.f32 %v6066_v63, %v6066_v63  ;;  %v2709_v37 = vadd.f32 %v2708_v56, %v6051_v23  ;;  %v3388_v5 = vsel %vm2740_vm0, %v3091_v51, 0.0 }
 0x25d   :  { %8586 = vst [vmem:[#allocation129_spill] sm:$0xff] %v6106_v19  ;;  %v2887_v4 = vadd.f32 %v2886_v27, %v2885_v14  ;;  %v3093_v24 = vmul.f32 %v6080_v50, %v6080_v50  ;;  %v3095_v56 = vmul.f32 %v6097_v45, %v6097_v45  ;;  %v2890_v51 = vsel %vm2740_vm0, %v6080_v50, 0.0 }
 0x25e   :  { %v2015_v31 = vpop.f32.mrb[156].mxu1 }
 0x25f   :  { %v2538_v34 = vpop.f32.mrb[156].mxu0  ;;  %v2017_v21 = vpop.f32.mrb[157].mxu1  ;;  %v3392_v50 = vsel %vm2740_vm0, %v3095_v56, 0.0 }
 0x260   :  { %v6122_v7 = vadd.f32 %v2538_v34, %v2015_v31  ;;  %v2540_v29 = vpop.f32.mrb[157].mxu0  ;;  %v2019_v8 = vpop.f32.mrb[158].mxu1  ;;  %v3386_v34 = vsel %vm2740_vm0, %v3089_v16, 0.0  ;;  %v3092_v16 = vmul.f32 %v6075_v1, %v6075_v1 }
 0x261   :  { %v6126_v12 = vadd.f32 %v2540_v29, %v2017_v21  ;;  %v2542_v42 = vpop.f32.mrb[158].mxu0  ;;  %v2021_v40 = vpop.f32.mrb[159].mxu1  ;;  %v3210_v21 = vadd.f32 %v3209_v28, %v3088_v10  ;;  %v2888_v29 = vsel %vm2740_vm0, %v6068_v53, 0.0  ;;  %v3387_v54 = vadd.f32 %v3386_v34, %v3385_v44 }
 0x262   :  { %v6132_v18 = vadd.f32 %v2542_v42, %v2019_v8  ;;  %v2544_v31 = vpop.f32.mrb[159].mxu0  ;;  %v2710_v8 = vadd.f32 %v2709_v37, %v6066_v63  ;;  %v3094_v37 = vmul.f32 %v6095_v13, %v6095_v13 }
 0x263   :  { %8587 = vst [vmem:[#allocation130_spill] sm:$0xff] %v6126_v12  ;;  %v6135_v43 = vadd.f32 %v2544_v31, %v2021_v40  ;;  %v3211_v42 = vadd.f32 %v3210_v21, %v3090_v3  ;;  %v2889_v31 = vadd.f32 %v2888_v29, %v2887_v4  ;;  %v3389_v14 = vadd.f32 %v3388_v5, %v3387_v54 }
 0x264   :  { %8588 = vst [vmem:[#allocation131_spill] sm:$0xff] %v6132_v18  ;;  %v3390_v3 = vsel %vm2740_vm0, %v3093_v24, 0.0  ;;  %v2711_v53 = vadd.f32 %v2710_v8, %v6075_v1  ;;  %v2892_v54 = vsel %vm2740_vm0, %v6097_v45, 0.0  ;;  %v3097_v24 = vmul.f32 %v6106_v19, %v6106_v19 }
 0x265   :  { %8589 = vst [vmem:[#allocation132_spill] sm:$0xff] %v6135_v43  ;;  %v3212_v63 = vadd.f32 %v3211_v42, %v3092_v16  ;;  %v3096_v42 = vmul.f32 %v6102_v59, %v6102_v59 }
 0x266   :  { %v2025_v40 = vpop.f32.mrb[160].mxu1 }
 0x267   :  { %v2548_v28 = vpop.f32.mrb[160].mxu0  ;;  %v2027_v10 = vpop.f32.mrb[161].mxu1  ;;  %v3213_v47 = vadd.f32 %v3212_v63, %v3094_v37 }
 0x268   :  { %v6150_v27 = vadd.f32 %v2548_v28, %v2025_v40  ;;  %v2550_v44 = vpop.f32.mrb[161].mxu0  ;;  %v2029_v34 = vpop.f32.mrb[162].mxu1  ;;  %v2891_v28 = vadd.f32 %v2890_v51, %v2889_v31  ;;  %v3099_v31 = vmul.f32 %v6126_v12, %v6126_v12  ;;  %v3394_v51 = vsel %vm2740_vm0, %v3097_v24, 0.0 }
 0x269   :  { %v6155_v21 = vadd.f32 %v2550_v44, %v2027_v10  ;;  %v2552_v29 = vpop.f32.mrb[162].mxu0  ;;  %v2031_v4 = vpop.f32.mrb[163].mxu1  ;;  %v3391_v10 = vadd.f32 %v3390_v3, %v3389_v14  ;;  %v2712_v44 = vadd.f32 %v2711_v53, %v6095_v13  ;;  %v3098_v14 = vmul.f32 %v6122_v7, %v6122_v7 }
 0x26a   :  { %v6160_v5 = vadd.f32 %v2552_v29, %v2029_v34  ;;  %v2554_v40 = vpop.f32.mrb[163].mxu0  ;;  %v2893_v8 = vadd.f32 %v2892_v54, %v2891_v28  ;;  %v2894_v34 = vsel %vm2740_vm0, %v6106_v19, 0.0  ;;  %v3396_v45 = vsel %vm2740_vm0, %v3099_v31, 0.0 }
 0x26b   :  { %8590 = vst [vmem:[#allocation133_spill] sm:$0xff] %v6155_v21  ;;  %v6165_v23 = vadd.f32 %v2554_v40, %v2031_v4  ;;  %v3393_v16 = vadd.f32 %v3392_v50, %v3391_v10  ;;  %v2713_v63 = vadd.f32 %v2712_v44, %v6102_v59  ;;  %v3214_v4 = vadd.f32 %v3213_v47, %v3096_v42 }
 0x26c   :  { %8591 = vst [vmem:[#allocation134_spill] sm:$0xff] %v6160_v5  ;;  %v2895_v54 = vadd.f32 %v2894_v34, %v2893_v8  ;;  %v2896_v40 = vsel %vm2740_vm0, %v6126_v12, 0.0  ;;  %v3101_v13 = vmul.f32 %v6135_v43, %v6135_v43  ;;  %v3100_v8 = vmul.f32 %v6132_v18, %v6132_v18 }
 0x26d   :  { %8592 = vst [vmem:[#allocation135_spill] sm:$0xff] %v6165_v23  ;;  %v3395_v19 = vadd.f32 %v3394_v51, %v3393_v16  ;;  %v3215_v47 = vadd.f32 %v3214_v4, %v3098_v14  ;;  %v3103_v16 = vmul.f32 %v6155_v21, %v6155_v21  ;;  %v2898_v31 = vsel %vm2740_vm0, %v6135_v43, 0.0 }
 0x26e   :  { %v2035_v56 = vpop.f32.mrb[164].mxu1  ;;  %v2897_v34 = vadd.f32 %v2896_v40, %v2895_v54  ;;  %v2900_v4 = vsel %vm2740_vm0, %v6155_v21, 0.0 }
 0x26f   :  { %v2558_v3 = vpop.f32.mrb[164].mxu0  ;;  %v2037_v53 = vpop.f32.mrb[165].mxu1  ;;  %v3397_v51 = vadd.f32 %v3396_v45, %v3395_v19  ;;  %v3400_v45 = vsel %vm2740_vm0, %v3103_v16, 0.0  ;;  %v3105_v19 = vmul.f32 %v6165_v23, %v6165_v23 }
 0x270   :  { %v6178_v37 = vadd.f32 %v2558_v3, %v2035_v56  ;;  %v2560_v29 = vpop.f32.mrb[165].mxu0  ;;  %v2039_v50 = vpop.f32.mrb[166].mxu1  ;;  %v2714_v3 = vadd.f32 %v2713_v63, %v6122_v7 }
 0x271   :  { %v6182_v28 = vadd.f32 %v2560_v29, %v2037_v53  ;;  %v2562_v10 = vpop.f32.mrb[166].mxu0  ;;  %v2041_v24 = vpop.f32.mrb[167].mxu1  ;;  %v3102_v53 = vmul.f32 %v6150_v27, %v6150_v27  ;;  %v3398_v29 = vsel %vm2740_vm0, %v3101_v13, 0.0 }
 0x272   :  { %8593 = vst [vmem:[#allocation136_spill] sm:$0xff] %v6178_v37  ;;  %v6187_v44 = vadd.f32 %v2562_v10, %v2039_v50  ;;  %v2564_v56 = vpop.f32.mrb[167].mxu0  ;;  %v2715_v14 = vadd.f32 %v2714_v3, %v6132_v18  ;;  %v3216_v50 = vadd.f32 %v3215_v47, %v3100_v8  ;;  %v2899_v10 = vadd.f32 %v2898_v31, %v2897_v34 }
 0x273   :  { %8594 = vst [vmem:[#allocation137_spill] sm:$0xff] %v6182_v28  ;;  %v6192_v42 = vadd.f32 %v2564_v56, %v2041_v24  ;;  %v3399_v13 = vadd.f32 %v3398_v29, %v3397_v51  ;;  %v3104_v34 = vmul.f32 %v6160_v5, %v6160_v5  ;;  %v3107_v16 = vmul.f32 %v6182_v28, %v6182_v28 }
 0x274   :  { %8595 = vst [vmem:[#allocation138_spill] sm:$0xff] %v6187_v44  ;;  %v2716_v12 = vadd.f32 %v2715_v14, %v6150_v27  ;;  %v3217_v3 = vadd.f32 %v3216_v50, %v3102_v53  ;;  %v2901_v18 = vadd.f32 %v2900_v4, %v2899_v10  ;;  %v2902_v51 = vsel %vm2740_vm0, %v6165_v23, 0.0 }
 0x275   :  { %8596 = vst [vmem:[#allocation139_spill] sm:$0xff] %v6192_v42  ;;  %v3402_v53 = vsel %vm2740_vm0, %v3105_v19, 0.0  ;;  %v3106_v14 = vmul.f32 %v6178_v37, %v6178_v37  ;;  %v2904_v4 = vsel %vm2740_vm0, %v6182_v28, 0.0  ;;  %v3404_v10 = vsel %vm2740_vm0, %v3107_v16, 0.0 }
 0x276   :  { %v2045_v63 = vpop.f32.mrb[168].mxu1  ;;  %v2717_v50 = vadd.f32 %v2716_v12, %v6160_v5  ;;  %v3108_v12 = vmul.f32 %v6187_v44, %v6187_v44  ;;  %v2906_v16 = vsel %vm2740_vm0, %v6192_v42, 0.0 }
 0x277   :  { %v2568_v54 = vpop.f32.mrb[168].mxu0  ;;  %v2047_v40 = vpop.f32.mrb[169].mxu1 }
 0x278   :  { %v6207_v24 = vadd.f32 %v2568_v54, %v2045_v63  ;;  %v2570_v56 = vpop.f32.mrb[169].mxu0  ;;  %v2049_v43 = vpop.f32.mrb[170].mxu1  ;;  %v3401_v54 = vadd.f32 %v3400_v45, %v3399_v13  ;;  %v3109_v45 = vmul.f32 %v6192_v42, %v6192_v42  ;;  %v2718_v13 = vadd.f32 %v2717_v50, %v6178_v37 }
 0x279   :  { %v6210_v47 = vadd.f32 %v2570_v56, %v2047_v40  ;;  %v2572_v8 = vpop.f32.mrb[170].mxu0  ;;  %v2051_v21 = vpop.f32.mrb[171].mxu1  ;;  %v3218_v40 = vadd.f32 %v3217_v3, %v3104_v34 }
 0x27a   :  { %8597 = vst [vmem:[#allocation140_spill] sm:$0xff] %v6207_v24  ;;  %v6216_v31 = vadd.f32 %v2572_v8, %v2049_v43  ;;  %v2574_v63 = vpop.f32.mrb[171].mxu0  ;;  %v2903_v43 = vadd.f32 %v2902_v51, %v2901_v18 }
 0x27b   :  { %8598 = vst [vmem:[#allocation141_spill] sm:$0xff] %v6210_v47  ;;  %v6220_v29 = vadd.f32 %v2574_v63, %v2051_v21  ;;  %v3403_v21 = vadd.f32 %v3402_v53, %v3401_v54  ;;  %v3219_v63 = vadd.f32 %v3218_v40, %v3106_v14  ;;  %v3111_v54 = vmul.f32 %v6210_v47, %v6210_v47 }
 0x27c   :  { %v2905_v23 = vadd.f32 %v2904_v4, %v2903_v43  ;;  %v3406_v14 = vsel %vm2740_vm0, %v3109_v45, 0.0  ;;  %v3110_v4 = vmul.f32 %v6207_v24, %v6207_v24  ;;  %v3112_v37 = vmul.f32 %v6216_v31, %v6216_v31 }
 0x27d   :  { %8599 = vst [vmem:[#allocation142_spill] sm:$0xff] %v6220_v29  ;;  %v3405_v34 = vadd.f32 %v3404_v10, %v3403_v21  ;;  %v2908_v10 = vsel %vm2740_vm0, %v6210_v47, 0.0  ;;  %v2719_v21 = vadd.f32 %v2718_v13, %v6187_v44  ;;  %v3408_v42 = vsel %vm2740_vm0, %v3111_v54, 0.0 }
 0x27e   :  { %v2055_v56 = vpop.f32.mrb[172].mxu1  ;;  %v3113_v45 = vmul.f32 %v6220_v29, %v6220_v29 }
 0x27f   :  { %v2578_v19 = vpop.f32.mrb[172].mxu0  ;;  %v2057_v8 = vpop.f32.mrb[173].mxu1  ;;  %v2720_v28 = vadd.f32 %v2719_v21, %v6207_v24 }
 0x280   :  { %v6234_v5 = vadd.f32 %v2578_v19, %v2055_v56  ;;  %v2580_v3 = vpop.f32.mrb[173].mxu0  ;;  %v2059_v18 = vpop.f32.mrb[174].mxu1  ;;  %v3220_v19 = vadd.f32 %v3219_v63, %v3108_v12 }
 0x281   :  { %v6240_v51 = vadd.f32 %v2580_v3, %v2057_v8  ;;  %v2582_v53 = vpop.f32.mrb[174].mxu0  ;;  %v2061_v50 = vpop.f32.mrb[175].mxu1  ;;  %v2907_v8 = vadd.f32 %v2906_v16, %v2905_v23  ;;  %v3407_v3 = vadd.f32 %v3406_v14, %v3405_v34 }
 0x282   :  { %8600 = vst [vmem:[#allocation143_spill] sm:$0xff] %v6234_v5  ;;  %v6245_v40 = vadd.f32 %v2582_v53, %v2059_v18  ;;  %v2584_v43 = vpop.f32.mrb[175].mxu0  ;;  %v3221_v18 = vadd.f32 %v3220_v19, %v3110_v4  ;;  %v3114_v34 = vmul.f32 %v6234_v5, %v6234_v5  ;;  %v3410_v4 = vsel %vm2740_vm0, %v3113_v45, 0.0 }
 0x283   :  { %8601 = vst [vmem:[#allocation144_spill] sm:$0xff] %v6240_v51  ;;  %v6249_v56 = vadd.f32 %v2584_v43, %v2061_v50  ;;  %v2909_v53 = vadd.f32 %v2908_v10, %v2907_v8  ;;  %v2910_v50 = vsel %vm2740_vm0, %v6220_v29, 0.0  ;;  %v3115_v23 = vmul.f32 %v6240_v51, %v6240_v51 }
 0x284   :  { %v3409_v12 = vadd.f32 %v3408_v42, %v3407_v3  ;;  %v2721_v19 = vadd.f32 %v2720_v28, %v6216_v31  ;;  %v3222_v8 = vadd.f32 %v3221_v18, %v3112_v37  ;;  %v2912_v3 = vsel %vm2740_vm0, %v6240_v51, 0.0 }
 0x285   :  { %8602 = vst [vmem:[#allocation145_spill] sm:$0xff] %v6249_v56  ;;  %v2911_v29 = vadd.f32 %v2910_v50, %v2909_v53  ;;  %v3116_v37 = vmul.f32 %v6245_v40, %v6245_v40 }
 0x286   :  { %v2065_v47 = vpop.f32.mrb[176].mxu1  ;;  %v3223_v44 = vadd.f32 %v3222_v8, %v3114_v34 }
 0x287   :  { %v2588_v13 = vpop.f32.mrb[176].mxu0  ;;  %v2067_v63 = vpop.f32.mrb[177].mxu1  ;;  %v2913_v18 = vadd.f32 %v2912_v3, %v2911_v29 }
 0x288   :  { %v6264_v16 = vadd.f32 %v2588_v13, %v2065_v47  ;;  %v2590_v54 = vpop.f32.mrb[177].mxu0  ;;  %v2069_v14 = vpop.f32.mrb[178].mxu1  ;;  %v3412_v47 = vsel %vm2740_vm0, %v3115_v23, 0.0  ;;  %v3117_v13 = vmul.f32 %v6249_v56, %v6249_v56  ;;  %v2914_v23 = vsel %vm2740_vm0, %v6249_v56, 0.0 }
 0x289   :  { %v6267_v43 = vadd.f32 %v2590_v54, %v2067_v63  ;;  %v2592_v10 = vpop.f32.mrb[178].mxu0  ;;  %v2071_v21 = vpop.f32.mrb[179].mxu1  ;;  %v3411_v63 = vadd.f32 %v3410_v4, %v3409_v12  ;;  %v2722_v54 = vadd.f32 %v2721_v19, %v6234_v5  ;;  %v2915_v51 = vadd.f32 %v2914_v23, %v2913_v18 }
 0x28a   :  { %8603 = vst [vmem:[#allocation146_spill] sm:$0xff] %v6264_v16  ;;  %v6270_v24 = vadd.f32 %v2592_v10, %v2069_v14  ;;  %v2594_v42 = vpop.f32.mrb[179].mxu0  ;;  %v3414_v14 = vsel %vm2740_vm0, %v3117_v13, 0.0  ;;  %v3118_v12 = vmul.f32 %v6264_v16, %v6264_v16 }
 0x28b   :  { %8604 = vst [vmem:[#allocation147_spill] sm:$0xff] %v6267_v43  ;;  %v6277_v45 = vadd.f32 %v2594_v42, %v2071_v21  ;;  %v3119_v28 = vmul.f32 %v6267_v43, %v6267_v43  ;;  %v3413_v53 = vadd.f32 %v3412_v47, %v3411_v63  ;;  %v2723_v34 = vadd.f32 %v2722_v54, %v6245_v40 }
 0x28c   :  { %8605 = vst [vmem:[#allocation148_spill] sm:$0xff] %v6270_v24  ;;  %v3224_v21 = vadd.f32 %v3223_v44, %v3116_v37  ;;  %v2916_v29 = vsel %vm2740_vm0, %v6267_v43, 0.0 }
 0x28d   :  { %8606 = vst [vmem:[#allocation149_spill] sm:$0xff] %v6277_v45  ;;  %v3416_v3 = vsel %vm2740_vm0, %v3119_v28, 0.0  ;;  %v3121_v47 = vmul.f32 %v6277_v45, %v6277_v45  ;;  %v3415_v5 = vadd.f32 %v3414_v14, %v3413_v53  ;;  %v2724_v44 = vadd.f32 %v2723_v34, %v6264_v16 }
 0x28e   :  { %v2075_v50 = vpop.f32.mrb[180].mxu1  ;;  %v2918_v18 = vsel %vm2740_vm0, %v6277_v45, 0.0 }
 0x28f   :  { %v2598_v4 = vpop.f32.mrb[180].mxu0  ;;  %v2077_v10 = vpop.f32.mrb[181].mxu1  ;;  %v3418_v53 = vsel %vm2740_vm0, %v3121_v47, 0.0  ;;  %v2725_v14 = vadd.f32 %v2724_v44, %v6270_v24 }
 0x290   :  { %v6290_v19 = vadd.f32 %v2598_v4, %v2075_v50  ;;  %v2600_v8 = vpop.f32.mrb[181].mxu0  ;;  %v2079_v42 = vpop.f32.mrb[182].mxu1  ;;  %v3225_v50 = vadd.f32 %v3224_v21, %v3118_v12  ;;  %v3120_v4 = vmul.f32 %v6270_v24, %v6270_v24 }
 0x291   :  { %v6297_v13 = vadd.f32 %v2600_v8, %v2077_v10  ;;  %v2602_v63 = vpop.f32.mrb[182].mxu0  ;;  %v2081_v56 = vpop.f32.mrb[183].mxu1  ;;  %v2917_v10 = vadd.f32 %v2916_v29, %v2915_v51  ;;  %v3417_v8 = vadd.f32 %v3416_v3, %v3415_v5 }
 0x292   :  { %v6300_v54 = vadd.f32 %v2602_v63, %v2079_v42  ;;  %v2604_v37 = vpop.f32.mrb[183].mxu0  ;;  %v3122_v23 = vmul.f32 %v6290_v19, %v6290_v19  ;;  %v3226_v34 = vadd.f32 %v3225_v50, %v3120_v4  ;;  %v2726_v47 = vadd.f32 %v2725_v14, %v6290_v19 }
 0x293   :  { %8607 = vst [vmem:[#allocation150_spill] sm:$0xff] %v6297_v13  ;;  %v3123_v28 = vmul.f32 %v6297_v13, %v6297_v13  ;;  %v6306_v43 = vadd.f32 %v2604_v37, %v2081_v56  ;;  %v2920_v21 = vsel %vm2740_vm0, %v6297_v13, 0.0  ;;  %v2919_v29 = vadd.f32 %v2918_v18, %v2917_v10 }
 0x294   :  { %v3419_v3 = vadd.f32 %v3418_v53, %v3417_v8  ;;  %v3227_v45 = vadd.f32 %v3226_v34, %v3122_v23  ;;  %v3124_v50 = vmul.f32 %v6300_v54, %v6300_v54  ;;  %v2727_v34 = vadd.f32 %v2726_v47, %v6300_v54 }
 0x295   :  { %8608 = vst [vmem:[#allocation151_spill] sm:$0xff] %v6306_v43  ;;  %v3420_v56 = vsel %vm2740_vm0, %v3123_v28, 0.0  ;;  %v3125_v5 = vmul.f32 %v6306_v43, %v6306_v43  ;;  %v2921_v24 = vadd.f32 %v2920_v21, %v2919_v29  ;;  %v2922_v10 = vsel %vm2740_vm0, %v6306_v43, 0.0 }
 0x296   :  { %v2085_v12 = vpop.f32.mrb[184].mxu1  ;;  %v3421_v16 = vadd.f32 %v3420_v56, %v3419_v3  ;;  %v3228_v21 = vadd.f32 %v3227_v45, %v3124_v50 }
 0x297   :  { %v2608_v51 = vpop.f32.mrb[184].mxu0  ;;  %v2087_v42 = vpop.f32.mrb[185].mxu1  ;;  %v3422_v53 = vsel %vm2740_vm0, %v3125_v5, 0.0  ;;  %v2923_v5 = vadd.f32 %v2922_v10, %v2921_v24 }
 0x298   :  { %v6320_v63 = vadd.f32 %v2608_v51, %v2085_v12  ;;  %v2610_v37 = vpop.f32.mrb[185].mxu0  ;;  %v2089_v44 = vpop.f32.mrb[186].mxu1  ;;  %v3423_v29 = vadd.f32 %v3422_v53, %v3421_v16 }
 0x299   :  { %v6324_v4 = vadd.f32 %v2610_v37, %v2087_v42  ;;  %v2612_v28 = vpop.f32.mrb[186].mxu0  ;;  %v2091_v13 = vpop.f32.mrb[187].mxu1 }
 0x29a   :  { %8609 = vst [vmem:[#allocation152_spill] sm:$0xff] %v6320_v63  ;;  %v6328_v8 = vadd.f32 %v2612_v28, %v2089_v44  ;;  %v2614_v18 = vpop.f32.mrb[187].mxu0  ;;  %v3126_v23 = vmul.f32 %v6320_v63, %v6320_v63  ;;  %v2728_v3 = vadd.f32 %v2727_v34, %v6320_v63 }
 0x29b   :  { %8610 = vst [vmem:[#allocation153_spill] sm:$0xff] %v6324_v4  ;;  %v3127_v14 = vmul.f32 %v6324_v4, %v6324_v4  ;;  %v6335_v12 = vadd.f32 %v2614_v18, %v2091_v13  ;;  %v2924_v56 = vsel %vm2740_vm0, %v6324_v4, 0.0 }
 0x29c   :  { %8611 = vst [vmem:[#allocation154_spill] sm:$0xff] %v6328_v8  ;;  %v3229_v44 = vadd.f32 %v3228_v21, %v3126_v23  ;;  %v3128_v13 = vmul.f32 %v6328_v8, %v6328_v8  ;;  %v2925_v45 = vadd.f32 %v2924_v56, %v2923_v5  ;;  %v2729_v23 = vadd.f32 %v2728_v3, %v6328_v8 }
 0x29d   :  { %8612 = vst [vmem:[#allocation155_spill] sm:$0xff] %v6335_v12  ;;  %v3424_v51 = vsel %vm2740_vm0, %v3127_v14, 0.0  ;;  %v3129_v42 = vmul.f32 %v6335_v12, %v6335_v12  ;;  %v2926_v43 = vsel %vm2740_vm0, %v6335_v12, 0.0 }
 0x29e   :  { %v2095_v37 = vpop.f32.mrb[188].mxu1  ;;  %v3425_v50 = vadd.f32 %v3424_v51, %v3423_v29  ;;  %v3230_v51 = vadd.f32 %v3229_v44, %v3128_v13 }
 0x29f   :  { %v2618_v28 = vpop.f32.mrb[188].mxu0  ;;  %v2097_v47 = vpop.f32.mrb[189].mxu1  ;;  %v3426_v24 = vsel %vm2740_vm0, %v3129_v42, 0.0 }
 0x2a0   :  { %v6346_v18 = vadd.f32 %v2618_v28, %v2095_v37  ;;  %v2620_v4 = vpop.f32.mrb[189].mxu0  ;;  %v2099_v14 = vpop.f32.mrb[190].mxu1  ;;  %v3427_v37 = vadd.f32 %v3426_v24, %v3425_v50 }
 0x2a1   :  { %v6351_v16 = vadd.f32 %v2620_v4, %v2097_v47  ;;  %v2622_v10 = vpop.f32.mrb[190].mxu0  ;;  %v2101_v53 = vpop.f32.mrb[191].mxu1  ;;  %v2927_v4 = vadd.f32 %v2926_v43, %v2925_v45 }
 0x2a2   :  { %8613 = vst [vmem:[#allocation156_spill] sm:$0xff] %v6346_v18  ;;  %v3130_v34 = vmul.f32 %v6346_v18, %v6346_v18  ;;  %v6356_v21 = vadd.f32 %v2622_v10, %v2099_v14  ;;  %v2624_v56 = vpop.f32.mrb[191].mxu0  ;;  %v2730_v28 = vadd.f32 %v2729_v23, %v6346_v18 }
 0x2a3   :  { %8614 = vst [vmem:[#allocation157_spill] sm:$0xff] %v6351_v16  ;;  %v2928_v5 = vsel %vm2740_vm0, %v6351_v16, 0.0  ;;  %v3131_v29 = vmul.f32 %v6351_v16, %v6351_v16  ;;  %v6362_v42 = vadd.f32 %v2624_v56, %v2101_v53 }
 0x2a4   :  { %8615 = vst [vmem:[#allocation158_spill] sm:$0xff] %v6356_v21  ;;  %v3231_v3 = vadd.f32 %v3230_v51, %v3130_v34  ;;  %v3132_v14 = vmul.f32 %v6356_v21, %v6356_v21  ;;  %v2929_v13 = vadd.f32 %v2928_v5, %v2927_v4  ;;  %v2731_v45 = vadd.f32 %v2730_v28, %v6356_v21 }
 0x2a5   :  { %8616 = vst [vmem:[#allocation159_spill] sm:$0xff] %v6362_v42  ;;  %v3428_v47 = vsel %vm2740_vm0, %v3131_v29, 0.0  ;;  %v3133_v44 = vmul.f32 %v6362_v42, %v6362_v42  ;;  %v2930_v53 = vsel %vm2740_vm0, %v6362_v42, 0.0 }
 0x2a6   :  { %v2105_v10 = vpop.f32.mrb[192].mxu1  ;;  %v3429_v12 = vadd.f32 %v3428_v47, %v3427_v37  ;;  %v3232_v51 = vadd.f32 %v3231_v3, %v3132_v14  ;;  %v2931_v4 = vadd.f32 %v2930_v53, %v2929_v13 }
 0x2a7   :  { %v2628_v56 = vpop.f32.mrb[192].mxu0  ;;  %v2107_v43 = vpop.f32.mrb[193].mxu1  ;;  %v3430_v50 = vsel %vm2740_vm0, %v3133_v44, 0.0 }
 0x2a8   :  { %v6374_v24 = vadd.f32 %v2628_v56, %v2105_v10  ;;  %v2630_v23 = vpop.f32.mrb[193].mxu0  ;;  %v2109_v34 = vpop.f32.mrb[194].mxu1  ;;  %v3431_v21 = vadd.f32 %v3430_v50, %v3429_v12 }
 0x2a9   :  { %v6376_v29 = vadd.f32 %v2630_v23, %v2107_v43  ;;  %v2632_v16 = vpop.f32.mrb[194].mxu0  ;;  %v2111_v5 = vpop.f32.mrb[195].mxu1 }
 0x2aa   :  { %8617 = vst [vmem:[#allocation160_spill] sm:$0xff] %v6374_v24  ;;  %v2732_v37 = vadd.f32 %v2731_v45, %v6374_v24  ;;  %v3134_v47 = vmul.f32 %v6374_v24, %v6374_v24  ;;  %v6381_v42 = vadd.f32 %v2632_v16, %v2109_v34  ;;  %v2634_v28 = vpop.f32.mrb[195].mxu0 }
 0x2ab   :  { %8618 = vst [vmem:[#allocation161_spill] sm:$0xff] %v6376_v29  ;;  %v2932_v44 = vsel %vm2740_vm0, %v6376_v29, 0.0  ;;  %v3135_v3 = vmul.f32 %v6376_v29, %v6376_v29  ;;  %v6387_v14 = vadd.f32 %v2634_v28, %v2111_v5 }
 0x2ac   :  { %8619 = vst [vmem:[#allocation162_spill] sm:$0xff] %v6381_v42  ;;  %v3233_v10 = vadd.f32 %v3232_v51, %v3134_v47  ;;  %v2933_v56 = vadd.f32 %v2932_v44, %v2931_v4  ;;  %v2733_v13 = vadd.f32 %v2732_v37, %v6381_v42  ;;  %v3136_v53 = vmul.f32 %v6381_v42, %v6381_v42 }
 0x2ad   :  { %8620 = vst [vmem:[#allocation163_spill] sm:$0xff] %v6387_v14  ;;  %v3432_v16 = vsel %vm2740_vm0, %v3135_v3, 0.0  ;;  %v2934_v12 = vsel %vm2740_vm0, %v6387_v14, 0.0  ;;  %v3137_v43 = vmul.f32 %v6387_v14, %v6387_v14 }
 0x2ae   :  { %v3433_v45 = vadd.f32 %v3432_v16, %v3431_v21  ;;  %v2734_v50 = vrot.slane %v2733_v13, 4  ;;  %v3234_v23 = vadd.f32 %v3233_v10, %v3136_v53  ;;  %v2935_v34 = vadd.f32 %v2934_v12, %v2933_v56 }
 0x2af   :  { %v3434_v51 = vsel %vm2740_vm0, %v3137_v43, 0.0 }
 0x2b0   :  { %v2735_v5 = vadd.f32 %v2734_v50, %v2733_v13  ;;  %v3235_v4 = vrot.slane %v3234_v23, 4  ;;  %v2936_v37 = vrot.slane %v2935_v34, 4  ;;  %v3435_v47 = vadd.f32 %v3434_v51, %v3433_v45 }
 0x2b2   :  { %v2736_v28 = vrot.slane %v2735_v5, 2  ;;  %v3236_v44 = vadd.f32 %v3235_v4, %v3234_v23  ;;  %v2937_v42 = vadd.f32 %v2936_v37, %v2935_v34  ;;  %v3436_v3 = vrot.slane %v3435_v47, 4 }
 0x2b4   :  { %v2737_v29 = vadd.f32 %v2736_v28, %v2735_v5  ;;  %v3237_v24 = vrot.slane %v3236_v44, 2  ;;  %v2938_v18 = vrot.slane %v2937_v42, 2  ;;  %v3437_v8 = vadd.f32 %v3436_v3, %v3435_v47 }
 0x2b6   :  { %v2738_v63 = vrot.slane %v2737_v29, 1  ;;  %v3238_v14 = vadd.f32 %v3237_v24, %v3236_v44  ;;  %v2939_v21 = vadd.f32 %v2938_v18, %v2937_v42  ;;  %v3438_v16 = vrot.slane %v3437_v8, 2 }
 0x2b7   :  { %v3461_v42 = vlaneseq }
 0x2b8   :  { %v2739_v10 = vadd.f32 %v2738_v63, %v2737_v29  ;;  %v3239_v56 = vrot.slane %v3238_v14, 1  ;;  %v2940_v53 = vrot.slane %v2939_v21, 1  ;;  %v3439_v12 = vadd.f32 %v3438_v16, %v3437_v8 }
 0x2b9   :  { %v4992_v63 = vmov 1966171168   ;;  %v6398_v29 = vshrl.u32 %v3461_v42, 7 }
 0x2ba   :  { %v3240_v13 = vadd.f32 %v3239_v56, %v3238_v14  ;;  %v3442_v43 = vmul.f32 0.0012755102, %v2739_v10  ;;  %v2941_v50 = vadd.f32 %v2940_v53, %v2939_v21  ;;  %v3440_v45 = vrot.slane %v3439_v12, 1  ;;  %v3450_v56 = vld [vmem:[%s8295_s2] sm:$0x3] }
 0x2bb   :  { %v3459_v18 = vunpack.c.l.s4 %v4992_v63 }
 0x2bc   :  { %v3444_v51 = vmul.f32 0.0012755102, %v3240_v13  ;;  %v3446_v23 = vmul.f32 %v3442_v43, %v3442_v43  ;;  %v3441_v34 = vadd.f32 %v3440_v45, %v3439_v12  ;;  %v3443_v4 = vmul.f32 0.0012755102, %v2941_v50 }
 0x2bd   :  { %v3460_v8 = vunpack.c.0.s8 %v3459_v18  ;;  %v8459_v12 = vsub.s32 0, %v6398_v29  ;;  %v8458_v13 = vsub.s32 1, %v6398_v29  ;;  %v8624_v18 = vld [vmem:[#allocation8_spill] sm:$0xff] }
 0x2be   :  { %v3448_v5 = vsub.f32 %v3444_v51, %v3446_v23  ;;  %v3445_v37 = vmul.f32 0.0012755102, %v3441_v34  ;;  %v3447_v28 = vmul.f32 %v3443_v4, %v3443_v4 }
 0x2bf   :  { %v3463_v44 = vsub.s32 %v3460_v8, %v6398_v29  ;;  %v8626_v8 = vld [vmem:[#allocation10_spill] sm:$0xff] }
 0x2c0   :  { %v3451_v47 = vadd.f32 0.001, %v3448_v5  ;;  %v3449_v3 = vsub.f32 %v3445_v37, %v3447_v28  ;;  %v8621_v5 = vld [vmem:[#allocation5_spill] sm:$0xff]  ;;  %v8622_v28 = vld [vmem:[#allocation6_spill] sm:$0xff] }
 0x2c2   :  { %v3452_v24 = vadd.f32 0.001, %v3449_v3  ;;  %4961 = vrsqrt.f32 %v3451_v47 }
 0x2c4   :  { %4963 = vrsqrt.f32 %v3452_v24  ;;  %v8623_v24 = vld [vmem:[#allocation7_spill] sm:$0xff] }
 0x2cc   :  { %v4962_v14 = vpop.eup %4961 }
 0x2ce   :  { %v4964_v21 = vpop.eup %4963 }
 0x2cf   :  { %v3457_v16 = vcombine.low %v4962_v14, %v4964_v21  ;;  %v8627_v21 = vld [vmem:[#allocation11_spill] sm:$0xff] }
 0x2d1   :  { %v3464_v10 = vrot.slane %v3457_v16, %v3463_v44 }
 0x2d3   :  { %v3471_v53 = vrot.slane %v3464_v10, %v3463_v44  ;;  %v8628_v10 = vld [vmem:[#allocation12_spill] sm:$0xff] }
 0x2d5   :  { %v3473_v50 = vmul.f32 %v3471_v53, %v3450_v56  ;;  %v8629_v53 = vld [vmem:[#allocation13_spill] sm:$0xff] }
 0x2d7   :  { %v6408_v45 = vrot.slane %v3473_v50, %v8459_v12  ;;  %v6412_v51 = vrot.slane %v3473_v50, %v8458_v13  ;;  %v8637_v13 = vld [vmem:[#allocation19_spill] sm:$0xff]  ;;  %v8639_v12 = vld [vmem:[#allocation20_spill] sm:$0xff] }
 0x2d9   :  { %v3486_v23 = vmul.f32 %v6408_v45, %v3442_v43  ;;  %v3487_v34 = vmul.f32 %v6412_v51, %v3443_v4  ;;  %v6418_v37 = vmul.f32 %v6408_v45, %v8621_v5  ;;  %v6422_v47 = vmul.f32 %v6412_v51, %v8622_v28  ;;  %v8625_v43 = vld [vmem:[#allocation9_spill] sm:$0xff] }
 0x2da   :  { %v6426_v63 = vmul.f32 %v6408_v45, %v8623_v24  ;;  %v6430_v42 = vmul.f32 %v6412_v51, %v8624_v18  ;;  %v6434_v4 = vmul.f32 %v6408_v45, %v8625_v43  ;;  %v6438_v14 = vmul.f32 %v6412_v51, %v8626_v8  ;;  %v8631_v24 = vld [vmem:[#allocation15_spill] sm:$0xff]  ;;  %v8632_v43 = vld [vmem:[#allocation16_spill] sm:$0xff] }
 0x2db   :  { %v3490_v3 = vcombine.low %v3486_v23, %v3487_v34  ;;  %v6442_v16 = vmul.f32 %v6408_v45, %v8627_v21  ;;  %v6446_v56 = vmul.f32 %v6412_v51, %v8628_v10  ;;  %v6450_v50 = vmul.f32 %v6408_v45, %v8629_v53  ;;  %v8630_v34 = vld [vmem:[#allocation14_spill] sm:$0xff]  ;;  %v8633_v21 = vld [vmem:[#allocation17_spill] sm:$0xff] }
 0x2dc   :  { %v6454_v5 = vmul.f32 %v6412_v51, %v8630_v34  ;;  %v6458_v28 = vmul.f32 %v6408_v45, %v5242_v25  ;;  %v6462_v18 = vmul.f32 %v6412_v51, %v8631_v24  ;;  %v6466_v8 = vmul.f32 %v6408_v45, %v8632_v43  ;;  %v8635_v53 = vld [vmem:[#allocation18_spill] sm:$0xff]  ;;  %v3474_v34 = vld [vmem:[%s8296_s3] sm:$0x3] }
 0x2dd   :  { %v3497_v23 = vrot.slane %v3490_v3, %v3463_v44  ;;  %v6470_v10 = vmul.f32 %v6412_v51, %v8633_v21  ;;  %v6474_v3 = vmul.f32 %v6408_v45, %v5250_v41  ;;  %v6478_v25 = vmul.f32 %v6412_v51, %v8635_v53 }
 0x2de   :  { %v6485_v43 = vmul.f32 %v6408_v45, %v5254_v49  ;;  %v6489_v21 = vmul.f32 %v6412_v51, %v8637_v13  ;;  %v6493_v41 = vmul.f32 %v6408_v45, %v8639_v12 }
 0x2df   :  { %8634 = vst [vmem:[#allocation5_spill] sm:$0xff] %v6474_v3  ;;  %8636 = vst [vmem:[#allocation6_spill] sm:$0xff] %v6478_v25  ;;  %v3504_v24 = vrot.slane %v3497_v23, %v3463_v44  ;;  %v8641_v3 = vld [vmem:[#allocation21_spill] sm:$0xff]  ;;  %v6501_v25 = vmul.f32 %v6408_v45, %v5262_v6  ;;  %v8644_v44 = vld [vmem:[#allocation22_spill] sm:$0xff] }
 0x2e0   :  { %8638 = vst [vmem:[#allocation7_spill] sm:$0xff] %v6489_v21  ;;  %8640 = vst [vmem:[#allocation8_spill] sm:$0xff] %v6493_v41  ;;  %v6497_v53 = vmul.f32 %v6412_v51, %v8641_v3  ;;  %v6505_v49 = vmul.f32 %v6412_v51, %v8644_v44  ;;  %v8646_v23 = vld [vmem:[#allocation23_spill] sm:$0xff]  ;;  %v8648_v21 = vld [vmem:[#allocation24_spill] sm:$0xff] }
 0x2e1   :  { %8643 = vst [vmem:[#allocation10_spill] sm:$0xff] %v6501_v25  ;;  %v6509_v13 = vmul.f32 %v6408_v45, %v8646_v23  ;;  %v6513_v12 = vmul.f32 %v6412_v51, %v8648_v21  ;;  %v8650_v41 = vld [vmem:[#allocation25_spill] sm:$0xff]  ;;  %v8654_v25 = vld [vmem:[#allocation27_spill] sm:$0xff]  ;;  %v8655_v23 = vld [vmem:[#allocation28_spill] sm:$0xff] }
 0x2e2   :  { %8642 = vst [vmem:[#allocation9_spill] sm:$0xff] %v6497_v53  ;;  %8645 = vst [vmem:[#allocation11_spill] sm:$0xff] %v6505_v49  ;;  %v6517_v3 = vmul.f32 %v6408_v45, %v8650_v41  ;;  %v8652_v53 = vld [vmem:[#allocation26_spill] sm:$0xff]  ;;  %v6525_v44 = vmul.f32 %v6408_v45, %v8654_v25  ;;  %v6527_v49 = vsub.f32 %v3474_v34, %v3504_v24  ;;  %v8657_v21 = vld [vmem:[#allocation29_spill] sm:$0xff] }
 0x2e3   :  { %8647 = vst [vmem:[#allocation12_spill] sm:$0xff] %v6509_v13  ;;  %8649 = vst [vmem:[#allocation13_spill] sm:$0xff] %v6513_v12  ;;  %v6521_v6 = vmul.f32 %v6412_v51, %v8652_v53  ;;  %v6531_v13 = vmul.f32 %v6412_v51, %v8655_v23  ;;  %v6535_v12 = vmul.f32 %v6408_v45, %v8657_v21  ;;  %v8659_v41 = vld [vmem:[#allocation30_spill] sm:$0xff]  ;;  %v8661_v53 = vld [vmem:[#allocation31_spill] sm:$0xff] }
 0x2e4   :  { %8651 = vst [vmem:[#allocation14_spill] sm:$0xff] %v6517_v3  ;;  %v6539_v3 = vmul.f32 %v6412_v51, %v8659_v41  ;;  %v8663_v25 = vld [vmem:[#allocation32_spill] sm:$0xff]  ;;  %v8665_v24 = vld [vmem:[#allocation33_spill] sm:$0xff] }
 0x2e5   :  { %8653 = vst [vmem:[#allocation15_spill] sm:$0xff] %v6521_v6  ;;  %8656 = vst [vmem:[#allocation16_spill] sm:$0xff] %v6531_v13  ;;  %v6543_v6 = vmul.f32 %v6408_v45, %v8661_v53  ;;  %v6547_v34 = vmul.f32 %v6412_v51, %v8663_v25  ;;  %v6551_v23 = vmul.f32 %v6408_v45, %v8665_v24  ;;  %v8667_v13 = vld [vmem:[#allocation34_spill] sm:$0xff] }
 0x2e6   :  { %8658 = vst [vmem:[#allocation17_spill] sm:$0xff] %v6535_v12  ;;  %8660 = vst [vmem:[#allocation18_spill] sm:$0xff] %v6539_v3  ;;  %v6555_v21 = vmul.f32 %v6412_v51, %v8667_v13  ;;  %v8669_v12 = vld [vmem:[#allocation35_spill] sm:$0xff]  ;;  %v8671_v3 = vld [vmem:[#allocation36_spill] sm:$0xff] }
 0x2e7   :  { %8662 = vst [vmem:[#allocation19_spill] sm:$0xff] %v6543_v6  ;;  %8664 = vst [vmem:[#allocation20_spill] sm:$0xff] %v6547_v34  ;;  %v6559_v41 = vmul.f32 %v6408_v45, %v8669_v12  ;;  %v6563_v53 = vmul.f32 %v6412_v51, %v8671_v3  ;;  %v8673_v6 = vld [vmem:[#allocation37_spill] sm:$0xff]  ;;  %v8675_v34 = vld [vmem:[#allocation38_spill] sm:$0xff] }
 0x2e8   :  { %8666 = vst [vmem:[#allocation21_spill] sm:$0xff] %v6551_v23  ;;  %8668 = vst [vmem:[#allocation22_spill] sm:$0xff] %v6555_v21  ;;  %v6567_v25 = vmul.f32 %v6408_v45, %v8673_v6  ;;  %v6571_v24 = vmul.f32 %v6412_v51, %v8675_v34  ;;  %v8677_v23 = vld [vmem:[#allocation39_spill] sm:$0xff]  ;;  %v8678_v21 = vld [vmem:[#allocation40_spill] sm:$0xff] }
 0x2e9   :  { %8670 = vst [vmem:[#allocation23_spill] sm:$0xff] %v6559_v41  ;;  %8672 = vst [vmem:[#allocation24_spill] sm:$0xff] %v6563_v53  ;;  %v6575_v13 = vmul.f32 %v6408_v45, %v8677_v23  ;;  %v6579_v12 = vmul.f32 %v6412_v51, %v8678_v21  ;;  %v8680_v41 = vld [vmem:[#allocation41_spill] sm:$0xff]  ;;  %v8681_v53 = vld [vmem:[#allocation42_spill] sm:$0xff]  ;;  %v6599_v21 = vmul.f32 %v6408_v45, %v8522_v11 }
 0x2ea   :  { %8674 = vst [vmem:[#allocation25_spill] sm:$0xff] %v6567_v25  ;;  %8676 = vst [vmem:[#allocation26_spill] sm:$0xff] %v6571_v24  ;;  %v6583_v3 = vmul.f32 %v6408_v45, %v8680_v41  ;;  %v6587_v6 = vmul.f32 %v6412_v51, %v8681_v53  ;;  %v8682_v25 = vld [vmem:[#allocation43_spill] sm:$0xff]  ;;  %v8683_v24 = vld [vmem:[#allocation44_spill] sm:$0xff]  ;;  %v6607_v53 = vmul.f32 %v6408_v45, %v5344_v17 }
 0x2eb   :  { %8679 = vst [vmem:[#allocation27_spill] sm:$0xff] %v6579_v12  ;;  %v6591_v34 = vmul.f32 %v6408_v45, %v8682_v25  ;;  %v6595_v23 = vmul.f32 %v6412_v51, %v8683_v24  ;;  %8685 = vst [vmem:[#allocation29_spill] sm:$0xff] %v6599_v21  ;;  %v8686_v12 = vld [vmem:[#allocation46_spill] sm:$0xff]  ;;  %v6611_v25 = vmul.f32 %v6412_v51, %v5351_v61  ;;  %v8692_v21 = vld [vmem:[#allocation48_spill] sm:$0xff] }
 0x2ec   :  { %v6603_v41 = vmul.f32 %v6412_v51, %v8686_v12  ;;  %8688 = vst [vmem:[#allocation31_spill] sm:$0xff] %v6607_v53  ;;  %v6615_v24 = vmul.f32 %v6408_v45, %v5364_v20  ;;  %v6623_v12 = vmul.f32 %v6408_v45, %v8692_v21  ;;  %v8694_v53 = vld [vmem:[#allocation50_spill] sm:$0xff] }
 0x2ed   :  { %8684 = vst [vmem:[#allocation28_spill] sm:$0xff] %v6595_v23  ;;  %8689 = vst [vmem:[#allocation32_spill] sm:$0xff] %v6611_v25  ;;  %v8690_v23 = vld [vmem:[#allocation47_spill] sm:$0xff]  ;;  %v6631_v61 = vmul.f32 %v6408_v45, %v8694_v53  ;;  %v6651_v53 = vmul.f32 %v6412_v51, %v5425_v22 }
 0x2ee   :  { %8687 = vst [vmem:[#allocation30_spill] sm:$0xff] %v6603_v41  ;;  %v6619_v11 = vmul.f32 %v6412_v51, %v8690_v23  ;;  %v8693_v41 = vld [vmem:[#allocation49_spill] sm:$0xff]  ;;  %v8695_v25 = vld [vmem:[#allocation51_spill] sm:$0xff]  ;;  %v6639_v23 = vmul.f32 %v6408_v45, %v5403_v0 }
 0x2ef   :  { %v6627_v17 = vmul.f32 %v6412_v51, %v8693_v41  ;;  %v6635_v20 = vmul.f32 %v6412_v51, %v8695_v25  ;;  %v6647_v41 = vmul.f32 %v6408_v45, %v5420_v9  ;;  %8701 = vst [vmem:[#allocation38_spill] sm:$0xff] %v6651_v53  ;;  %v6655_v25 = vmul.f32 %v6408_v45, %v5430_v38  ;;  %v8710_v53 = vld [vmem:[#allocation57_spill] sm:$0xff] }
 0x2f0   :  { %8691 = vst [vmem:[#allocation33_spill] sm:$0xff] %v6619_v11  ;;  %8697 = vst [vmem:[#allocation35_spill] sm:$0xff] %v6639_v23  ;;  %v8698_v11 = vld [vmem:[#allocation52_spill] sm:$0xff]  ;;  %v8704_v23 = vld [vmem:[#allocation54_spill] sm:$0xff]  ;;  %v6675_v38 = vmul.f32 %v6412_v51, %v8710_v53 }
 0x2f1   :  { %8696 = vst [vmem:[#allocation34_spill] sm:$0xff] %v6635_v20  ;;  %v6643_v21 = vmul.f32 %v6412_v51, %v8698_v11  ;;  %8700 = vst [vmem:[#allocation37_spill] sm:$0xff] %v6647_v41  ;;  %v8702_v20 = vld [vmem:[#allocation53_spill] sm:$0xff]  ;;  %v6663_v11 = vmul.f32 %v6408_v45, %v8704_v23  ;;  %v8708_v41 = vld [vmem:[#allocation56_spill] sm:$0xff] }
 0x2f2   :  { %v6659_v0 = vmul.f32 %v6412_v51, %v8702_v20  ;;  %v6671_v22 = vmul.f32 %v6408_v45, %v8708_v41  ;;  %8711 = vst [vmem:[#allocation43_spill] sm:$0xff] %v6675_v38  ;;  %v6679_v20 = vmul.f32 %v6408_v45, %v5478_v52  ;;  %v8719_v38 = vld [vmem:[#allocation62_spill] sm:$0xff] }
 0x2f3   :  { %8699 = vst [vmem:[#allocation36_spill] sm:$0xff] %v6643_v21  ;;  %8705 = vst [vmem:[#allocation40_spill] sm:$0xff] %v6663_v11  ;;  %v8706_v21 = vld [vmem:[#allocation55_spill] sm:$0xff]  ;;  %v6699_v52 = vmul.f32 %v6412_v51, %v8719_v38  ;;  %v6719_v38 = vmul.f32 %v6408_v45, %v5539_v48 }
 0x2f4   :  { %8703 = vst [vmem:[#allocation39_spill] sm:$0xff] %v6659_v0  ;;  %v6667_v9 = vmul.f32 %v6412_v51, %v8706_v21  ;;  %8709 = vst [vmem:[#allocation42_spill] sm:$0xff] %v6671_v22  ;;  %v8712_v0 = vld [vmem:[#allocation58_spill] sm:$0xff]  ;;  %v8714_v11 = vld [vmem:[#allocation59_spill] sm:$0xff] }
 0x2f5   :  { %v6683_v23 = vmul.f32 %v6412_v51, %v8712_v0  ;;  %v6687_v21 = vmul.f32 %v6408_v45, %v8714_v11  ;;  %v8718_v22 = vld [vmem:[#allocation61_spill] sm:$0xff]  ;;  %8720 = vst [vmem:[#allocation48_spill] sm:$0xff] %v6699_v52  ;;  %v6703_v0 = vmul.f32 %v6408_v45, %v5515_v60  ;;  %v8728_v52 = vld [vmem:[#allocation66_spill] sm:$0xff] }
 0x2f6   :  { %8707 = vst [vmem:[#allocation41_spill] sm:$0xff] %v6667_v9  ;;  %v8716_v9 = vld [vmem:[#allocation60_spill] sm:$0xff]  ;;  %v6695_v53 = vmul.f32 %v6408_v45, %v8718_v22  ;;  %v6723_v60 = vmul.f32 %v6412_v51, %v8728_v52  ;;  %v6743_v52 = vmul.f32 %v6408_v45, %v5586_v15 }
 0x2f7   :  { %8713 = vst [vmem:[#allocation44_spill] sm:$0xff] %v6683_v23  ;;  %8715 = vst [vmem:[#allocation46_spill] sm:$0xff] %v6687_v21  ;;  %v6691_v41 = vmul.f32 %v6412_v51, %v8716_v9  ;;  %v8722_v23 = vld [vmem:[#allocation63_spill] sm:$0xff]  ;;  %v8724_v21 = vld [vmem:[#allocation64_spill] sm:$0xff] }
 0x2f8   :  { %8721 = vst [vmem:[#allocation49_spill] sm:$0xff] %v6703_v0  ;;  %v6707_v11 = vmul.f32 %v6412_v51, %v8722_v23  ;;  %v6711_v9 = vmul.f32 %v6408_v45, %v8724_v21  ;;  %8729 = vst [vmem:[#allocation53_spill] sm:$0xff] %v6723_v60  ;;  %v8730_v0 = vld [vmem:[#allocation45_spill] sm:$0xff]  ;;  %v8738_v60 = vld [vmem:[#allocation70_spill] sm:$0xff] }
 0x2f9   :  { %8717 = vst [vmem:[#allocation47_spill] sm:$0xff] %v6691_v41  ;;  %v8726_v41 = vld [vmem:[#allocation65_spill] sm:$0xff]  ;;  %v6727_v23 = vmul.f32 %v6408_v45, %v8730_v0  ;;  %8737 = vst [vmem:[#allocation57_spill] sm:$0xff] %v6743_v52  ;;  %v6747_v0 = vmul.f32 %v6412_v51, %v8738_v60  ;;  %v8747_v52 = vld [vmem:[#allocation74_spill] sm:$0xff] }
 0x2fa   :  { %8723 = vst [vmem:[#allocation50_spill] sm:$0xff] %v6707_v11  ;;  %8725 = vst [vmem:[#allocation51_spill] sm:$0xff] %v6711_v9  ;;  %v6715_v22 = vmul.f32 %v6412_v51, %v8726_v41  ;;  %v8732_v11 = vld [vmem:[#allocation67_spill] sm:$0xff]  ;;  %v8734_v9 = vld [vmem:[#allocation68_spill] sm:$0xff]  ;;  %v6767_v60 = vmul.f32 %v6408_v45, %v8747_v52 }
 0x2fb   :  { %8731 = vst [vmem:[#allocation54_spill] sm:$0xff] %v6727_v23  ;;  %v6731_v21 = vmul.f32 %v6412_v51, %v8732_v11  ;;  %v6735_v41 = vmul.f32 %v6408_v45, %v8734_v9  ;;  %8739 = vst [vmem:[#allocation58_spill] sm:$0xff] %v6747_v0  ;;  %v8740_v23 = vld [vmem:[#allocation71_spill] sm:$0xff] }
 0x2fc   :  { %8727 = vst [vmem:[#allocation52_spill] sm:$0xff] %v6715_v22  ;;  %v8735_v22 = vld [vmem:[#allocation69_spill] sm:$0xff]  ;;  %v6751_v11 = vmul.f32 %v6408_v45, %v8740_v23  ;;  %v8748_v0 = vld [vmem:[#allocation75_spill] sm:$0xff] }
 0x2fd   :  { %8733 = vst [vmem:[#allocation55_spill] sm:$0xff] %v6731_v21  ;;  %v6739_v48 = vmul.f32 %v6412_v51, %v8735_v22  ;;  %v8742_v21 = vld [vmem:[#allocation72_spill] sm:$0xff]  ;;  %v6759_v22 = vmul.f32 %v6408_v45, %v5614_v33  ;;  %v6771_v23 = vmul.f32 %v6412_v51, %v8748_v0  ;;  %v6791_v0 = vmul.f32 %v6408_v45, %v5671_v46 }
 0x2fe   :  { %8741 = vst [vmem:[#allocation59_spill] sm:$0xff] %v6751_v11  ;;  %v6755_v9 = vmul.f32 %v6412_v51, %v8742_v21  ;;  %v8750_v11 = vld [vmem:[#allocation76_spill] sm:$0xff] }
 0x2ff   :  { %8736 = vst [vmem:[#allocation56_spill] sm:$0xff] %v6739_v48  ;;  %8744 = vst [vmem:[#allocation61_spill] sm:$0xff] %v6759_v22  ;;  %v8745_v48 = vld [vmem:[#allocation73_spill] sm:$0xff]  ;;  %v6775_v21 = vmul.f32 %v6408_v45, %v8750_v11  ;;  %v8754_v22 = vld [vmem:[#allocation78_spill] sm:$0xff] }
 0x300   :  { %8743 = vst [vmem:[#allocation60_spill] sm:$0xff] %v6755_v9  ;;  %v6763_v15 = vmul.f32 %v6412_v51, %v8745_v48  ;;  %8749 = vst [vmem:[#allocation63_spill] sm:$0xff] %v6771_v23  ;;  %v8752_v9 = vld [vmem:[#allocation77_spill] sm:$0xff]  ;;  %v6783_v48 = vmul.f32 %v6408_v45, %v8754_v22  ;;  %v8759_v23 = vld [vmem:[#allocation80_spill] sm:$0xff] }
 0x301   :  { %8751 = vst [vmem:[#allocation64_spill] sm:$0xff] %v6775_v21  ;;  %v6779_v33 = vmul.f32 %v6412_v51, %v8752_v9  ;;  %8758 = vst [vmem:[#allocation67_spill] sm:$0xff] %v6791_v0  ;;  %v6795_v11 = vmul.f32 %v6412_v51, %v8759_v23  ;;  %v8761_v21 = vld [vmem:[#allocation81_spill] sm:$0xff] }
 0x302   :  { %8746 = vst [vmem:[#allocation62_spill] sm:$0xff] %v6763_v15  ;;  %8755 = vst [vmem:[#allocation66_spill] sm:$0xff] %v6783_v48  ;;  %v8756_v15 = vld [vmem:[#allocation79_spill] sm:$0xff]  ;;  %v6799_v9 = vmul.f32 %v6408_v45, %v8761_v21  ;;  %v8767_v0 = vld [vmem:[#allocation85_spill] sm:$0xff] }
 0x303   :  { %8753 = vst [vmem:[#allocation65_spill] sm:$0xff] %v6779_v33  ;;  %v6787_v52 = vmul.f32 %v6412_v51, %v8756_v15  ;;  %8760 = vst [vmem:[#allocation68_spill] sm:$0xff] %v6795_v11  ;;  %v8762_v33 = vld [vmem:[#allocation82_spill] sm:$0xff]  ;;  %v8764_v48 = vld [vmem:[#allocation83_spill] sm:$0xff]  ;;  %v6815_v23 = vmul.f32 %v6408_v45, %v8767_v0 }
 0x304   :  { %v6803_v22 = vmul.f32 %v6412_v51, %v8762_v33  ;;  %v6807_v15 = vmul.f32 %v6408_v45, %v8764_v48  ;;  %v8768_v11 = vld [vmem:[#allocation86_spill] sm:$0xff]  ;;  %v6823_v33 = vmul.f32 %v6408_v45, %v5728_v58 }
 0x305   :  { %8757 = vst [vmem:[#allocation45_spill] sm:$0xff] %v6787_v52  ;;  %v8765_v52 = vld [vmem:[#allocation84_spill] sm:$0xff]  ;;  %v6819_v21 = vmul.f32 %v6412_v51, %v8768_v11  ;;  %v6839_v11 = vmul.f32 %v6408_v45, %v5754_v30 }
 0x306   :  { %8763 = vst [vmem:[#allocation69_spill] sm:$0xff] %v6803_v22  ;;  %v6811_v46 = vmul.f32 %v6412_v51, %v8765_v52  ;;  %8770 = vst [vmem:[#allocation72_spill] sm:$0xff] %v6823_v33  ;;  %v8771_v22 = vld [vmem:[#allocation87_spill] sm:$0xff]  ;;  %v6831_v52 = vmul.f32 %v6408_v45, %v5734_v2  ;;  %v8779_v33 = vld [vmem:[#allocation90_spill] sm:$0xff] }
 0x307   :  { %8769 = vst [vmem:[#allocation71_spill] sm:$0xff] %v6819_v21  ;;  %v6827_v48 = vmul.f32 %v6412_v51, %v8771_v22  ;;  %8776 = vst [vmem:[#allocation76_spill] sm:$0xff] %v6839_v11  ;;  %v8777_v21 = vld [vmem:[#allocation89_spill] sm:$0xff]  ;;  %v6847_v22 = vmul.f32 %v6408_v45, %v8779_v33  ;;  %v8786_v11 = vld [vmem:[#allocation94_spill] sm:$0xff] }
 0x308   :  { %8766 = vst [vmem:[#allocation70_spill] sm:$0xff] %v6811_v46  ;;  %8773 = vst [vmem:[#allocation74_spill] sm:$0xff] %v6831_v52  ;;  %v8774_v46 = vld [vmem:[#allocation88_spill] sm:$0xff]  ;;  %v6843_v58 = vmul.f32 %v6412_v51, %v8777_v21  ;;  %v6863_v21 = vmul.f32 %v6408_v45, %v8786_v11 }
 0x309   :  { %8772 = vst [vmem:[#allocation73_spill] sm:$0xff] %v6827_v48  ;;  %v6835_v0 = vmul.f32 %v6412_v51, %v8774_v46  ;;  %v8780_v48 = vld [vmem:[#allocation91_spill] sm:$0xff]  ;;  %v8782_v52 = vld [vmem:[#allocation92_spill] sm:$0xff] }
 0x30a   :  { %8778 = vst [vmem:[#allocation77_spill] sm:$0xff] %v6843_v58  ;;  %v6851_v2 = vmul.f32 %v6412_v51, %v8780_v48  ;;  %v6855_v46 = vmul.f32 %v6408_v45, %v8782_v52  ;;  %8787 = vst [vmem:[#allocation81_spill] sm:$0xff] %v6863_v21  ;;  %v8788_v58 = vld [vmem:[#allocation95_spill] sm:$0xff]  ;;  %v6871_v48 = vmul.f32 %v6408_v45, %v5815_v55 }
 0x30b   :  { %8775 = vst [vmem:[#allocation75_spill] sm:$0xff] %v6835_v0  ;;  %v8784_v0 = vld [vmem:[#allocation93_spill] sm:$0xff]  ;;  %v6867_v33 = vmul.f32 %v6412_v51, %v8788_v58  ;;  %v8796_v21 = vld [vmem:[#allocation99_spill] sm:$0xff] }
 0x30c   :  { %8781 = vst [vmem:[#allocation78_spill] sm:$0xff] %v6851_v2  ;;  %8783 = vst [vmem:[#allocation79_spill] sm:$0xff] %v6855_v46  ;;  %v6859_v30 = vmul.f32 %v6412_v51, %v8784_v0  ;;  %v8791_v2 = vld [vmem:[#allocation96_spill] sm:$0xff]  ;;  %v8793_v46 = vld [vmem:[#allocation97_spill] sm:$0xff]  ;;  %v6887_v58 = vmul.f32 %v6408_v45, %v8796_v21 }
 0x30d   :  { %8789 = vst [vmem:[#allocation82_spill] sm:$0xff] %v6867_v33  ;;  %8790 = vst [vmem:[#allocation83_spill] sm:$0xff] %v6871_v48  ;;  %v6875_v52 = vmul.f32 %v6412_v51, %v8791_v2  ;;  %v6879_v0 = vmul.f32 %v6408_v45, %v8793_v46  ;;  %v8797_v33 = vld [vmem:[#allocation100_spill] sm:$0xff]  ;;  %v8799_v48 = vld [vmem:[#allocation101_spill] sm:$0xff] }
 0x30e   :  { %8785 = vst [vmem:[#allocation80_spill] sm:$0xff] %v6859_v30  ;;  %v8794_v30 = vld [vmem:[#allocation98_spill] sm:$0xff]  ;;  %v6891_v55 = vmul.f32 %v6412_v51, %v8797_v33  ;;  %v6895_v2 = vmul.f32 %v6408_v45, %v8799_v48  ;;  %v6911_v33 = vmul.f32 %v6408_v45, %v5880_v39 }
 0x30f   :  { %8792 = vst [vmem:[#allocation84_spill] sm:$0xff] %v6875_v52  ;;  %v6883_v11 = vmul.f32 %v6412_v51, %v8794_v30  ;;  %v8800_v52 = vld [vmem:[#allocation102_spill] sm:$0xff]  ;;  %v6903_v30 = vmul.f32 %v6408_v45, %v5871_v57 }
 0x310   :  { %8798 = vst [vmem:[#allocation86_spill] sm:$0xff] %v6891_v55  ;;  %v6899_v46 = vmul.f32 %v6412_v51, %v8800_v52  ;;  %8805 = vst [vmem:[#allocation90_spill] sm:$0xff] %v6911_v33  ;;  %v8806_v55 = vld [vmem:[#allocation104_spill] sm:$0xff]  ;;  %v6919_v52 = vmul.f32 %v6408_v45, %v5898_v35 }
 0x311   :  { %8795 = vst [vmem:[#allocation85_spill] sm:$0xff] %v6883_v11  ;;  %8802 = vst [vmem:[#allocation88_spill] sm:$0xff] %v6903_v30  ;;  %v8803_v11 = vld [vmem:[#allocation103_spill] sm:$0xff]  ;;  %v6915_v48 = vmul.f32 %v6412_v51, %v8806_v55  ;;  %v8811_v30 = vld [vmem:[#allocation106_spill] sm:$0xff] }
 0x312   :  { %8801 = vst [vmem:[#allocation87_spill] sm:$0xff] %v6899_v46  ;;  %v6907_v21 = vmul.f32 %v6412_v51, %v8803_v11  ;;  %8808 = vst [vmem:[#allocation92_spill] sm:$0xff] %v6919_v52  ;;  %v8809_v46 = vld [vmem:[#allocation105_spill] sm:$0xff]  ;;  %v6927_v11 = vmul.f32 %v6408_v45, %v8811_v30  ;;  %v8814_v33 = vld [vmem:[#allocation108_spill] sm:$0xff] }
 0x313   :  { %8807 = vst [vmem:[#allocation91_spill] sm:$0xff] %v6915_v48  ;;  %v6923_v57 = vmul.f32 %v6412_v51, %v8809_v46  ;;  %v6935_v55 = vmul.f32 %v6408_v45, %v8814_v33  ;;  %v8816_v48 = vld [vmem:[#allocation109_spill] sm:$0xff]  ;;  %v8818_v52 = vld [vmem:[#allocation110_spill] sm:$0xff] }
 0x314   :  { %8804 = vst [vmem:[#allocation89_spill] sm:$0xff] %v6907_v21  ;;  %v8812_v21 = vld [vmem:[#allocation107_spill] sm:$0xff]  ;;  %v6939_v35 = vmul.f32 %v6412_v51, %v8816_v48  ;;  %v6943_v46 = vmul.f32 %v6408_v45, %v8818_v52 }
 0x315   :  { %8810 = vst [vmem:[#allocation93_spill] sm:$0xff] %v6923_v57  ;;  %v6931_v39 = vmul.f32 %v6412_v51, %v8812_v21  ;;  %8815 = vst [vmem:[#allocation95_spill] sm:$0xff] %v6935_v55  ;;  %v8820_v57 = vld [vmem:[#allocation111_spill] sm:$0xff]  ;;  %v6951_v21 = vmul.f32 %v6408_v45, %v5954_v32  ;;  %v8825_v55 = vld [vmem:[#allocation113_spill] sm:$0xff] }
 0x316   :  { %8817 = vst [vmem:[#allocation96_spill] sm:$0xff] %v6939_v35  ;;  %8819 = vst [vmem:[#allocation97_spill] sm:$0xff] %v6943_v46  ;;  %v6947_v30 = vmul.f32 %v6412_v51, %v8820_v57  ;;  %v6959_v48 = vmul.f32 %v6408_v45, %v8825_v55  ;;  %v8826_v35 = vld [vmem:[#allocation114_spill] sm:$0xff]  ;;  %v8828_v46 = vld [vmem:[#allocation115_spill] sm:$0xff] }
 0x317   :  { %8813 = vst [vmem:[#allocation94_spill] sm:$0xff] %v6931_v39  ;;  %8822 = vst [vmem:[#allocation99_spill] sm:$0xff] %v6951_v21  ;;  %v8823_v39 = vld [vmem:[#allocation112_spill] sm:$0xff]  ;;  %v6963_v52 = vmul.f32 %v6412_v51, %v8826_v35  ;;  %v6967_v57 = vmul.f32 %v6408_v45, %v8828_v46  ;;  %v8830_v21 = vld [vmem:[#allocation117_spill] sm:$0xff]  ;;  %v6983_v35 = vmul.f32 %v6408_v45, %v6010_v26 }
 0x318   :  { %8821 = vst [vmem:[#allocation98_spill] sm:$0xff] %v6947_v30  ;;  %v6955_v33 = vmul.f32 %v6412_v51, %v8823_v39  ;;  %v8829_v30 = vld [vmem:[#allocation116_spill] sm:$0xff]  ;;  %v6975_v39 = vmul.f32 %v6408_v45, %v8830_v21  ;;  %v6995_v21 = vmul.f32 %v6412_v51, %v6024_v62 }
 0x319   :  { %8827 = vst [vmem:[#allocation101_spill] sm:$0xff] %v6963_v52  ;;  %v6971_v32 = vmul.f32 %v6412_v51, %v8829_v30  ;;  %8834 = vst [vmem:[#allocation104_spill] sm:$0xff] %v6983_v35  ;;  %v8835_v52 = vld [vmem:[#allocation119_spill] sm:$0xff]  ;;  %v6991_v30 = vmul.f32 %v6408_v45, %v6019_v36  ;;  %v8842_v35 = vld [vmem:[#allocation122_spill] sm:$0xff] }
 0x31a   :  { %8824 = vst [vmem:[#allocation100_spill] sm:$0xff] %v6955_v33  ;;  %8831 = vst [vmem:[#allocation102_spill] sm:$0xff] %v6975_v39  ;;  %v8832_v33 = vld [vmem:[#allocation118_spill] sm:$0xff]  ;;  %v6987_v46 = vmul.f32 %v6412_v51, %v8835_v52  ;;  %v8839_v39 = vld [vmem:[#allocation120_spill] sm:$0xff]  ;;  %v7007_v52 = vmul.f32 %v6408_v45, %v8842_v35 }
 0x31b   :  { %v6979_v55 = vmul.f32 %v6412_v51, %v8832_v33  ;;  %8837 = vst [vmem:[#allocation106_spill] sm:$0xff] %v6991_v30  ;;  %8838 = vst [vmem:[#allocation107_spill] sm:$0xff] %v6995_v21  ;;  %v6999_v33 = vmul.f32 %v6408_v45, %v8839_v39  ;;  %v8846_v30 = vld [vmem:[#allocation124_spill] sm:$0xff]  ;;  %v8847_v21 = vld [vmem:[#allocation125_spill] sm:$0xff] }
 0x31c   :  { %8836 = vst [vmem:[#allocation105_spill] sm:$0xff] %v6987_v46  ;;  %8843 = vst [vmem:[#allocation109_spill] sm:$0xff] %v7007_v52  ;;  %v8844_v46 = vld [vmem:[#allocation123_spill] sm:$0xff]  ;;  %v7015_v62 = vmul.f32 %v6408_v45, %v8846_v30  ;;  %v7019_v39 = vmul.f32 %v6412_v51, %v8847_v21  ;;  %v7039_v21 = vmul.f32 %v6408_v45, %v6102_v59 }
 0x31d   :  { %8833 = vst [vmem:[#allocation103_spill] sm:$0xff] %v6979_v55  ;;  %v8840_v55 = vld [vmem:[#allocation121_spill] sm:$0xff]  ;;  %v7011_v36 = vmul.f32 %v6412_v51, %v8844_v46  ;;  %v8851_v52 = vld [vmem:[#allocation127_spill] sm:$0xff] }
 0x31e   :  { %v7003_v26 = vmul.f32 %v6412_v51, %v8840_v55  ;;  %8848 = vst [vmem:[#allocation111_spill] sm:$0xff] %v7019_v39  ;;  %v7023_v55 = vmul.f32 %v6408_v45, %v6075_v1  ;;  %v7031_v46 = vmul.f32 %v6408_v45, %v8851_v52  ;;  %v8855_v39 = vld [vmem:[#allocation129_spill] sm:$0xff] }
 0x31f   :  { %8845 = vst [vmem:[#allocation110_spill] sm:$0xff] %v7011_v36  ;;  %v8853_v36 = vld [vmem:[#allocation128_spill] sm:$0xff]  ;;  %v7043_v1 = vmul.f32 %v6412_v51, %v8855_v39  ;;  %v7063_v39 = vmul.f32 %v6408_v45, %v6150_v27 }
 0x320   :  { %8841 = vst [vmem:[#allocation108_spill] sm:$0xff] %v7003_v26  ;;  %v8849_v26 = vld [vmem:[#allocation126_spill] sm:$0xff]  ;;  %8852 = vst [vmem:[#allocation113_spill] sm:$0xff] %v7031_v46  ;;  %v7035_v30 = vmul.f32 %v6412_v51, %v8853_v36  ;;  %v8860_v46 = vld [vmem:[#allocation131_spill] sm:$0xff] }
 0x321   :  { %v7027_v35 = vmul.f32 %v6412_v51, %v8849_v26  ;;  %8856 = vst [vmem:[#allocation115_spill] sm:$0xff] %v7043_v1  ;;  %v7047_v26 = vmul.f32 %v6408_v45, %v6122_v7  ;;  %v7055_v36 = vmul.f32 %v6408_v45, %v8860_v46  ;;  %8864 = vst [vmem:[#allocation120_spill] sm:$0xff] %v7063_v39  ;;  %v8865_v1 = vld [vmem:[#allocation133_spill] sm:$0xff]  ;;  %v8874_v39 = vld [vmem:[#allocation138_spill] sm:$0xff] }
 0x322   :  { %8854 = vst [vmem:[#allocation114_spill] sm:$0xff] %v7035_v30  ;;  %v8862_v30 = vld [vmem:[#allocation132_spill] sm:$0xff]  ;;  %v7067_v7 = vmul.f32 %v6412_v51, %v8865_v1  ;;  %v7087_v1 = vmul.f32 %v6408_v45, %v8874_v39 }
 0x323   :  { %8850 = vst [vmem:[#allocation112_spill] sm:$0xff] %v7027_v35  ;;  %8857 = vst [vmem:[#allocation116_spill] sm:$0xff] %v7047_v26  ;;  %v8858_v35 = vld [vmem:[#allocation130_spill] sm:$0xff]  ;;  %v7059_v59 = vmul.f32 %v6412_v51, %v8862_v30 }
 0x324   :  { %v7051_v52 = vmul.f32 %v6412_v51, %v8858_v35  ;;  %8861 = vst [vmem:[#allocation118_spill] sm:$0xff] %v7055_v36  ;;  %8866 = vst [vmem:[#allocation121_spill] sm:$0xff] %v7067_v7  ;;  %v8867_v26 = vld [vmem:[#allocation134_spill] sm:$0xff]  ;;  %v8871_v36 = vld [vmem:[#allocation136_spill] sm:$0xff] }
 0x325   :  { %8863 = vst [vmem:[#allocation119_spill] sm:$0xff] %v7059_v59  ;;  %v7071_v35 = vmul.f32 %v6408_v45, %v8867_v26  ;;  %v7079_v30 = vmul.f32 %v6408_v45, %v8871_v36  ;;  %v8872_v59 = vld [vmem:[#allocation137_spill] sm:$0xff]  ;;  %8875 = vst [vmem:[#allocation125_spill] sm:$0xff] %v7087_v1  ;;  %v8876_v7 = vld [vmem:[#allocation139_spill] sm:$0xff] }
 0x326   :  { %8859 = vst [vmem:[#allocation117_spill] sm:$0xff] %v7051_v52  ;;  %v8869_v52 = vld [vmem:[#allocation135_spill] sm:$0xff]  ;;  %v7083_v27 = vmul.f32 %v6412_v51, %v8872_v59  ;;  %v7091_v26 = vmul.f32 %v6412_v51, %v8876_v7  ;;  %v7103_v59 = vmul.f32 %v6408_v45, %v6216_v31 }
 0x327   :  { %8868 = vst [vmem:[#allocation122_spill] sm:$0xff] %v7071_v35  ;;  %v7075_v46 = vmul.f32 %v6412_v51, %v8869_v52  ;;  %v8878_v35 = vld [vmem:[#allocation140_spill] sm:$0xff]  ;;  %v8884_v1 = vld [vmem:[#allocation143_spill] sm:$0xff] }
 0x328   :  { %8873 = vst [vmem:[#allocation124_spill] sm:$0xff] %v7083_v27  ;;  %8877 = vst [vmem:[#allocation126_spill] sm:$0xff] %v7091_v26  ;;  %v7095_v52 = vmul.f32 %v6408_v45, %v8878_v35  ;;  %v8882_v27 = vld [vmem:[#allocation142_spill] sm:$0xff]  ;;  %v7111_v7 = vmul.f32 %v6408_v45, %v8884_v1  ;;  %v8886_v26 = vld [vmem:[#allocation144_spill] sm:$0xff] }
 0x329   :  { %8870 = vst [vmem:[#allocation123_spill] sm:$0xff] %v7075_v46  ;;  %v8879_v46 = vld [vmem:[#allocation141_spill] sm:$0xff]  ;;  %8881 = vst [vmem:[#allocation128_spill] sm:$0xff] %v7103_v59  ;;  %v7107_v39 = vmul.f32 %v6412_v51, %v8882_v27  ;;  %v7115_v35 = vmul.f32 %v6412_v51, %v8886_v26  ;;  %v8890_v59 = vld [vmem:[#allocation146_spill] sm:$0xff] }
 0x32a   :  { %v7099_v36 = vmul.f32 %v6412_v51, %v8879_v46  ;;  %8885 = vst [vmem:[#allocation130_spill] sm:$0xff] %v7111_v7  ;;  %v7119_v46 = vmul.f32 %v6408_v45, %v6245_v40  ;;  %v7127_v27 = vmul.f32 %v6408_v45, %v8890_v59  ;;  %v8893_v7 = vld [vmem:[#allocation148_spill] sm:$0xff] }
 0x32b   :  { %8883 = vst [vmem:[#allocation129_spill] sm:$0xff] %v7107_v39  ;;  %8887 = vst [vmem:[#allocation131_spill] sm:$0xff] %v7115_v35  ;;  %v8891_v39 = vld [vmem:[#allocation147_spill] sm:$0xff]  ;;  %v7135_v26 = vmul.f32 %v6408_v45, %v8893_v7  ;;  %v8895_v35 = vld [vmem:[#allocation149_spill] sm:$0xff] }
 0x32c   :  { %8880 = vst [vmem:[#allocation127_spill] sm:$0xff] %v7099_v36  ;;  %v8888_v36 = vld [vmem:[#allocation145_spill] sm:$0xff]  ;;  %v7131_v1 = vmul.f32 %v6412_v51, %v8891_v39  ;;  %v7139_v40 = vmul.f32 %v6412_v51, %v8895_v35  ;;  %v7151_v39 = vmul.f32 %v6408_v45, %v6300_v54 }
 0x32d   :  { %v7123_v31 = vmul.f32 %v6412_v51, %v8888_v36  ;;  %8894 = vst [vmem:[#allocation134_spill] sm:$0xff] %v7135_v26  ;;  %v7143_v36 = vmul.f32 %v6408_v45, %v6290_v19  ;;  %v8903_v26 = vld [vmem:[#allocation152_spill] sm:$0xff] }
 0x32e   :  { %8892 = vst [vmem:[#allocation133_spill] sm:$0xff] %v7131_v1  ;;  %8896 = vst [vmem:[#allocation135_spill] sm:$0xff] %v7139_v40  ;;  %v8901_v1 = vld [vmem:[#allocation151_spill] sm:$0xff]  ;;  %v7159_v35 = vmul.f32 %v6408_v45, %v8903_v26  ;;  %v8905_v40 = vld [vmem:[#allocation153_spill] sm:$0xff] }
 0x32f   :  { %8889 = vst [vmem:[#allocation132_spill] sm:$0xff] %v7123_v31  ;;  %8897 = vst [vmem:[#allocation136_spill] sm:$0xff] %v7143_v36  ;;  %v8898_v31 = vld [vmem:[#allocation150_spill] sm:$0xff]  ;;  %v7155_v7 = vmul.f32 %v6412_v51, %v8901_v1  ;;  %v7163_v19 = vmul.f32 %v6412_v51, %v8905_v40 }
 0x330   :  { %v7147_v59 = vmul.f32 %v6412_v51, %v8898_v31  ;;  %8900 = vst [vmem:[#allocation138_spill] sm:$0xff] %v7151_v39  ;;  %8904 = vst [vmem:[#allocation140_spill] sm:$0xff] %v7159_v35  ;;  %v8907_v36 = vld [vmem:[#allocation154_spill] sm:$0xff]  ;;  %v8911_v39 = vld [vmem:[#allocation156_spill] sm:$0xff] }
 0x331   :  { %8902 = vst [vmem:[#allocation139_spill] sm:$0xff] %v7155_v7  ;;  %8906 = vst [vmem:[#allocation141_spill] sm:$0xff] %v7163_v19  ;;  %v7167_v31 = vmul.f32 %v6408_v45, %v8907_v36  ;;  %v7175_v1 = vmul.f32 %v6408_v45, %v8911_v39  ;;  %v8913_v7 = vld [vmem:[#allocation157_spill] sm:$0xff]  ;;  %v8915_v35 = vld [vmem:[#allocation158_spill] sm:$0xff]  ;;  %v8920_v39 = vsub.s32 1, %v6398_v29 }
 0x332   :  { %8899 = vst [vmem:[#allocation137_spill] sm:$0xff] %v7147_v59  ;;  %v8909_v59 = vld [vmem:[#allocation155_spill] sm:$0xff]  ;;  %v7179_v26 = vmul.f32 %v6412_v51, %v8913_v7  ;;  %v7183_v40 = vmul.f32 %v6408_v45, %v8915_v35  ;;  %v8921_v7 = vld [vmem:[#allocation160_spill] sm:$0xff]  ;;  %v8922_v35 = vld [vmem:[#allocation161_spill] sm:$0xff] }
 0x333   :  { %8908 = vst [vmem:[#allocation142_spill] sm:$0xff] %v7167_v31  ;;  %v7171_v54 = vmul.f32 %v6412_v51, %v8909_v59  ;;  %8912 = vst [vmem:[#allocation144_spill] sm:$0xff] %v7175_v1  ;;  %v8917_v19 = vld [vmem:[#allocation159_spill] sm:$0xff]  ;;  %v8919_v31 = vsub.s32 0, %v6398_v29  ;;  %v7197_v1 = vrot.slane %v6527_v49, %v8920_v39 }
 0x334   :  { %8914 = vst [vmem:[#allocation145_spill] sm:$0xff] %v7179_v26  ;;  %8916 = vst [vmem:[#allocation146_spill] sm:$0xff] %v7183_v40  ;;  %v7187_v36 = vmul.f32 %v6412_v51, %v8917_v19  ;;  %v7201_v26 = vmul.f32 %v6408_v45, %v8921_v7  ;;  %v7205_v40 = vmul.f32 %v6412_v51, %v8922_v35  ;;  %v8923_v19 = vld [vmem:[#allocation162_spill] sm:$0xff] }
 0x335   :  { %8910 = vst [vmem:[#allocation143_spill] sm:$0xff] %v7171_v54  ;;  %v7192_v59 = vrot.slane %v6527_v49, %v8919_v31  ;;  %v8924_v54 = vld [vmem:[#allocation163_spill] sm:$0xff]  ;;  %v3715_v49 = vadd.f32 %v7197_v1, %v6422_v47  ;;  %v3717_v7 = vadd.f32 %v7197_v1, %v6430_v42  ;;  %v3719_v35 = vadd.f32 %v7197_v1, %v6438_v14 }
 0x336   :  { %8918 = vst [vmem:[#allocation147_spill] sm:$0xff] %v7187_v36  ;;  %v7209_v36 = vmul.f32 %v6408_v45, %v8923_v19  ;;  %v7213_v31 = vmul.f32 %v6412_v51, %v8924_v54  ;;  %v8928_v54 = vld [vmem:[#allocation8_spill] sm:$0xff] }
 0x337   :  { %v3714_v29 = vadd.f32 %v7192_v59, %v6418_v37  ;;  %v3716_v39 = vadd.f32 %v7192_v59, %v6426_v63  ;;  %v3718_v45 = vadd.f32 %v7192_v59, %v6434_v4  ;;  %v3720_v51 = vadd.f32 %v7192_v59, %v6442_v16  ;;  %3911 = vst.msk [vmem:[%s8297_s4 + $0x8] sm:$0xff] %vm2740_vm0, %v3715_v49 }
 0x338   :  { %v3721_v37 = vadd.f32 %v7197_v1, %v6446_v56  ;;  %v3722_v47 = vadd.f32 %v7192_v59, %v6450_v50  ;;  %v3723_v63 = vadd.f32 %v7197_v1, %v6454_v5  ;;  %v3724_v42 = vadd.f32 %v7192_v59, %v6458_v28  ;;  %3913 = vst.msk [vmem:[%s8297_s4 + $0x18] sm:$0xff] %vm2740_vm0, %v3717_v7  ;;  %v8925_v56 = vld [vmem:[#allocation5_spill] sm:$0xff]  ;;  %v8926_v5 = vld [vmem:[#allocation6_spill] sm:$0xff]  ;;  %v8931_v7 = vld [vmem:[#allocation11_spill] sm:$0xff] }
 0x339   :  { %v3725_v4 = vadd.f32 %v7197_v1, %v6462_v18  ;;  %3910 = vst [vmem:[%s8297_s4] sm:$0xff] %v3714_v29  ;;  %3912 = vst [vmem:[%s8297_s4 + $0x10] sm:$0xff] %v3716_v39  ;;  %v3726_v14 = vadd.f32 %v7192_v59, %v6466_v8  ;;  %v3727_v16 = vadd.f32 %v7197_v1, %v6470_v10  ;;  %v8927_v8 = vld [vmem:[#allocation7_spill] sm:$0xff]  ;;  %v8929_v29 = vld [vmem:[#allocation9_spill] sm:$0xff] }
 0x33a   :  { %v3728_v50 = vadd.f32 %v7192_v59, %v8925_v56  ;;  %v3729_v28 = vadd.f32 %v7197_v1, %v8926_v5  ;;  %3914 = vst [vmem:[%s8297_s4 + $0x20] sm:$0xff] %v3718_v45  ;;  %3915 = vst.msk [vmem:[%s8297_s4 + $0x28] sm:$0xff] %vm2740_vm0, %v3719_v35  ;;  %v3730_v18 = vadd.f32 %v7192_v59, %v6485_v43  ;;  %v8930_v43 = vld [vmem:[#allocation10_spill] sm:$0xff]  ;;  %v8932_v35 = vld [vmem:[#allocation12_spill] sm:$0xff] }
 0x33b   :  { %3916 = vst [vmem:[%s8297_s4 + $0x30] sm:$0xff] %v3720_v51  ;;  %3917 = vst.msk [vmem:[%s8297_s4 + $0x38] sm:$0xff] %vm2740_vm0, %v3721_v37  ;;  %v3731_v10 = vadd.f32 %v7197_v1, %v8927_v8  ;;  %v3732_v19 = vadd.f32 %v7192_v59, %v8928_v54  ;;  %v3733_v49 = vadd.f32 %v7197_v1, %v8929_v29  ;;  %v8933_v37 = vld [vmem:[#allocation13_spill] sm:$0xff]  ;;  %v8936_v5 = vld [vmem:[#allocation16_spill] sm:$0xff] }
 0x33c   :  { %3918 = vst [vmem:[%s8297_s4 + $0x40] sm:$0xff] %v3722_v47  ;;  %3919 = vst.msk [vmem:[%s8297_s4 + $0x48] sm:$0xff] %vm2740_vm0, %v3723_v63  ;;  %v3734_v39 = vadd.f32 %v7192_v59, %v8930_v43  ;;  %v3735_v45 = vadd.f32 %v7197_v1, %v8931_v7  ;;  %v3736_v51 = vadd.f32 %v7192_v59, %v8932_v35  ;;  %v8934_v63 = vld [vmem:[#allocation14_spill] sm:$0xff]  ;;  %v8939_v8 = vld [vmem:[#allocation19_spill] sm:$0xff] }
 0x33d   :  { %3920 = vst [vmem:[%s8297_s4 + $0x50] sm:$0xff] %v3724_v42  ;;  %3921 = vst.msk [vmem:[%s8297_s4 + $0x58] sm:$0xff] %vm2740_vm0, %v3725_v4  ;;  %v3737_v47 = vadd.f32 %v7197_v1, %v8933_v37  ;;  %v3738_v42 = vadd.f32 %v7192_v59, %v8934_v63  ;;  %v8935_v4 = vld [vmem:[#allocation15_spill] sm:$0xff]  ;;  %v3740_v56 = vadd.f32 %v7192_v59, %v6525_v44  ;;  %v8937_v44 = vld [vmem:[#allocation17_spill] sm:$0xff] }
 0x33e   :  { %3922 = vst [vmem:[%s8297_s4 + $0x60] sm:$0xff] %v3726_v14  ;;  %3923 = vst.msk [vmem:[%s8297_s4 + $0x68] sm:$0xff] %vm2740_vm0, %v3727_v16  ;;  %v3739_v14 = vadd.f32 %v7197_v1, %v8935_v4  ;;  %v3741_v16 = vadd.f32 %v7197_v1, %v8936_v5  ;;  %v3744_v54 = vadd.f32 %v7192_v59, %v8939_v8  ;;  %v8940_v29 = vld [vmem:[#allocation20_spill] sm:$0xff]  ;;  %v8942_v43 = vld [vmem:[#allocation22_spill] sm:$0xff] }
 0x33f   :  { %3924 = vst [vmem:[%s8297_s4 + $0x70] sm:$0xff] %v3728_v50  ;;  %3925 = vst.msk [vmem:[%s8297_s4 + $0x78] sm:$0xff] %vm2740_vm0, %v3729_v28  ;;  %v3742_v50 = vadd.f32 %v7192_v59, %v8937_v44  ;;  %v8938_v28 = vld [vmem:[#allocation18_spill] sm:$0xff]  ;;  %v8943_v7 = vld [vmem:[#allocation23_spill] sm:$0xff]  ;;  %v3752_v4 = vadd.f32 %v7192_v59, %v6575_v13  ;;  %v3754_v13 = vadd.f32 %v7192_v59, %v6583_v3 }
 0x340   :  { %3926 = vst [vmem:[%s8297_s4 + $0x80] sm:$0xff] %v3730_v18  ;;  %3927 = vst.msk [vmem:[%s8297_s4 + $0x88] sm:$0xff] %vm2740_vm0, %v3731_v10  ;;  %v3743_v18 = vadd.f32 %v7197_v1, %v8938_v28  ;;  %v3745_v10 = vadd.f32 %v7197_v1, %v8940_v29  ;;  %v3748_v35 = vadd.f32 %v7192_v59, %v8943_v7  ;;  %v8944_v37 = vld [vmem:[#allocation24_spill] sm:$0xff]  ;;  %v8946_v63 = vld [vmem:[#allocation26_spill] sm:$0xff] }
 0x341   :  { %3928 = vst [vmem:[%s8297_s4 + $0x90] sm:$0xff] %v3732_v19  ;;  %3929 = vst.msk [vmem:[%s8297_s4 + $0x98] sm:$0xff] %vm2740_vm0, %v3733_v49  ;;  %v8941_v19 = vld [vmem:[#allocation21_spill] sm:$0xff]  ;;  %v8947_v5 = vld [vmem:[#allocation27_spill] sm:$0xff] }
 0x342   :  { %3930 = vst [vmem:[%s8297_s4 + $0xa0] sm:$0xff] %v3734_v39  ;;  %3931 = vst.msk [vmem:[%s8297_s4 + $0xa8] sm:$0xff] %vm2740_vm0, %v3735_v45  ;;  %v3746_v49 = vadd.f32 %v7192_v59, %v8941_v19  ;;  %v3747_v39 = vadd.f32 %v7197_v1, %v8942_v43  ;;  %v3749_v45 = vadd.f32 %v7197_v1, %v8944_v37  ;;  %v8948_v44 = vld [vmem:[#allocation28_spill] sm:$0xff]  ;;  %v8949_v3 = vld [vmem:[#allocation29_spill] sm:$0xff] }
 0x343   :  { %3932 = vst [vmem:[%s8297_s4 + $0xb0] sm:$0xff] %v3736_v51  ;;  %3933 = vst.msk [vmem:[%s8297_s4 + $0xb8] sm:$0xff] %vm2740_vm0, %v3737_v47  ;;  %v8945_v51 = vld [vmem:[#allocation25_spill] sm:$0xff]  ;;  %v3764_v43 = vadd.f32 %v7192_v59, %v6623_v12  ;;  %v8954_v12 = vld [vmem:[#allocation34_spill] sm:$0xff] }
 0x344   :  { %3934 = vst [vmem:[%s8297_s4 + $0xc0] sm:$0xff] %v3738_v42  ;;  %3935 = vst.msk [vmem:[%s8297_s4 + $0xc8] sm:$0xff] %vm2740_vm0, %v3739_v14  ;;  %v3750_v47 = vadd.f32 %v7192_v59, %v8945_v51  ;;  %v3751_v42 = vadd.f32 %v7197_v1, %v8946_v63  ;;  %v3753_v14 = vadd.f32 %v7197_v1, %v8947_v5  ;;  %v8953_v19 = vld [vmem:[#allocation33_spill] sm:$0xff]  ;;  %v8955_v7 = vld [vmem:[#allocation35_spill] sm:$0xff] }
 0x345   :  { %3936 = vst [vmem:[%s8297_s4 + $0xd0] sm:$0xff] %v3740_v56  ;;  %3937 = vst.msk [vmem:[%s8297_s4 + $0xd8] sm:$0xff] %vm2740_vm0, %v3741_v16  ;;  %v3755_v56 = vadd.f32 %v7197_v1, %v6587_v6  ;;  %v3756_v16 = vadd.f32 %v7192_v59, %v6591_v34  ;;  %v3758_v6 = vadd.f32 %v7192_v59, %v8949_v3  ;;  %v8950_v34 = vld [vmem:[#allocation30_spill] sm:$0xff]  ;;  %v8956_v37 = vld [vmem:[#allocation36_spill] sm:$0xff] }
 0x346   :  { %3938 = vst [vmem:[%s8297_s4 + $0xe0] sm:$0xff] %v3742_v50  ;;  %3939 = vst.msk [vmem:[%s8297_s4 + $0xe8] sm:$0xff] %vm2740_vm0, %v3743_v18  ;;  %v3757_v50 = vadd.f32 %v7197_v1, %v8948_v44  ;;  %v3759_v28 = vadd.f32 %v7197_v1, %v8950_v34  ;;  %v8951_v18 = vld [vmem:[#allocation31_spill] sm:$0xff]  ;;  %v8964_v34 = vld [vmem:[#allocation44_spill] sm:$0xff] }
 0x347   :  { %3940 = vst [vmem:[%s8297_s4 + $0xf0] sm:$0xff] %v3744_v54  ;;  %3941 = vst.msk [vmem:[%s8297_s4 + $0xf8] sm:$0xff] %vm2740_vm0, %v3745_v10  ;;  %v3760_v8 = vadd.f32 %v7192_v59, %v8951_v18  ;;  %v8952_v54 = vld [vmem:[#allocation32_spill] sm:$0xff]  ;;  %v3762_v10 = vadd.f32 %v7192_v59, %v6615_v24  ;;  %v3766_v24 = vadd.f32 %v7192_v59, %v6631_v61  ;;  %v8957_v61 = vld [vmem:[#allocation37_spill] sm:$0xff] }
 0x348   :  { %3942 = vst [vmem:[%s8297_s4 + $0x100] sm:$0xff] %v3746_v49  ;;  %3943 = vst.msk [vmem:[%s8297_s4 + $0x108] sm:$0xff] %vm2740_vm0, %v3747_v39  ;;  %v3761_v29 = vadd.f32 %v7197_v1, %v8952_v54  ;;  %v3763_v49 = vadd.f32 %v7197_v1, %v8953_v19  ;;  %v3765_v39 = vadd.f32 %v7197_v1, %v6627_v17  ;;  %v8965_v18 = vld [vmem:[#allocation46_spill] sm:$0xff]  ;;  %v8966_v54 = vld [vmem:[#allocation47_spill] sm:$0xff] }
 0x349   :  { %3944 = vst [vmem:[%s8297_s4 + $0x110] sm:$0xff] %v3748_v35  ;;  %3945 = vst.msk [vmem:[%s8297_s4 + $0x118] sm:$0xff] %vm2740_vm0, %v3749_v45  ;;  %v3767_v17 = vadd.f32 %v7197_v1, %v8954_v12  ;;  %v3768_v35 = vadd.f32 %v7192_v59, %v8955_v7  ;;  %v3769_v45 = vadd.f32 %v7197_v1, %v8956_v37  ;;  %v8972_v37 = vld [vmem:[#allocation53_spill] sm:$0xff] }
 0x34a   :  { %3946 = vst [vmem:[%s8297_s4 + $0x120] sm:$0xff] %v3750_v47  ;;  %3947 = vst.msk [vmem:[%s8297_s4 + $0x128] sm:$0xff] %vm2740_vm0, %v3751_v42  ;;  %v3770_v51 = vadd.f32 %v7192_v59, %v8957_v61  ;;  %v8958_v47 = vld [vmem:[#allocation38_spill] sm:$0xff]  ;;  %v3772_v42 = vadd.f32 %v7192_v59, %v6655_v25  ;;  %v8960_v25 = vld [vmem:[#allocation40_spill] sm:$0xff] }
 0x34b   :  { %3948 = vst [vmem:[%s8297_s4 + $0x130] sm:$0xff] %v3752_v4  ;;  %3949 = vst.msk [vmem:[%s8297_s4 + $0x138] sm:$0xff] %vm2740_vm0, %v3753_v14  ;;  %v3771_v63 = vadd.f32 %v7197_v1, %v8958_v47  ;;  %v8959_v4 = vld [vmem:[#allocation39_spill] sm:$0xff]  ;;  %v3774_v14 = vadd.f32 %v7192_v59, %v8960_v25  ;;  %v8977_v25 = vld [vmem:[#allocation58_spill] sm:$0xff] }
 0x34c   :  { %3950 = vst [vmem:[%s8297_s4 + $0x140] sm:$0xff] %v3754_v13  ;;  %3951 = vst.msk [vmem:[%s8297_s4 + $0x148] sm:$0xff] %vm2740_vm0, %v3755_v56  ;;  %v3773_v5 = vadd.f32 %v7197_v1, %v8959_v4  ;;  %v8961_v13 = vld [vmem:[#allocation41_spill] sm:$0xff] }
 0x34d   :  { %3952 = vst [vmem:[%s8297_s4 + $0x150] sm:$0xff] %v3756_v16  ;;  %3953 = vst.msk [vmem:[%s8297_s4 + $0x158] sm:$0xff] %vm2740_vm0, %v3757_v50  ;;  %v3775_v56 = vadd.f32 %v7197_v1, %v8961_v13  ;;  %v8962_v16 = vld [vmem:[#allocation42_spill] sm:$0xff]  ;;  %v8963_v50 = vld [vmem:[#allocation43_spill] sm:$0xff] }
 0x34e   :  { %3954 = vst [vmem:[%s8297_s4 + $0x160] sm:$0xff] %v3758_v6  ;;  %3955 = vst.msk [vmem:[%s8297_s4 + $0x168] sm:$0xff] %vm2740_vm0, %v3759_v28  ;;  %v3776_v44 = vadd.f32 %v7192_v59, %v8962_v16  ;;  %v3777_v3 = vadd.f32 %v7197_v1, %v8963_v50  ;;  %v3778_v6 = vadd.f32 %v7192_v59, %v6679_v20  ;;  %v8978_v13 = vld [vmem:[#allocation59_spill] sm:$0xff]  ;;  %v8979_v16 = vld [vmem:[#allocation60_spill] sm:$0xff] }
 0x34f   :  { %3956 = vst [vmem:[%s8297_s4 + $0x170] sm:$0xff] %v3760_v8  ;;  %3957 = vst.msk [vmem:[%s8297_s4 + $0x178] sm:$0xff] %vm2740_vm0, %v3761_v29  ;;  %v3779_v28 = vadd.f32 %v7197_v1, %v8964_v34  ;;  %v3780_v8 = vadd.f32 %v7192_v59, %v8965_v18  ;;  %v3781_v29 = vadd.f32 %v7197_v1, %v8966_v54  ;;  %v8980_v50 = vld [vmem:[#allocation61_spill] sm:$0xff]  ;;  %v8982_v18 = vld [vmem:[#allocation63_spill] sm:$0xff] }
 0x350   :  { %3958 = vst [vmem:[%s8297_s4 + $0x180] sm:$0xff] %v3762_v10  ;;  %3959 = vst.msk [vmem:[%s8297_s4 + $0x188] sm:$0xff] %vm2740_vm0, %v3763_v49  ;;  %v3782_v20 = vadd.f32 %v7192_v59, %v6695_v53  ;;  %v8967_v10 = vld [vmem:[#allocation48_spill] sm:$0xff]  ;;  %v8968_v49 = vld [vmem:[#allocation49_spill] sm:$0xff] }
 0x351   :  { %3960 = vst [vmem:[%s8297_s4 + $0x190] sm:$0xff] %v3764_v43  ;;  %3961 = vst.msk [vmem:[%s8297_s4 + $0x198] sm:$0xff] %vm2740_vm0, %v3765_v39  ;;  %v3783_v19 = vadd.f32 %v7197_v1, %v8967_v10  ;;  %v3784_v43 = vadd.f32 %v7192_v59, %v8968_v49  ;;  %v8969_v39 = vld [vmem:[#allocation50_spill] sm:$0xff]  ;;  %v8970_v53 = vld [vmem:[#allocation51_spill] sm:$0xff] }
 0x352   :  { %3962 = vst [vmem:[%s8297_s4 + $0x1a0] sm:$0xff] %v3766_v24  ;;  %3963 = vst.msk [vmem:[%s8297_s4 + $0x1a8] sm:$0xff] %vm2740_vm0, %v3767_v17  ;;  %v3785_v24 = vadd.f32 %v7197_v1, %v8969_v39  ;;  %v3786_v12 = vadd.f32 %v7192_v59, %v8970_v53  ;;  %v8971_v17 = vld [vmem:[#allocation52_spill] sm:$0xff]  ;;  %v8985_v10 = vld [vmem:[#allocation66_spill] sm:$0xff] }
 0x353   :  { %3964 = vst [vmem:[%s8297_s4 + $0x1b0] sm:$0xff] %v3768_v35  ;;  %3965 = vst.msk [vmem:[%s8297_s4 + $0x1b8] sm:$0xff] %vm2740_vm0, %v3769_v45  ;;  %v3787_v7 = vadd.f32 %v7197_v1, %v8971_v17  ;;  %v3788_v35 = vadd.f32 %v7192_v59, %v6719_v38  ;;  %v3789_v45 = vadd.f32 %v7197_v1, %v8972_v37  ;;  %v8973_v38 = vld [vmem:[#allocation54_spill] sm:$0xff]  ;;  %v8986_v49 = vld [vmem:[#allocation45_spill] sm:$0xff] }
 0x354   :  { %3966 = vst [vmem:[%s8297_s4 + $0x1c0] sm:$0xff] %v3770_v51  ;;  %3967 = vst.msk [vmem:[%s8297_s4 + $0x1c8] sm:$0xff] %vm2740_vm0, %v3771_v63  ;;  %v3790_v61 = vadd.f32 %v7192_v59, %v8973_v38  ;;  %v8974_v51 = vld [vmem:[#allocation55_spill] sm:$0xff]  ;;  %v3792_v63 = vadd.f32 %v7192_v59, %v6735_v41  ;;  %v8976_v41 = vld [vmem:[#allocation57_spill] sm:$0xff]  ;;  %v3808_v17 = vadd.f32 %v7192_v59, %v6799_v9 }
 0x355   :  { %3968 = vst [vmem:[%s8297_s4 + $0x1d0] sm:$0xff] %v3772_v42  ;;  %3969 = vst.msk [vmem:[%s8297_s4 + $0x1d8] sm:$0xff] %vm2740_vm0, %v3773_v5  ;;  %v3791_v47 = vadd.f32 %v7197_v1, %v8974_v51  ;;  %v8975_v42 = vld [vmem:[#allocation56_spill] sm:$0xff]  ;;  %v3794_v5 = vadd.f32 %v7192_v59, %v8976_v41  ;;  %v8987_v39 = vld [vmem:[#allocation67_spill] sm:$0xff]  ;;  %v3810_v9 = vadd.f32 %v7192_v59, %v6807_v15 }
 0x356   :  { %3970 = vst [vmem:[%s8297_s4 + $0x1e0] sm:$0xff] %v3774_v14  ;;  %3971 = vst.msk [vmem:[%s8297_s4 + $0x1e8] sm:$0xff] %vm2740_vm0, %v3775_v56  ;;  %v3793_v4 = vadd.f32 %v7197_v1, %v8975_v42  ;;  %v3795_v14 = vadd.f32 %v7197_v1, %v8977_v25  ;;  %v3796_v56 = vadd.f32 %v7192_v59, %v8978_v13  ;;  %v8988_v53 = vld [vmem:[#allocation68_spill] sm:$0xff]  ;;  %v8990_v37 = vld [vmem:[#allocation70_spill] sm:$0xff] }
 0x357   :  { %3972 = vst [vmem:[%s8297_s4 + $0x1f0] sm:$0xff] %v3776_v44  ;;  %3973 = vst.msk [vmem:[%s8297_s4 + $0x1f8] sm:$0xff] %vm2740_vm0, %v3777_v3  ;;  %v3797_v44 = vadd.f32 %v7197_v1, %v8979_v16  ;;  %v3798_v3 = vadd.f32 %v7192_v59, %v8980_v50  ;;  %v3812_v38 = vadd.f32 %v7192_v59, %v6815_v23  ;;  %v8992_v15 = vld [vmem:[#allocation72_spill] sm:$0xff]  ;;  %v8994_v42 = vld [vmem:[#allocation74_spill] sm:$0xff] }
 0x358   :  { %3974 = vst [vmem:[%s8297_s4 + $0x200] sm:$0xff] %v3778_v6  ;;  %3975 = vst.msk [vmem:[%s8297_s4 + $0x208] sm:$0xff] %vm2740_vm0, %v3779_v28  ;;  %v8981_v6 = vld [vmem:[#allocation62_spill] sm:$0xff]  ;;  %v3800_v28 = vadd.f32 %v7192_v59, %v6767_v60  ;;  %v8983_v60 = vld [vmem:[#allocation64_spill] sm:$0xff]  ;;  %v3814_v23 = vadd.f32 %v7192_v59, %v8992_v15  ;;  %v3820_v16 = vadd.f32 %v7192_v59, %v6847_v22 }
 0x359   :  { %3976 = vst [vmem:[%s8297_s4 + $0x210] sm:$0xff] %v3780_v8  ;;  %3977 = vst.msk [vmem:[%s8297_s4 + $0x218] sm:$0xff] %vm2740_vm0, %v3781_v29  ;;  %v3799_v34 = vadd.f32 %v7197_v1, %v8981_v6  ;;  %v3801_v8 = vadd.f32 %v7197_v1, %v8982_v18  ;;  %v3802_v54 = vadd.f32 %v7192_v59, %v8983_v60  ;;  %v8984_v29 = vld [vmem:[#allocation65_spill] sm:$0xff]  ;;  %v8995_v41 = vld [vmem:[#allocation75_spill] sm:$0xff] }
 0x35a   :  { %3978 = vst [vmem:[%s8297_s4 + $0x220] sm:$0xff] %v3782_v20  ;;  %3979 = vst.msk [vmem:[%s8297_s4 + $0x228] sm:$0xff] %vm2740_vm0, %v3783_v19  ;;  %v3803_v20 = vadd.f32 %v7197_v1, %v8984_v29  ;;  %v3804_v19 = vadd.f32 %v7192_v59, %v8985_v10  ;;  %v8996_v25 = vld [vmem:[#allocation76_spill] sm:$0xff]  ;;  %v8997_v13 = vld [vmem:[#allocation77_spill] sm:$0xff] }
 0x35b   :  { %3980 = vst [vmem:[%s8297_s4 + $0x230] sm:$0xff] %v3784_v43  ;;  %3981 = vst.msk [vmem:[%s8297_s4 + $0x238] sm:$0xff] %vm2740_vm0, %v3785_v24  ;;  %v3805_v43 = vadd.f32 %v7197_v1, %v8986_v49  ;;  %v3806_v24 = vadd.f32 %v7192_v59, %v8987_v39  ;;  %v8999_v22 = vld [vmem:[#allocation79_spill] sm:$0xff]  ;;  %v9000_v6 = vld [vmem:[#allocation80_spill] sm:$0xff] }
 0x35c   :  { %3982 = vst [vmem:[%s8297_s4 + $0x240] sm:$0xff] %v3786_v12  ;;  %3983 = vst.msk [vmem:[%s8297_s4 + $0x248] sm:$0xff] %vm2740_vm0, %v3787_v7  ;;  %v3807_v12 = vadd.f32 %v7197_v1, %v8988_v53  ;;  %v8989_v7 = vld [vmem:[#allocation69_spill] sm:$0xff]  ;;  %v9006_v39 = vld [vmem:[#allocation86_spill] sm:$0xff]  ;;  %v3832_v53 = vadd.f32 %v7192_v59, %v6895_v2 }
 0x35d   :  { %3984 = vst [vmem:[%s8297_s4 + $0x250] sm:$0xff] %v3788_v35  ;;  %3985 = vst.msk [vmem:[%s8297_s4 + $0x258] sm:$0xff] %vm2740_vm0, %v3789_v45  ;;  %v3809_v35 = vadd.f32 %v7197_v1, %v8989_v7  ;;  %v3811_v45 = vadd.f32 %v7197_v1, %v8990_v37  ;;  %v9005_v49 = vld [vmem:[#allocation85_spill] sm:$0xff] }
 0x35e   :  { %3986 = vst [vmem:[%s8297_s4 + $0x260] sm:$0xff] %v3790_v61  ;;  %3987 = vst.msk [vmem:[%s8297_s4 + $0x268] sm:$0xff] %vm2740_vm0, %v3791_v47  ;;  %v8991_v61 = vld [vmem:[#allocation71_spill] sm:$0xff]  ;;  %v8993_v47 = vld [vmem:[#allocation73_spill] sm:$0xff] }
 0x35f   :  { %3988 = vst [vmem:[%s8297_s4 + $0x270] sm:$0xff] %v3792_v63  ;;  %3989 = vst.msk [vmem:[%s8297_s4 + $0x278] sm:$0xff] %vm2740_vm0, %v3793_v4  ;;  %v3813_v51 = vadd.f32 %v7197_v1, %v8991_v61  ;;  %v3815_v63 = vadd.f32 %v7197_v1, %v8993_v47  ;;  %v3816_v4 = vadd.f32 %v7192_v59, %v8994_v42  ;;  %v9009_v7 = vld [vmem:[#allocation89_spill] sm:$0xff]  ;;  %v9012_v61 = vld [vmem:[#allocation92_spill] sm:$0xff] }
 0x360   :  { %3990 = vst [vmem:[%s8297_s4 + $0x280] sm:$0xff] %v3794_v5  ;;  %3991 = vst.msk [vmem:[%s8297_s4 + $0x288] sm:$0xff] %vm2740_vm0, %v3795_v14  ;;  %v3817_v5 = vadd.f32 %v7197_v1, %v8995_v41  ;;  %v3818_v14 = vadd.f32 %v7192_v59, %v8996_v25  ;;  %v9013_v15 = vld [vmem:[#allocation93_spill] sm:$0xff]  ;;  %v3840_v47 = vadd.f32 %v7192_v59, %v6927_v11  ;;  %v9015_v11 = vld [vmem:[#allocation95_spill] sm:$0xff] }
 0x361   :  { %3992 = vst [vmem:[%s8297_s4 + $0x290] sm:$0xff] %v3796_v56  ;;  %3993 = vst.msk [vmem:[%s8297_s4 + $0x298] sm:$0xff] %vm2740_vm0, %v3797_v44  ;;  %v3819_v56 = vadd.f32 %v7197_v1, %v8997_v13  ;;  %v8998_v44 = vld [vmem:[#allocation78_spill] sm:$0xff]  ;;  %v9016_v41 = vld [vmem:[#allocation96_spill] sm:$0xff] }
 0x362   :  { %3994 = vst [vmem:[%s8297_s4 + $0x2a0] sm:$0xff] %v3798_v3  ;;  %3995 = vst.msk [vmem:[%s8297_s4 + $0x2a8] sm:$0xff] %vm2740_vm0, %v3799_v34  ;;  %v3821_v50 = vadd.f32 %v7197_v1, %v8998_v44  ;;  %v3822_v3 = vadd.f32 %v7192_v59, %v8999_v22  ;;  %v3823_v34 = vadd.f32 %v7197_v1, %v9000_v6  ;;  %v9017_v25 = vld [vmem:[#allocation97_spill] sm:$0xff]  ;;  %v9018_v13 = vld [vmem:[#allocation98_spill] sm:$0xff] }
 0x363   :  { %3996 = vst [vmem:[%s8297_s4 + $0x2b0] sm:$0xff] %v3800_v28  ;;  %3997 = vst.msk [vmem:[%s8297_s4 + $0x2b8] sm:$0xff] %vm2740_vm0, %v3801_v8  ;;  %v9001_v28 = vld [vmem:[#allocation81_spill] sm:$0xff]  ;;  %v9002_v8 = vld [vmem:[#allocation82_spill] sm:$0xff] }
 0x364   :  { %3998 = vst [vmem:[%s8297_s4 + $0x2c0] sm:$0xff] %v3802_v54  ;;  %3999 = vst.msk [vmem:[%s8297_s4 + $0x2c8] sm:$0xff] %vm2740_vm0, %v3803_v20  ;;  %v3824_v18 = vadd.f32 %v7192_v59, %v9001_v28  ;;  %v3825_v60 = vadd.f32 %v7197_v1, %v9002_v8  ;;  %v9003_v54 = vld [vmem:[#allocation83_spill] sm:$0xff]  ;;  %v9004_v20 = vld [vmem:[#allocation84_spill] sm:$0xff]  ;;  %v3851_v28 = vadd.f32 %v7197_v1, %v6971_v32 }
 0x365   :  { %4000 = vst [vmem:[%s8297_s4 + $0x2d0] sm:$0xff] %v3804_v19  ;;  %4001 = vst.msk [vmem:[%s8297_s4 + $0x2d8] sm:$0xff] %vm2740_vm0, %v3805_v43  ;;  %v3826_v29 = vadd.f32 %v7192_v59, %v9003_v54  ;;  %v3827_v10 = vadd.f32 %v7197_v1, %v9004_v20  ;;  %v3828_v19 = vadd.f32 %v7192_v59, %v6879_v0  ;;  %v9021_v6 = vld [vmem:[#allocation101_spill] sm:$0xff] }
 0x366   :  { %4002 = vst [vmem:[%s8297_s4 + $0x2e0] sm:$0xff] %v3806_v24  ;;  %4003 = vst.msk [vmem:[%s8297_s4 + $0x2e8] sm:$0xff] %vm2740_vm0, %v3807_v12  ;;  %v3829_v43 = vadd.f32 %v7197_v1, %v9005_v49  ;;  %v3830_v0 = vadd.f32 %v7192_v59, %v6887_v58  ;;  %v3831_v24 = vadd.f32 %v7197_v1, %v9006_v39  ;;  %v9007_v12 = vld [vmem:[#allocation87_spill] sm:$0xff]  ;;  %v9008_v58 = vld [vmem:[#allocation88_spill] sm:$0xff] }
 0x367   :  { %4004 = vst [vmem:[%s8297_s4 + $0x2f0] sm:$0xff] %v3808_v17  ;;  %4005 = vst.msk [vmem:[%s8297_s4 + $0x2f8] sm:$0xff] %vm2740_vm0, %v3809_v35  ;;  %v3833_v17 = vadd.f32 %v7197_v1, %v9007_v12  ;;  %v3834_v2 = vadd.f32 %v7192_v59, %v9008_v58  ;;  %v3835_v35 = vadd.f32 %v7197_v1, %v9009_v7  ;;  %v9027_v49 = vld [vmem:[#allocation107_spill] sm:$0xff]  ;;  %v9028_v39 = vld [vmem:[#allocation108_spill] sm:$0xff] }
 0x368   :  { %4006 = vst [vmem:[%s8297_s4 + $0x300] sm:$0xff] %v3810_v9  ;;  %4007 = vst.msk [vmem:[%s8297_s4 + $0x308] sm:$0xff] %vm2740_vm0, %v3811_v45  ;;  %v9010_v9 = vld [vmem:[#allocation90_spill] sm:$0xff]  ;;  %v9011_v45 = vld [vmem:[#allocation91_spill] sm:$0xff] }
 0x369   :  { %4008 = vst [vmem:[%s8297_s4 + $0x310] sm:$0xff] %v3812_v38  ;;  %4009 = vst.msk [vmem:[%s8297_s4 + $0x318] sm:$0xff] %vm2740_vm0, %v3813_v51  ;;  %v3836_v37 = vadd.f32 %v7192_v59, %v9010_v9  ;;  %v3837_v38 = vadd.f32 %v7197_v1, %v9011_v45  ;;  %v3838_v51 = vadd.f32 %v7192_v59, %v9012_v61  ;;  %v9032_v9 = vld [vmem:[#allocation112_spill] sm:$0xff]  ;;  %v9034_v45 = vld [vmem:[#allocation114_spill] sm:$0xff] }
 0x36a   :  { %4010 = vst [vmem:[%s8297_s4 + $0x320] sm:$0xff] %v3814_v23  ;;  %4011 = vst.msk [vmem:[%s8297_s4 + $0x328] sm:$0xff] %vm2740_vm0, %v3815_v63  ;;  %v3839_v23 = vadd.f32 %v7197_v1, %v9013_v15  ;;  %v9014_v63 = vld [vmem:[#allocation94_spill] sm:$0xff]  ;;  %v3868_v61 = vadd.f32 %v7192_v59, %v7039_v21  ;;  %v9036_v21 = vld [vmem:[#allocation116_spill] sm:$0xff] }
 0x36b   :  { %4012 = vst [vmem:[%s8297_s4 + $0x330] sm:$0xff] %v3816_v4  ;;  %4013 = vst.msk [vmem:[%s8297_s4 + $0x338] sm:$0xff] %vm2740_vm0, %v3817_v5  ;;  %v3841_v42 = vadd.f32 %v7197_v1, %v9014_v63  ;;  %v3842_v4 = vadd.f32 %v7192_v59, %v9015_v11  ;;  %v3843_v5 = vadd.f32 %v7197_v1, %v9016_v41 }
 0x36c   :  { %4014 = vst [vmem:[%s8297_s4 + $0x340] sm:$0xff] %v3818_v14  ;;  %4015 = vst.msk [vmem:[%s8297_s4 + $0x348] sm:$0xff] %vm2740_vm0, %v3819_v56  ;;  %v3844_v14 = vadd.f32 %v7192_v59, %v9017_v25  ;;  %v3845_v56 = vadd.f32 %v7197_v1, %v9018_v13 }
 0x36d   :  { %4016 = vst [vmem:[%s8297_s4 + $0x350] sm:$0xff] %v3820_v16  ;;  %4017 = vst.msk [vmem:[%s8297_s4 + $0x358] sm:$0xff] %vm2740_vm0, %v3821_v50  ;;  %v9019_v16 = vld [vmem:[#allocation99_spill] sm:$0xff]  ;;  %v9020_v50 = vld [vmem:[#allocation100_spill] sm:$0xff] }
 0x36e   :  { %4018 = vst [vmem:[%s8297_s4 + $0x360] sm:$0xff] %v3822_v3  ;;  %4019 = vst.msk [vmem:[%s8297_s4 + $0x368] sm:$0xff] %vm2740_vm0, %v3823_v34  ;;  %v3846_v44 = vadd.f32 %v7192_v59, %v9019_v16  ;;  %v3847_v22 = vadd.f32 %v7197_v1, %v9020_v50  ;;  %v3848_v3 = vadd.f32 %v7192_v59, %v6959_v48 }
 0x36f   :  { %4020 = vst [vmem:[%s8297_s4 + $0x370] sm:$0xff] %v3824_v18  ;;  %4021 = vst.msk [vmem:[%s8297_s4 + $0x378] sm:$0xff] %vm2740_vm0, %v3825_v60  ;;  %v3849_v34 = vadd.f32 %v7197_v1, %v9021_v6  ;;  %v3850_v48 = vadd.f32 %v7192_v59, %v6967_v57  ;;  %v9022_v18 = vld [vmem:[#allocation102_spill] sm:$0xff]  ;;  %v9023_v60 = vld [vmem:[#allocation103_spill] sm:$0xff] }
 0x370   :  { %4022 = vst [vmem:[%s8297_s4 + $0x380] sm:$0xff] %v3826_v29  ;;  %4023 = vst.msk [vmem:[%s8297_s4 + $0x388] sm:$0xff] %vm2740_vm0, %v3827_v10  ;;  %v3852_v8 = vadd.f32 %v7192_v59, %v9022_v18  ;;  %v3853_v54 = vadd.f32 %v7197_v1, %v9023_v60  ;;  %v9024_v57 = vld [vmem:[#allocation104_spill] sm:$0xff]  ;;  %v9025_v29 = vld [vmem:[#allocation105_spill] sm:$0xff] }
 0x371   :  { %4024 = vst [vmem:[%s8297_s4 + $0x390] sm:$0xff] %v3828_v19  ;;  %4025 = vst.msk [vmem:[%s8297_s4 + $0x398] sm:$0xff] %vm2740_vm0, %v3829_v43  ;;  %v3854_v32 = vadd.f32 %v7192_v59, %v9024_v57  ;;  %v3855_v20 = vadd.f32 %v7197_v1, %v9025_v29  ;;  %v9026_v10 = vld [vmem:[#allocation106_spill] sm:$0xff]  ;;  %v3857_v43 = vadd.f32 %v7197_v1, %v9027_v49 }
 0x372   :  { %4026 = vst [vmem:[%s8297_s4 + $0x3a0] sm:$0xff] %v3830_v0  ;;  %4027 = vst.msk [vmem:[%s8297_s4 + $0x3a8] sm:$0xff] %vm2740_vm0, %v3831_v24  ;;  %v3856_v19 = vadd.f32 %v7192_v59, %v9026_v10  ;;  %v3858_v0 = vadd.f32 %v7192_v59, %v6999_v33  ;;  %v3859_v24 = vadd.f32 %v7197_v1, %v9028_v39  ;;  %v9051_v10 = vld [vmem:[#allocation131_spill] sm:$0xff]  ;;  %v9053_v39 = vld [vmem:[#allocation133_spill] sm:$0xff] }
 0x373   :  { %4028 = vst [vmem:[%s8297_s4 + $0x3b0] sm:$0xff] %v3832_v53  ;;  %4029 = vst.msk [vmem:[%s8297_s4 + $0x3b8] sm:$0xff] %vm2740_vm0, %v3833_v17  ;;  %v9029_v53 = vld [vmem:[#allocation109_spill] sm:$0xff]  ;;  %v9030_v17 = vld [vmem:[#allocation110_spill] sm:$0xff]  ;;  %v3862_v33 = vadd.f32 %v7192_v59, %v7015_v62  ;;  %v3888_v49 = vadd.f32 %v7192_v59, %v7119_v46  ;;  %v3890_v46 = vadd.f32 %v7192_v59, %v7127_v27 }
 0x374   :  { %4030 = vst [vmem:[%s8297_s4 + $0x3c0] sm:$0xff] %v3834_v2  ;;  %4031 = vst.msk [vmem:[%s8297_s4 + $0x3c8] sm:$0xff] %vm2740_vm0, %v3835_v35  ;;  %v3860_v12 = vadd.f32 %v7192_v59, %v9029_v53  ;;  %v3861_v58 = vadd.f32 %v7197_v1, %v9030_v17  ;;  %v9031_v2 = vld [vmem:[#allocation111_spill] sm:$0xff]  ;;  %v3864_v35 = vadd.f32 %v7192_v59, %v7023_v55  ;;  %v9033_v62 = vld [vmem:[#allocation113_spill] sm:$0xff] }
 0x375   :  { %4032 = vst [vmem:[%s8297_s4 + $0x3d0] sm:$0xff] %v3836_v37  ;;  %4033 = vst.msk [vmem:[%s8297_s4 + $0x3d8] sm:$0xff] %vm2740_vm0, %v3837_v38  ;;  %v3863_v7 = vadd.f32 %v7197_v1, %v9031_v2  ;;  %v3865_v37 = vadd.f32 %v7197_v1, %v9032_v9  ;;  %v3866_v55 = vadd.f32 %v7192_v59, %v9033_v62  ;;  %v9054_v53 = vld [vmem:[#allocation134_spill] sm:$0xff]  ;;  %v9055_v17 = vld [vmem:[#allocation135_spill] sm:$0xff] }
 0x376   :  { %4034 = vst [vmem:[%s8297_s4 + $0x3e0] sm:$0xff] %v3838_v51  ;;  %4035 = vst.msk [vmem:[%s8297_s4 + $0x3e8] sm:$0xff] %vm2740_vm0, %v3839_v23  ;;  %v3867_v38 = vadd.f32 %v7197_v1, %v9034_v45  ;;  %v9035_v51 = vld [vmem:[#allocation115_spill] sm:$0xff]  ;;  %v3870_v23 = vadd.f32 %v7192_v59, %v9036_v21  ;;  %v9056_v27 = vld [vmem:[#allocation136_spill] sm:$0xff] }
 0x377   :  { %4036 = vst [vmem:[%s8297_s4 + $0x3f0] sm:$0xff] %v3840_v47  ;;  %4037 = vst.msk [vmem:[%s8297_s4 + $0x3f8] sm:$0xff] %vm2740_vm0, %v3841_v42  ;;  %v3869_v15 = vadd.f32 %v7197_v1, %v9035_v51  ;;  %v9037_v47 = vld [vmem:[#allocation117_spill] sm:$0xff]  ;;  %v9038_v42 = vld [vmem:[#allocation118_spill] sm:$0xff] }
 0x378   :  { %4038 = vst [vmem:[%s8297_s4 + $0x400] sm:$0xff] %v3842_v4  ;;  %4039 = vst.msk [vmem:[%s8297_s4 + $0x408] sm:$0xff] %vm2740_vm0, %v3843_v5  ;;  %v3871_v63 = vadd.f32 %v7197_v1, %v9037_v47  ;;  %v3872_v11 = vadd.f32 %v7192_v59, %v9038_v42  ;;  %v9039_v4 = vld [vmem:[#allocation119_spill] sm:$0xff]  ;;  %v9040_v5 = vld [vmem:[#allocation120_spill] sm:$0xff] }
 0x379   :  { %4040 = vst [vmem:[%s8297_s4 + $0x410] sm:$0xff] %v3844_v14  ;;  %4041 = vst.msk [vmem:[%s8297_s4 + $0x418] sm:$0xff] %vm2740_vm0, %v3845_v56  ;;  %v3873_v41 = vadd.f32 %v7197_v1, %v9039_v4  ;;  %v3874_v25 = vadd.f32 %v7192_v59, %v9040_v5  ;;  %v9041_v14 = vld [vmem:[#allocation121_spill] sm:$0xff]  ;;  %v9042_v56 = vld [vmem:[#allocation122_spill] sm:$0xff] }
 0x37a   :  { %4042 = vst [vmem:[%s8297_s4 + $0x420] sm:$0xff] %v3846_v44  ;;  %4043 = vst.msk [vmem:[%s8297_s4 + $0x428] sm:$0xff] %vm2740_vm0, %v3847_v22  ;;  %v3875_v13 = vadd.f32 %v7197_v1, %v9041_v14  ;;  %v3876_v16 = vadd.f32 %v7192_v59, %v9042_v56  ;;  %v9043_v44 = vld [vmem:[#allocation123_spill] sm:$0xff]  ;;  %v3878_v22 = vadd.f32 %v7192_v59, %v7079_v30  ;;  %v9057_v2 = vld [vmem:[#allocation137_spill] sm:$0xff] }
 0x37b   :  { %4044 = vst [vmem:[%s8297_s4 + $0x430] sm:$0xff] %v3848_v3  ;;  %4045 = vst.msk [vmem:[%s8297_s4 + $0x438] sm:$0xff] %vm2740_vm0, %v3849_v34  ;;  %v3877_v50 = vadd.f32 %v7197_v1, %v9043_v44  ;;  %v9044_v3 = vld [vmem:[#allocation124_spill] sm:$0xff]  ;;  %v9045_v34 = vld [vmem:[#allocation125_spill] sm:$0xff]  ;;  %v3882_v30 = vadd.f32 %v7192_v59, %v7095_v52  ;;  %v3906_v14 = vadd.f32 %v7192_v59, %v7201_v26 }
 0x37c   :  { %4046 = vst [vmem:[%s8297_s4 + $0x440] sm:$0xff] %v3850_v48  ;;  %4047 = vst.msk [vmem:[%s8297_s4 + $0x448] sm:$0xff] %vm2740_vm0, %v3851_v28  ;;  %v3879_v6 = vadd.f32 %v7197_v1, %v9044_v3  ;;  %v3880_v48 = vadd.f32 %v7192_v59, %v9045_v34  ;;  %v9046_v28 = vld [vmem:[#allocation126_spill] sm:$0xff]  ;;  %v9063_v21 = vld [vmem:[#allocation143_spill] sm:$0xff]  ;;  %v3908_v56 = vadd.f32 %v7192_v59, %v7209_v36 }
 0x37d   :  { %4048 = vst [vmem:[%s8297_s4 + $0x450] sm:$0xff] %v3852_v8  ;;  %4049 = vst.msk [vmem:[%s8297_s4 + $0x458] sm:$0xff] %vm2740_vm0, %v3853_v54  ;;  %v3881_v18 = vadd.f32 %v7197_v1, %v9046_v28  ;;  %v9047_v8 = vld [vmem:[#allocation127_spill] sm:$0xff]  ;;  %v9048_v54 = vld [vmem:[#allocation128_spill] sm:$0xff] }
 0x37e   :  { %4050 = vst [vmem:[%s8297_s4 + $0x460] sm:$0xff] %v3854_v32  ;;  %4051 = vst.msk [vmem:[%s8297_s4 + $0x468] sm:$0xff] %vm2740_vm0, %v3855_v20  ;;  %v3883_v60 = vadd.f32 %v7197_v1, %v9047_v8  ;;  %v3884_v57 = vadd.f32 %v7192_v59, %v9048_v54  ;;  %v9049_v32 = vld [vmem:[#allocation129_spill] sm:$0xff]  ;;  %v9050_v52 = vld [vmem:[#allocation130_spill] sm:$0xff] }
 0x37f   :  { %4052 = vst [vmem:[%s8297_s4 + $0x470] sm:$0xff] %v3856_v19  ;;  %4053 = vst.msk [vmem:[%s8297_s4 + $0x478] sm:$0xff] %vm2740_vm0, %v3857_v43  ;;  %v3885_v29 = vadd.f32 %v7197_v1, %v9049_v32  ;;  %v3886_v20 = vadd.f32 %v7192_v59, %v9050_v52  ;;  %v3887_v19 = vadd.f32 %v7197_v1, %v9051_v10  ;;  %v9052_v43 = vld [vmem:[#allocation132_spill] sm:$0xff]  ;;  %v9062_v51 = vld [vmem:[#allocation142_spill] sm:$0xff] }
 0x380   :  { %4054 = vst [vmem:[%s8297_s4 + $0x480] sm:$0xff] %v3858_v0  ;;  %4055 = vst.msk [vmem:[%s8297_s4 + $0x488] sm:$0xff] %vm2740_vm0, %v3859_v24  ;;  %v3889_v0 = vadd.f32 %v7197_v1, %v9052_v43  ;;  %v3891_v24 = vadd.f32 %v7197_v1, %v9053_v39  ;;  %v9064_v47 = vld [vmem:[#allocation144_spill] sm:$0xff]  ;;  %v9065_v42 = vld [vmem:[#allocation145_spill] sm:$0xff] }
 0x381   :  { %4056 = vst [vmem:[%s8297_s4 + $0x490] sm:$0xff] %v3860_v12  ;;  %4057 = vst.msk [vmem:[%s8297_s4 + $0x498] sm:$0xff] %vm2740_vm0, %v3861_v58  ;;  %v3892_v12 = vadd.f32 %v7192_v59, %v9054_v53  ;;  %v3893_v58 = vadd.f32 %v7197_v1, %v9055_v17  ;;  %v9066_v4 = vld [vmem:[#allocation146_spill] sm:$0xff]  ;;  %v9067_v5 = vld [vmem:[#allocation147_spill] sm:$0xff] }
 0x382   :  { %4058 = vst [vmem:[%s8297_s4 + $0x4a0] sm:$0xff] %v3862_v33  ;;  %4059 = vst.msk [vmem:[%s8297_s4 + $0x4a8] sm:$0xff] %vm2740_vm0, %v3863_v7  ;;  %v3894_v33 = vadd.f32 %v7192_v59, %v9056_v27  ;;  %v3895_v7 = vadd.f32 %v7197_v1, %v9057_v2 }
 0x383   :  { %4060 = vst [vmem:[%s8297_s4 + $0x4b0] sm:$0xff] %v3864_v35  ;;  %4061 = vst.msk [vmem:[%s8297_s4 + $0x4b8] sm:$0xff] %vm2740_vm0, %v3865_v37  ;;  %v9058_v35 = vld [vmem:[#allocation138_spill] sm:$0xff]  ;;  %v9059_v37 = vld [vmem:[#allocation139_spill] sm:$0xff] }
 0x384   :  { %4062 = vst [vmem:[%s8297_s4 + $0x4c0] sm:$0xff] %v3866_v55  ;;  %4063 = vst.msk [vmem:[%s8297_s4 + $0x4c8] sm:$0xff] %vm2740_vm0, %v3867_v38  ;;  %v3896_v9 = vadd.f32 %v7192_v59, %v9058_v35  ;;  %v3897_v62 = vadd.f32 %v7197_v1, %v9059_v37  ;;  %v9060_v55 = vld [vmem:[#allocation140_spill] sm:$0xff]  ;;  %v9061_v38 = vld [vmem:[#allocation141_spill] sm:$0xff] }
 0x385   :  { %4064 = vst [vmem:[%s8297_s4 + $0x4d0] sm:$0xff] %v3868_v61  ;;  %4065 = vst.msk [vmem:[%s8297_s4 + $0x4d8] sm:$0xff] %vm2740_vm0, %v3869_v15  ;;  %v3898_v45 = vadd.f32 %v7192_v59, %v9060_v55  ;;  %v3899_v61 = vadd.f32 %v7197_v1, %v9061_v38  ;;  %v3900_v15 = vadd.f32 %v7192_v59, %v9062_v51 }
 0x386   :  { %4066 = vst [vmem:[%s8297_s4 + $0x4e0] sm:$0xff] %v3870_v23  ;;  %4067 = vst.msk [vmem:[%s8297_s4 + $0x4e8] sm:$0xff] %vm2740_vm0, %v3871_v63  ;;  %v3901_v23 = vadd.f32 %v7197_v1, %v9063_v21  ;;  %v3902_v63 = vadd.f32 %v7192_v59, %v9064_v47 }
 0x387   :  { %4068 = vst [vmem:[%s8297_s4 + $0x4f0] sm:$0xff] %v3872_v11  ;;  %4069 = vst.msk [vmem:[%s8297_s4 + $0x4f8] sm:$0xff] %vm2740_vm0, %v3873_v41  ;;  %v3903_v11 = vadd.f32 %v7197_v1, %v9065_v42  ;;  %v3904_v41 = vadd.f32 %v7192_v59, %v9066_v4 }
 0x388   :  { %4070 = vst [vmem:[%s8297_s4 + $0x500] sm:$0xff] %v3874_v25  ;;  %4071 = vst.msk [vmem:[%s8297_s4 + $0x508] sm:$0xff] %vm2740_vm0, %v3875_v13  ;;  %v3905_v25 = vadd.f32 %v7197_v1, %v9067_v5  ;;  %v3907_v13 = vadd.f32 %v7197_v1, %v7205_v40 }
 0x389   :  { %4072 = vst [vmem:[%s8297_s4 + $0x510] sm:$0xff] %v3876_v16  ;;  %4073 = vst.msk [vmem:[%s8297_s4 + $0x518] sm:$0xff] %vm2740_vm0, %v3877_v50  ;;  %v3909_v16 = vadd.f32 %v7197_v1, %v7213_v31 }
 0x38a   :  { %4074 = vst [vmem:[%s8297_s4 + $0x520] sm:$0xff] %v3878_v22  ;;  %4075 = vst.msk [vmem:[%s8297_s4 + $0x528] sm:$0xff] %vm2740_vm0, %v3879_v6 }
 0x38b   :  { %4076 = vst [vmem:[%s8297_s4 + $0x530] sm:$0xff] %v3880_v48  ;;  %4077 = vst.msk [vmem:[%s8297_s4 + $0x538] sm:$0xff] %vm2740_vm0, %v3881_v18 }
 0x38c   :  { %4078 = vst [vmem:[%s8297_s4 + $0x540] sm:$0xff] %v3882_v30  ;;  %4079 = vst.msk [vmem:[%s8297_s4 + $0x548] sm:$0xff] %vm2740_vm0, %v3883_v60 }
 0x38d   :  { %4080 = vst [vmem:[%s8297_s4 + $0x550] sm:$0xff] %v3884_v57  ;;  %4081 = vst.msk [vmem:[%s8297_s4 + $0x558] sm:$0xff] %vm2740_vm0, %v3885_v29 }
 0x38e   :  { %4082 = vst [vmem:[%s8297_s4 + $0x560] sm:$0xff] %v3886_v20  ;;  %4083 = vst.msk [vmem:[%s8297_s4 + $0x568] sm:$0xff] %vm2740_vm0, %v3887_v19 }
 0x38f   :  { %4084 = vst [vmem:[%s8297_s4 + $0x570] sm:$0xff] %v3888_v49  ;;  %4085 = vst.msk [vmem:[%s8297_s4 + $0x578] sm:$0xff] %vm2740_vm0, %v3889_v0 }
 0x390   :  { %4086 = vst [vmem:[%s8297_s4 + $0x580] sm:$0xff] %v3890_v46  ;;  %4087 = vst.msk [vmem:[%s8297_s4 + $0x588] sm:$0xff] %vm2740_vm0, %v3891_v24 }
 0x391   :  { %4088 = vst [vmem:[%s8297_s4 + $0x590] sm:$0xff] %v3892_v12  ;;  %4089 = vst.msk [vmem:[%s8297_s4 + $0x598] sm:$0xff] %vm2740_vm0, %v3893_v58 }
 0x392   :  { %4090 = vst [vmem:[%s8297_s4 + $0x5a0] sm:$0xff] %v3894_v33  ;;  %4091 = vst.msk [vmem:[%s8297_s4 + $0x5a8] sm:$0xff] %vm2740_vm0, %v3895_v7 }
 0x393   :  { %4092 = vst [vmem:[%s8297_s4 + $0x5b0] sm:$0xff] %v3896_v9  ;;  %4093 = vst.msk [vmem:[%s8297_s4 + $0x5b8] sm:$0xff] %vm2740_vm0, %v3897_v62 }
 0x394   :  { %4094 = vst [vmem:[%s8297_s4 + $0x5c0] sm:$0xff] %v3898_v45  ;;  %4095 = vst.msk [vmem:[%s8297_s4 + $0x5c8] sm:$0xff] %vm2740_vm0, %v3899_v61 }
 0x395   :  { %4096 = vst [vmem:[%s8297_s4 + $0x5d0] sm:$0xff] %v3900_v15  ;;  %4097 = vst.msk [vmem:[%s8297_s4 + $0x5d8] sm:$0xff] %vm2740_vm0, %v3901_v23 }
 0x396   :  { %4098 = vst [vmem:[%s8297_s4 + $0x5e0] sm:$0xff] %v3902_v63  ;;  %4099 = vst.msk [vmem:[%s8297_s4 + $0x5e8] sm:$0xff] %vm2740_vm0, %v3903_v11 }
 0x397   :  { %4100 = vst [vmem:[%s8297_s4 + $0x5f0] sm:$0xff] %v3904_v41  ;;  %4101 = vst.msk [vmem:[%s8297_s4 + $0x5f8] sm:$0xff] %vm2740_vm0, %v3905_v25 }
 0x398   :  { %4102 = vst [vmem:[%s8297_s4 + $0x600] sm:$0xff] %v3906_v14  ;;  %4103 = vst.msk [vmem:[%s8297_s4 + $0x608] sm:$0xff] %vm2740_vm0, %v3907_v13 }
 0x399   :  { %4104 = vst [vmem:[%s8297_s4 + $0x610] sm:$0xff] %v3908_v56  ;;  %4105 = vst.msk [vmem:[%s8297_s4 + $0x618] sm:$0xff] %vm2740_vm0, %v3909_v16 }
 0x39a   :  { %4110 = vsyncpa [#allocation3], 1 }

</bundles_post_ra>
